<compile_context>
chip_gen: v7x
topology: tpu7x:2x2x1
jax: 0.10.0
libtpu: 0.0.40
codegen_flags: <defaults>
</compile_context>

<pallas_src>
import functools

import jax
import jax.numpy as jnp
from jax.experimental import pallas as pl
from jax.experimental.pallas import tpu as pltpu

HIDDEN = 64
BN_EPS = 1e-5
_VMEM_LIMIT = 32 * 1024 * 1024  # safe on v5e/v6e/v7x scoped limits


def _round_up(x, m):
    return (x + m - 1) // m * m


# ---------------------------------------------------------------------------
# Kernel 1: fused matmul + per-output-channel affine + optional ReLU
# ---------------------------------------------------------------------------
def _matmul_kernel(x_ref, w_ref, scale_ref, shift_ref, o_ref, *, relu):
    acc = jnp.dot(x_ref[...].astype(jnp.bfloat16),
                  w_ref[...].astype(jnp.bfloat16),
                  preferred_element_type=jnp.float32)
    acc = acc * scale_ref[...] + shift_ref[...]
    if relu:
        acc = jnp.maximum(acc, 0.0)
    o_ref[...] = acc.astype(o_ref.dtype)


def fused_matmul(x, w, scale=None, shift=None, relu=False,
                 out_dtype=jnp.bfloat16, tile_m=256, tile_n=256):
    """(M,K) @ (K,N) * scale[N] + shift[N] (+ ReLU) on the MXU via Pallas.

    bf16 operands / f32 accumulate; tiled over (M, N) with masked tail tiles so
    no explicit host-side padding or slicing is needed.  K is kept un-tiled
    (it never exceeds 512 in this network).
    """
    M, K = x.shape
    K2, N = w.shape
    assert K == K2
    if scale is None:
        scale = jnp.ones((N,), jnp.float32)
    if shift is None:
        shift = jnp.zeros((N,), jnp.float32)
    scale = scale.astype(jnp.float32).reshape(1, N)
    shift = shift.astype(jnp.float32).reshape(1, N)

    tile_m = min(tile_m, _round_up(M, 8))
    tile_n = min(tile_n, _round_up(N, 128))
    grid = (pl.cdiv(M, tile_m), pl.cdiv(N, tile_n))

    return pl.pallas_call(
        functools.partial(_matmul_kernel, relu=relu),
        out_shape=jax.ShapeDtypeStruct((M, N), out_dtype),
        grid=grid,
        in_specs=[
            pl.BlockSpec((tile_m, K), lambda i, j: (i, 0)),
            pl.BlockSpec((K, tile_n), lambda i, j: (0, j)),
            pl.BlockSpec((1, tile_n), lambda i, j: (0, j)),
            pl.BlockSpec((1, tile_n), lambda i, j: (0, j)),
        ],
        out_specs=pl.BlockSpec((tile_m, tile_n), lambda i, j: (i, j)),
        compiler_params=pltpu.CompilerParams(
            dimension_semantics=("parallel", "parallel"),
            vmem_limit_bytes=_VMEM_LIMIT),
    )(x, w, scale, shift)


# ---------------------------------------------------------------------------
# BatchNorm folding (eval mode, running stats) + 1x1 conv wrapper
# ---------------------------------------------------------------------------
def _fold_bn(conv_bias, bn, cout):
    bias = (conv_bias if conv_bias is not None
            else jnp.zeros((cout,), jnp.float32)).astype(jnp.float32)
    if bn is None:
        return jnp.ones((cout,), jnp.float32), bias
    gamma, beta, mean, var = bn
    scale = gamma / jnp.sqrt(var + BN_EPS)
    shift = (bias - mean) * scale + beta
    return scale, shift


def conv1x1_bn_act(x_nhwc, w_oc_ic, bias, bn, relu,
                   out_dtype=jnp.bfloat16, pad_cout_to=None):
    """1x1 conv (PyTorch weight (Cout,Cin)) + folded BN + optional ReLU.

    `pad_cout_to` zero-pads the output channels inside the kernel (padded
    channels are exact zeros), keeping downstream tensors lane-dense.
    """
    B, H, W, Cin = x_nhwc.shape
    Cout = w_oc_ic.shape[0]
    scale, shift = _fold_bn(bias, bn, Cout)
    wt = jnp.transpose(w_oc_ic).astype(jnp.float32)          # (Cin, Cout)
    if pad_cout_to is not None and pad_cout_to > Cout:
        pad = pad_cout_to - Cout
        wt = jnp.pad(wt, ((0, 0), (0, pad)))
        scale = jnp.pad(scale, (0, pad), constant_values=1.0)
        shift = jnp.pad(shift, (0, pad))
        Cout = pad_cout_to
    y = fused_matmul(x_nhwc.reshape(B * H * W, Cin), wt, scale, shift,
                     relu=relu, out_dtype=out_dtype)
    return y.reshape(B, H, W, Cout)


# ---------------------------------------------------------------------------
# Kernel 2: 3x3 conv (padding=1) as 9 shifted in-VMEM matmuls (no im2col)
# ---------------------------------------------------------------------------
def _conv3x3_kernel(x_ref, w_ref, scale_ref, shift_ref, o_ref, *, rows, wp, relu):
    cout = w_ref.shape[2]
    acc = jnp.zeros((rows, cout), jnp.float32)
    for t in range(9):                         # static unroll: 9 taps
        dh, dw = divmod(t, 3)
        patch = x_ref[0, pl.ds(dh * wp + dw, rows), :].astype(jnp.bfloat16)
        acc = acc + jnp.dot(patch, w_ref[t].astype(jnp.bfloat16),
                            preferred_element_type=jnp.float32)
    acc = acc * scale_ref[...] + shift_ref[...]
    if relu:
        acc = jnp.maximum(acc, 0.0)
    o_ref[0] = acc.astype(o_ref.dtype)


def conv3x3_bn_act(x_nhwc, w, bias, bn, relu, out_dtype=jnp.bfloat16):
    """3x3 conv, padding=1 (PyTorch weight (Cout,Cin,3,3)).

    The spatially zero-padded image is row-flattened to 2-D; each of the 9 taps
    is then a *contiguous* (H*(W+2), Cin) slab of that 2-D buffer, so the whole
    conv is 9 accumulated VMEM matmuls per image.  The two junk pad columns per
    output row are sliced away afterwards.
    """
    B, H, W, Cin = x_nhwc.shape
    Cout = w.shape[0]
    wp = W + 2
    rows = H * wp
    scale, shift = _fold_bn(bias, bn, Cout)
    scale = scale.reshape(1, Cout)
    shift = shift.reshape(1, Cout)

    # pad: 1 top / 1 left / 1 right, 2 rows at the bottom so every shifted slab
    # of the flattened image stays in bounds.
    xp = jnp.pad(x_nhwc, ((0, 0), (1, 2), (1, 1), (0, 0)))
    xf = xp.reshape(B, (H + 3) * wp, Cin)
    w9 = jnp.transpose(w, (2, 3, 1, 0)).reshape(9, Cin, Cout)   # t = kh*3 + kw

    out = pl.pallas_call(
        functools.partial(_conv3x3_kernel, rows=rows, wp=wp, relu=relu),
        out_shape=jax.ShapeDtypeStruct((B, rows, Cout), out_dtype),
        grid=(B,),
        in_specs=[
            pl.BlockSpec((1, (H + 3) * wp, Cin), lambda b: (b, 0, 0)),
            pl.BlockSpec((9, Cin, Cout), lambda b: (0, 0, 0)),
            pl.BlockSpec((1, Cout), lambda b: (0, 0)),
            pl.BlockSpec((1, Cout), lambda b: (0, 0)),
        ],
        out_specs=pl.BlockSpec((1, rows, Cout), lambda b: (b, 0, 0)),
        compiler_params=pltpu.CompilerParams(
            dimension_semantics=("parallel",),
            vmem_limit_bytes=_VMEM_LIMIT),
    )(xf, w9, scale, shift)
    return out.reshape(B, H, wp, Cout)[:, :, :W, :]


# ---------------------------------------------------------------------------
# Kernel 3: fused bilinear resize (align_corners=True) — Rh @ X @ kron(Rw^T, I)
# ---------------------------------------------------------------------------
def _interp_matrix(n_out, n_in):
    if n_in == 1:
        return jnp.ones((n_out, 1), jnp.float32)
    coords = jnp.arange(n_out, dtype=jnp.float32) * (n_in - 1) / max(n_out - 1, 1)
    lo = jnp.clip(jnp.floor(coords).astype(jnp.int32), 0, n_in - 2)
    frac = coords - lo.astype(jnp.float32)
    R = jnp.zeros((n_out, n_in), jnp.float32)
    R = R.at[jnp.arange(n_out), lo].set(1.0 - frac)
    R = R.at[jnp.arange(n_out), lo + 1].add(frac)
    return R


def _resize_kernel(rh_ref, rk_ref, x_ref, o_ref):
    x = x_ref[0].astype(jnp.float32)
    y = jnp.dot(rh_ref[...], x, preferred_element_type=jnp.float32)
    z = jnp.dot(y, rk_ref[...], preferred_element_type=jnp.float32)
    o_ref[0] = z.astype(o_ref.dtype)


def bilinear_resize(x_nhwc, Hout, Wout, out_dtype=None):
    """F.interpolate(mode='bilinear', align_corners=True), fused in one kernel.

    The W-interpolation matrix is expanded with kron(Rw^T, I_C) so both passes
    are plain 2-D matmuls on the row-major NHWC layout — one HBM read, one
    write, no transposes (fine here since C is small; the kron costs O(C) extra
    flops).
    """
    B, Hin, Win, C = x_nhwc.shape
    out_dtype = out_dtype or x_nhwc.dtype
    Rh = _interp_matrix(Hout, Hin)
    Rw = _interp_matrix(Wout, Win)
    Rk = jnp.kron(Rw.T, jnp.eye(C, dtype=jnp.float32))       # (Win*C, Wout*C)
    x2 = x_nhwc.reshape(B, Hin, Win * C)

    out = pl.pallas_call(
        _resize_kernel,
        out_shape=jax.ShapeDtypeStruct((B, Hout, Wout * C), out_dtype),
        grid=(B,),
        in_specs=[
            pl.BlockSpec((Hout, Hin), lambda b: (0, 0)),
            pl.BlockSpec((Win * C, Wout * C), lambda b: (0, 0)),
            pl.BlockSpec((1, Hin, Win * C), lambda b: (b, 0, 0)),
        ],
        out_specs=pl.BlockSpec((1, Hout, Wout * C), lambda b: (b, 0, 0)),
        compiler_params=pltpu.CompilerParams(
            dimension_semantics=("parallel",),
            vmem_limit_bytes=_VMEM_LIMIT),
    )(Rh, Rk, x2)
    return out.reshape(B, Hout, Wout, C)


# ---------------------------------------------------------------------------
# Deterministic synthetic backbone (TG takes an external backbone) producing
# {'low_level': /4 @ 64ch, 'out': /8 @ 512ch, 'aux': /8 @ 256ch}
# ---------------------------------------------------------------------------
def synthetic_backbone(x_nhwc, params):
    def pool(x, s):
        B, H, W, C = x.shape
        return x.reshape(B, H // s, s, W // s, s, C).mean(axis=(2, 4))

    feats = {}
    for name, stride in (("low_level", 4), ("out", 8), ("aux", 8)):
        p = pool(x_nhwc, stride)
        feats[name] = conv1x1_bn_act(
            p, params[f"bb_{name}_w"], params[f"bb_{name}_b"], None, relu=True)
    return feats


# ---------------------------------------------------------------------------
# Parameter init (deterministic, synthetic)
# ---------------------------------------------------------------------------
def _make_bn(key, c):
    k1, k2, k3, k4 = jax.random.split(key, 4)
    gamma = 1.0 + 0.1 * jax.random.normal(k1, (c,), jnp.float32)
    beta = 0.1 * jax.random.normal(k2, (c,), jnp.float32)
    mean = 0.1 * jax.random.normal(k3, (c,), jnp.float32)
    var = jnp.abs(1.0 + 0.1 * jax.random.normal(k4, (c,), jnp.float32))
    return (gamma, beta, mean, var)


def init_params(key, in_channels, num_classes):
    ks = jax.random.split(key, 16)

    def norm(k, shape, s=0.1):
        return s * jax.random.normal(k, shape, jnp.float32)

    p = {}
    # synthetic backbone 1x1 projections (in_channels -> C)
    p["bb_low_level_w"] = norm(ks[0], (HIDDEN, in_channels))
    p["bb_low_level_b"] = norm(ks[1], (HIDDEN,))
    p["bb_out_w"] = norm(ks[2], (HIDDEN * 8, in_channels))
    p["bb_out_b"] = norm(ks[3], (HIDDEN * 8,))
    p["bb_aux_w"] = norm(ks[4], (HIDDEN * 4, in_channels))
    p["bb_aux_b"] = norm(ks[5], (HIDDEN * 4,))
    # self.project: Conv2d(64, 48, 1, bias=False) + BN(48) + ReLU
    p["project_w"] = norm(ks[6], (48, HIDDEN))
    p["project_bn"] = _make_bn(ks[7], 48)
    # self.gland_head_project: Conv2d(512, 64, 1) + BN(64) + ReLU
    p["ghp_w"] = norm(ks[8], (HIDDEN, HIDDEN * 8))
    p["ghp_b"] = norm(ks[9], (HIDDEN,))
    p["ghp_bn"] = _make_bn(ks[10], HIDDEN)
    # self.classifier: Conv2d(112, 64, 3, pad=1, bias=False)+BN+ReLU, Conv2d(64, nc, 1)
    p["cls1_w"] = norm(ks[11], (HIDDEN, HIDDEN + 48, 3, 3))
    p["cls1_bn"] = _make_bn(ks[12], HIDDEN)
    p["cls2_w"] = norm(ks[13], (num_classes, HIDDEN))
    p["cls2_b"] = norm(ks[14], (num_classes,))
    return p


# ---------------------------------------------------------------------------
# TG.forward (eval mode): returns `gland` logits at input resolution (NCHW)
# ---------------------------------------------------------------------------
def tg_forward(x_nchw, params):
    B, C, H, W = x_nchw.shape
    x = jnp.transpose(x_nchw, (0, 2, 3, 1))  # NCHW -> NHWC

    feats = synthetic_backbone(x, params)

    # project: 64 -> 48 (+16 zero channels so the concat is 128 lanes wide)
    low_level_feat = conv1x1_bn_act(
        feats["low_level"], params["project_w"], None, params["project_bn"],
        relu=True, pad_cout_to=HIDDEN)

    gland_feats = conv1x1_bn_act(
        feats["out"], params["ghp_w"], params["ghp_b"], params["ghp_bn"], relu=True)

    gland = bilinear_resize(gland_feats,
                            low_level_feat.shape[1], low_level_feat.shape[2],
                            out_dtype=jnp.bfloat16)
    gland = jnp.concatenate([gland, low_level_feat], axis=-1)  # (B,h,w,128)

    # classifier conv1: weight Cin padded 112 -> 128 (matches the zero channels)
    cls1_w = jnp.pad(params["cls1_w"],
                     ((0, 0), (0, 2 * HIDDEN - (HIDDEN + 48)), (0, 0), (0, 0)))
    gland = conv3x3_bn_act(gland, cls1_w, None, params["cls1_bn"], relu=True)

    gland = conv1x1_bn_act(gland, params["cls2_w"], params["cls2_b"], None,
                           relu=False, out_dtype=jnp.float32)
    gland = bilinear_resize(gland, H, W, out_dtype=jnp.float32)

    return jnp.transpose(gland, (0, 3, 1, 2))  # NHWC -> NCHW


if __name__ == "__main__":
    key = jax.random.PRNGKey(0)
    kx, kp = jax.random.split(key)

    B, C, H, W = 2, 3, 32, 32
    num_classes = 3

    x = jax.random.normal(kx, (B, C, H, W), jnp.float32)
    params = init_params(kp, C, num_classes)

    out = jax.jit(tg_forward)(x, params)
    out = jax.block_until_ready(out)
    assert out.shape == (B, num_classes, H, W), out.shape
    assert bool(jnp.all(jnp.isfinite(out)))
    print("KERNEL_OK")
</pallas_src>

<mosaic_0001>
module attributes {stable_mosaic.version = 11 : i64} {
  func.func private @main(%arg0: i32) attributes {dimension_semantics = [#tpu.dimension_semantics<core_parallel>], iteration_bounds = array<i64: 2>, tpu.core_type = #tpu.core_type<sc_scalar_subcore>, window_params = []} {
    return
  }
}

module attributes {stable_mosaic.version = 11 : i64} {
  func.func private @main(%arg0: i32) attributes {dimension_semantics = [#tpu.dimension_semantics<core_parallel>], iteration_bounds = array<i64: 2>, tpu.core_type = #tpu.core_type<sc_scalar_subcore>, window_params = []} {
    return
  }
}

module attributes {stable_mosaic.version = 11 : i64} {
  func.func @_matmul_kernel(%arg0: i32, %arg1: i32, %arg2: memref<128x64xbf16, #tpu.memory_space<vmem>>, %arg3: memref<64x128xf32, #tpu.memory_space<vmem>>, %arg4: memref<1x128xf32, #tpu.memory_space<vmem>>, %arg5: memref<1x128xf32, #tpu.memory_space<vmem>>, %arg6: memref<128x128xbf16, #tpu.memory_space<vmem>>) attributes {dimension_semantics = [#tpu.dimension_semantics<parallel>, #tpu.dimension_semantics<parallel>], iteration_bounds = array<i64: 1, 1>, scalar_prefetch = 0 : i64, scratch_operands = 0 : i64, tpu.core_type = #tpu.core_type<tc>, window_params = [{transform_indices = @transform_0, window_bounds = array<i64: 128, 64>}, {transform_indices = @transform_1, window_bounds = array<i64: 64, 128>}, {transform_indices = @transform_2, window_bounds = array<i64: 1, 128>}, {transform_indices = @transform_3, window_bounds = array<i64: 1, 128>}, {transform_indices = @transform_4, window_bounds = array<i64: 128, 128>}]} {
    %c0 = arith.constant 0 : index
    %c0_0 = arith.constant 0 : index
    %0 = vector.load %arg2[%c0, %c0_0] : memref<128x64xbf16, #tpu.memory_space<vmem>>, vector<128x64xbf16>
    %c0_1 = arith.constant 0 : index
    %c0_2 = arith.constant 0 : index
    %1 = vector.load %arg3[%c0_1, %c0_2] : memref<64x128xf32, #tpu.memory_space<vmem>>, vector<64x128xf32>
    %2 = arith.truncf %1 : vector<64x128xf32> to vector<64x128xbf16>
    %cst = arith.constant dense<0.000000e+00> : vector<128x128xf32>
    %3 = tpu.matmul %0, %2, %cst {dimension_numbers = #tpu.dot_dimension_numbers<[1], [0], [0], [1], [0, 0, 1, 1], [], []>} : vector<128x64xbf16>, vector<64x128xbf16>, vector<128x128xf32> -> vector<128x128xf32>
    %c0_3 = arith.constant 0 : index
    %c0_4 = arith.constant 0 : index
    %4 = vector.load %arg4[%c0_3, %c0_4] : memref<1x128xf32, #tpu.memory_space<vmem>>, vector<1x128xf32>
    %5 = vector.broadcast %4 : vector<1x128xf32> to vector<128x128xf32>
    %6 = arith.mulf %3, %5 : vector<128x128xf32>
    %c0_5 = arith.constant 0 : index
    %c0_6 = arith.constant 0 : index
    %7 = vector.load %arg5[%c0_5, %c0_6] : memref<1x128xf32, #tpu.memory_space<vmem>>, vector<1x128xf32>
    %8 = vector.broadcast %7 : vector<1x128xf32> to vector<128x128xf32>
    %9 = arith.addf %6, %8 : vector<128x128xf32>
    %cst_7 = arith.constant 0.000000e+00 : f32
    %10 = vector.broadcast %cst_7 : f32 to vector<128x128xf32>
    %11 = arith.maximumf %9, %10 : vector<128x128xf32>
    %12 = arith.truncf %11 : vector<128x128xf32> to vector<128x128xbf16>
    %c0_8 = arith.constant 0 : index
    %c0_9 = arith.constant 0 : index
    %13 = vector.load %arg6[%c0_8, %c0_9] : memref<128x128xbf16, #tpu.memory_space<vmem>>, vector<128x128xbf16>
    tpu.vector_store %arg6[%c0_8, %c0_9], %12 {strides = array<i32>} : memref<128x128xbf16, #tpu.memory_space<vmem>>, vector<128x128xbf16>,
    return
  }
  func.func @transform_0(%arg0: i32, %arg1: i32) -> (i32, i32) {
    %c0_i32 = arith.constant 0 : i32
    %c0_i32_0 = arith.constant 0 : i32
    return %arg0, %c0_i32 : i32, i32
  }
  func.func @transform_1(%arg0: i32, %arg1: i32) -> (i32, i32) {
    %c0_i32 = arith.constant 0 : i32
    %c0_i32_0 = arith.constant 0 : i32
    return %c0_i32, %arg1 : i32, i32
  }
  func.func @transform_2(%arg0: i32, %arg1: i32) -> (i32, i32) {
    %c0_i32 = arith.constant 0 : i32
    %c0_i32_0 = arith.constant 0 : i32
    return %c0_i32, %arg1 : i32, i32
  }
  func.func @transform_3(%arg0: i32, %arg1: i32) -> (i32, i32) {
    %c0_i32 = arith.constant 0 : i32
    %c0_i32_0 = arith.constant 0 : i32
    return %c0_i32, %arg1 : i32, i32
  }
  func.func @transform_4(%arg0: i32, %arg1: i32) -> (i32, i32) {
    %c0_i32 = arith.constant 0 : i32
    return %arg0, %arg1 : i32, i32
  }
}

module attributes {stable_mosaic.version = 11 : i64} {
  func.func @_matmul_kernel(%arg0: i32, %arg1: i32, %arg2: memref<128x3xf32, #tpu.memory_space<vmem>>, %arg3: memref<3x128xf32, #tpu.memory_space<vmem>>, %arg4: memref<1x128xf32, #tpu.memory_space<vmem>>, %arg5: memref<1x128xf32, #tpu.memory_space<vmem>>, %arg6: memref<128x128xbf16, #tpu.memory_space<vmem>>) attributes {dimension_semantics = [#tpu.dimension_semantics<parallel>, #tpu.dimension_semantics<parallel>], iteration_bounds = array<i64: 1, 1>, scalar_prefetch = 0 : i64, scratch_operands = 0 : i64, tpu.core_type = #tpu.core_type<tc>, window_params = [{transform_indices = @transform_0, window_bounds = array<i64: 128, 3>}, {transform_indices = @transform_1, window_bounds = array<i64: 3, 128>}, {transform_indices = @transform_2, window_bounds = array<i64: 1, 128>}, {transform_indices = @transform_3, window_bounds = array<i64: 1, 128>}, {transform_indices = @transform_4, window_bounds = array<i64: 128, 128>}]} {
    %c0 = arith.constant 0 : index
    %c0_0 = arith.constant 0 : index
    %0 = vector.load %arg2[%c0, %c0_0] : memref<128x3xf32, #tpu.memory_space<vmem>>, vector<128x3xf32>
    %1 = arith.truncf %0 : vector<128x3xf32> to vector<128x3xbf16>
    %c0_1 = arith.constant 0 : index
    %c0_2 = arith.constant 0 : index
    %2 = vector.load %arg3[%c0_1, %c0_2] : memref<3x128xf32, #tpu.memory_space<vmem>>, vector<3x128xf32>
    %3 = arith.truncf %2 : vector<3x128xf32> to vector<3x128xbf16>
    %cst = arith.constant dense<0.000000e+00> : vector<128x128xf32>
    %4 = tpu.matmul %1, %3, %cst {dimension_numbers = #tpu.dot_dimension_numbers<[1], [0], [0], [1], [0, 0, 1, 1], [], []>} : vector<128x3xbf16>, vector<3x128xbf16>, vector<128x128xf32> -> vector<128x128xf32>
    %c0_3 = arith.constant 0 : index
    %c0_4 = arith.constant 0 : index
    %5 = vector.load %arg4[%c0_3, %c0_4] : memref<1x128xf32, #tpu.memory_space<vmem>>, vector<1x128xf32>
    %6 = vector.broadcast %5 : vector<1x128xf32> to vector<128x128xf32>
    %7 = arith.mulf %4, %6 : vector<128x128xf32>
    %c0_5 = arith.constant 0 : index
    %c0_6 = arith.constant 0 : index
    %8 = vector.load %arg5[%c0_5, %c0_6] : memref<1x128xf32, #tpu.memory_space<vmem>>, vector<1x128xf32>
    %9 = vector.broadcast %8 : vector<1x128xf32> to vector<128x128xf32>
    %10 = arith.addf %7, %9 : vector<128x128xf32>
    %cst_7 = arith.constant 0.000000e+00 : f32
    %11 = vector.broadcast %cst_7 : f32 to vector<128x128xf32>
    %12 = arith.maximumf %10, %11 : vector<128x128xf32>
    %13 = arith.truncf %12 : vector<128x128xf32> to vector<128x128xbf16>
    %c0_8 = arith.constant 0 : index
    %c0_9 = arith.constant 0 : index
    %14 = vector.load %arg6[%c0_8, %c0_9] : memref<128x128xbf16, #tpu.memory_space<vmem>>, vector<128x128xbf16>
    tpu.vector_store %arg6[%c0_8, %c0_9], %13 {strides = array<i32>} : memref<128x128xbf16, #tpu.memory_space<vmem>>, vector<128x128xbf16>,
    return
  }
  func.func @transform_0(%arg0: i32, %arg1: i32) -> (i32, i32) {
    %c0_i32 = arith.constant 0 : i32
    %c0_i32_0 = arith.constant 0 : i32
    return %arg0, %c0_i32 : i32, i32
  }
  func.func @transform_1(%arg0: i32, %arg1: i32) -> (i32, i32) {
    %c0_i32 = arith.constant 0 : i32
    %c0_i32_0 = arith.constant 0 : i32
    return %c0_i32, %arg1 : i32, i32
  }
  func.func @transform_2(%arg0: i32, %arg1: i32) -> (i32, i32) {
    %c0_i32 = arith.constant 0 : i32
    %c0_i32_0 = arith.constant 0 : i32
    return %c0_i32, %arg1 : i32, i32
  }
  func.func @transform_3(%arg0: i32, %arg1: i32) -> (i32, i32) {
    %c0_i32 = arith.constant 0 : i32
    %c0_i32_0 = arith.constant 0 : i32
    return %c0_i32, %arg1 : i32, i32
  }
  func.func @transform_4(%arg0: i32, %arg1: i32) -> (i32, i32) {
    %c0_i32 = arith.constant 0 : i32
    return %arg0, %arg1 : i32, i32
  }
}

module attributes {stable_mosaic.version = 11 : i64} {
  func.func @_matmul_kernel(%arg0: i32, %arg1: i32, %arg2: memref<32x512xbf16, #tpu.memory_space<vmem>>, %arg3: memref<512x128xf32, #tpu.memory_space<vmem>>, %arg4: memref<1x128xf32, #tpu.memory_space<vmem>>, %arg5: memref<1x128xf32, #tpu.memory_space<vmem>>, %arg6: memref<32x128xbf16, #tpu.memory_space<vmem>>) attributes {dimension_semantics = [#tpu.dimension_semantics<parallel>, #tpu.dimension_semantics<parallel>], iteration_bounds = array<i64: 1, 1>, scalar_prefetch = 0 : i64, scratch_operands = 0 : i64, tpu.core_type = #tpu.core_type<tc>, window_params = [{transform_indices = @transform_0, window_bounds = array<i64: 32, 512>}, {transform_indices = @transform_1, window_bounds = array<i64: 512, 128>}, {transform_indices = @transform_2, window_bounds = array<i64: 1, 128>}, {transform_indices = @transform_3, window_bounds = array<i64: 1, 128>}, {transform_indices = @transform_4, window_bounds = array<i64: 32, 128>}]} {
    %c0 = arith.constant 0 : index
    %c0_0 = arith.constant 0 : index
    %0 = vector.load %arg2[%c0, %c0_0] : memref<32x512xbf16, #tpu.memory_space<vmem>>, vector<32x512xbf16>
    %c0_1 = arith.constant 0 : index
    %c0_2 = arith.constant 0 : index
    %1 = vector.load %arg3[%c0_1, %c0_2] : memref<512x128xf32, #tpu.memory_space<vmem>>, vector<512x128xf32>
    %2 = arith.truncf %1 : vector<512x128xf32> to vector<512x128xbf16>
    %cst = arith.constant dense<0.000000e+00> : vector<32x128xf32>
    %3 = tpu.matmul %0, %2, %cst {dimension_numbers = #tpu.dot_dimension_numbers<[1], [0], [0], [1], [0, 0, 1, 1], [], []>} : vector<32x512xbf16>, vector<512x128xbf16>, vector<32x128xf32> -> vector<32x128xf32>
    %c0_3 = arith.constant 0 : index
    %c0_4 = arith.constant 0 : index
    %4 = vector.load %arg4[%c0_3, %c0_4] : memref<1x128xf32, #tpu.memory_space<vmem>>, vector<1x128xf32>
    %5 = vector.broadcast %4 : vector<1x128xf32> to vector<32x128xf32>
    %6 = arith.mulf %3, %5 : vector<32x128xf32>
    %c0_5 = arith.constant 0 : index
    %c0_6 = arith.constant 0 : index
    %7 = vector.load %arg5[%c0_5, %c0_6] : memref<1x128xf32, #tpu.memory_space<vmem>>, vector<1x128xf32>
    %8 = vector.broadcast %7 : vector<1x128xf32> to vector<32x128xf32>
    %9 = arith.addf %6, %8 : vector<32x128xf32>
    %cst_7 = arith.constant 0.000000e+00 : f32
    %10 = vector.broadcast %cst_7 : f32 to vector<32x128xf32>
    %11 = arith.maximumf %9, %10 : vector<32x128xf32>
    %12 = arith.truncf %11 : vector<32x128xf32> to vector<32x128xbf16>
    %c0_8 = arith.constant 0 : index
    %c0_9 = arith.constant 0 : index
    %13 = vector.load %arg6[%c0_8, %c0_9] : memref<32x128xbf16, #tpu.memory_space<vmem>>, vector<32x128xbf16>
    tpu.vector_store %arg6[%c0_8, %c0_9], %12 {strides = array<i32>} : memref<32x128xbf16, #tpu.memory_space<vmem>>, vector<32x128xbf16>,
    return
  }
  func.func @transform_0(%arg0: i32, %arg1: i32) -> (i32, i32) {
    %c0_i32 = arith.constant 0 : i32
    %c0_i32_0 = arith.constant 0 : i32
    return %arg0, %c0_i32 : i32, i32
  }
  func.func @transform_1(%arg0: i32, %arg1: i32) -> (i32, i32) {
    %c0_i32 = arith.constant 0 : i32
    %c0_i32_0 = arith.constant 0 : i32
    return %c0_i32, %arg1 : i32, i32
  }
  func.func @transform_2(%arg0: i32, %arg1: i32) -> (i32, i32) {
    %c0_i32 = arith.constant 0 : i32
    %c0_i32_0 = arith.constant 0 : i32
    return %c0_i32, %arg1 : i32, i32
  }
  func.func @transform_3(%arg0: i32, %arg1: i32) -> (i32, i32) {
    %c0_i32 = arith.constant 0 : i32
    %c0_i32_0 = arith.constant 0 : i32
    return %c0_i32, %arg1 : i32, i32
  }
  func.func @transform_4(%arg0: i32, %arg1: i32) -> (i32, i32) {
    %c0_i32 = arith.constant 0 : i32
    return %arg0, %arg1 : i32, i32
  }
}

module attributes {stable_mosaic.version = 11 : i64} {
  func.func @_matmul_kernel(%arg0: i32, %arg1: i32, %arg2: memref<32x3xf32, #tpu.memory_space<vmem>>, %arg3: memref<3x256xf32, #tpu.memory_space<vmem>>, %arg4: memref<1x256xf32, #tpu.memory_space<vmem>>, %arg5: memref<1x256xf32, #tpu.memory_space<vmem>>, %arg6: memref<32x256xbf16, #tpu.memory_space<vmem>>) attributes {dimension_semantics = [#tpu.dimension_semantics<parallel>, #tpu.dimension_semantics<parallel>], iteration_bounds = array<i64: 1, 2>, scalar_prefetch = 0 : i64, scratch_operands = 0 : i64, tpu.core_type = #tpu.core_type<tc>, window_params = [{transform_indices = @transform_0, window_bounds = array<i64: 32, 3>}, {transform_indices = @transform_1, window_bounds = array<i64: 3, 256>}, {transform_indices = @transform_2, window_bounds = array<i64: 1, 256>}, {transform_indices = @transform_3, window_bounds = array<i64: 1, 256>}, {transform_indices = @transform_4, window_bounds = array<i64: 32, 256>}]} {
    %c0 = arith.constant 0 : index
    %c0_0 = arith.constant 0 : index
    %0 = vector.load %arg2[%c0, %c0_0] : memref<32x3xf32, #tpu.memory_space<vmem>>, vector<32x3xf32>
    %1 = arith.truncf %0 : vector<32x3xf32> to vector<32x3xbf16>
    %c0_1 = arith.constant 0 : index
    %c0_2 = arith.constant 0 : index
    %2 = vector.load %arg3[%c0_1, %c0_2] : memref<3x256xf32, #tpu.memory_space<vmem>>, vector<3x256xf32>
    %3 = arith.truncf %2 : vector<3x256xf32> to vector<3x256xbf16>
    %cst = arith.constant dense<0.000000e+00> : vector<32x256xf32>
    %4 = tpu.matmul %1, %3, %cst {dimension_numbers = #tpu.dot_dimension_numbers<[1], [0], [0], [1], [0, 0, 1, 1], [], []>} : vector<32x3xbf16>, vector<3x256xbf16>, vector<32x256xf32> -> vector<32x256xf32>
    %c0_3 = arith.constant 0 : index
    %c0_4 = arith.constant 0 : index
    %5 = vector.load %arg4[%c0_3, %c0_4] : memref<1x256xf32, #tpu.memory_space<vmem>>, vector<1x256xf32>
    %6 = vector.broadcast %5 : vector<1x256xf32> to vector<32x256xf32>
    %7 = arith.mulf %4, %6 : vector<32x256xf32>
    %c0_5 = arith.constant 0 : index
    %c0_6 = arith.constant 0 : index
    %8 = vector.load %arg5[%c0_5, %c0_6] : memref<1x256xf32, #tpu.memory_space<vmem>>, vector<1x256xf32>
    %9 = vector.broadcast %8 : vector<1x256xf32> to vector<32x256xf32>
    %10 = arith.addf %7, %9 : vector<32x256xf32>
    %cst_7 = arith.constant 0.000000e+00 : f32
    %11 = vector.broadcast %cst_7 : f32 to vector<32x256xf32>
    %12 = arith.maximumf %10, %11 : vector<32x256xf32>
    %13 = arith.truncf %12 : vector<32x256xf32> to vector<32x256xbf16>
    %c0_8 = arith.constant 0 : index
    %c0_9 = arith.constant 0 : index
    %14 = vector.load %arg6[%c0_8, %c0_9] : memref<32x256xbf16, #tpu.memory_space<vmem>>, vector<32x256xbf16>
    tpu.vector_store %arg6[%c0_8, %c0_9], %13 {strides = array<i32>} : memref<32x256xbf16, #tpu.memory_space<vmem>>, vector<32x256xbf16>,
    return
  }
  func.func @transform_0(%arg0: i32, %arg1: i32) -> (i32, i32) {
    %c0_i32 = arith.constant 0 : i32
    %c0_i32_0 = arith.constant 0 : i32
    return %arg0, %c0_i32 : i32, i32
  }
  func.func @transform_1(%arg0: i32, %arg1: i32) -> (i32, i32) {
    %c0_i32 = arith.constant 0 : i32
    %c0_i32_0 = arith.constant 0 : i32
    return %c0_i32, %arg1 : i32, i32
  }
  func.func @transform_2(%arg0: i32, %arg1: i32) -> (i32, i32) {
    %c0_i32 = arith.constant 0 : i32
    %c0_i32_0 = arith.constant 0 : i32
    return %c0_i32, %arg1 : i32, i32
  }
  func.func @transform_3(%arg0: i32, %arg1: i32) -> (i32, i32) {
    %c0_i32 = arith.constant 0 : i32
    %c0_i32_0 = arith.constant 0 : i32
    return %c0_i32, %arg1 : i32, i32
  }
  func.func @transform_4(%arg0: i32, %arg1: i32) -> (i32, i32) {
    %c0_i32 = arith.constant 0 : i32
    return %arg0, %arg1 : i32, i32
  }
}

module attributes {stable_mosaic.version = 11 : i64} {
  func.func @_resize_kernel(%arg0: i32, %arg1: memref<8x4xf32, #tpu.memory_space<vmem>>, %arg2: memref<256x512xf32, #tpu.memory_space<vmem>>, %arg3: memref<1x4x256xbf16, #tpu.memory_space<vmem>>, %arg4: memref<1x8x512xbf16, #tpu.memory_space<vmem>>) attributes {dimension_semantics = [#tpu.dimension_semantics<parallel>], iteration_bounds = array<i64: 2>, scalar_prefetch = 0 : i64, scratch_operands = 0 : i64, tpu.core_type = #tpu.core_type<tc>, window_params = [{pipeline_mode = #tpu.pipeline_mode<synchronous>, transform_indices = @transform_0, window_bounds = array<i64: 8, 4>}, {pipeline_mode = #tpu.pipeline_mode<synchronous>, transform_indices = @transform_1, window_bounds = array<i64: 256, 512>}, {transform_indices = @transform_2, window_bounds = array<i64: 1, 4, 256>}, {transform_indices = @transform_3, window_bounds = array<i64: 1, 8, 512>}]} {
    %c0 = arith.constant 0 : index
    %c0_0 = arith.constant 0 : index
    %c0_1 = arith.constant 0 : index
    %0 = vector.load %arg3[%c0, %c0_0, %c0_1] : memref<1x4x256xbf16, #tpu.memory_space<vmem>>, vector<1x4x256xbf16>
    %1 = vector.shape_cast %0 : vector<1x4x256xbf16> to vector<4x256xbf16>
    %2 = arith.extf %1 : vector<4x256xbf16> to vector<4x256xf32>
    %c0_2 = arith.constant 0 : index
    %c0_3 = arith.constant 0 : index
    %3 = vector.load %arg1[%c0_2, %c0_3] : memref<8x4xf32, #tpu.memory_space<vmem>>, vector<8x4xf32>
    %cst = arith.constant dense<0.000000e+00> : vector<8x256xf32>
    %4 = tpu.matmul %3, %2, %cst {dimension_numbers = #tpu.dot_dimension_numbers<[1], [0], [0], [1], [0, 0, 1, 1], [], []>} : vector<8x4xf32>, vector<4x256xf32>, vector<8x256xf32> -> vector<8x256xf32>
    %c0_4 = arith.constant 0 : index
    %c0_5 = arith.constant 0 : index
    %5 = vector.load %arg2[%c0_4, %c0_5] : memref<256x512xf32, #tpu.memory_space<vmem>>, vector<256x512xf32>
    %cst_6 = arith.constant dense<0.000000e+00> : vector<8x512xf32>
    %6 = tpu.matmul %4, %5, %cst_6 {dimension_numbers = #tpu.dot_dimension_numbers<[1], [0], [0], [1], [0, 0, 1, 1], [], []>} : vector<8x256xf32>, vector<256x512xf32>, vector<8x512xf32> -> vector<8x512xf32>
    %7 = arith.truncf %6 : vector<8x512xf32> to vector<8x512xbf16>
    %c0_7 = arith.constant 0 : index
    %c0_8 = arith.constant 0 : index
    %c0_9 = arith.constant 0 : index
    %8 = vector.load %arg4[%c0_7, %c0_8, %c0_9] : memref<1x8x512xbf16, #tpu.memory_space<vmem>>, vector<1x8x512xbf16>
    %9 = vector.shape_cast %8 : vector<1x8x512xbf16> to vector<8x512xbf16>
    %10 = vector.shape_cast %7 : vector<8x512xbf16> to vector<1x8x512xbf16>
    tpu.vector_store %arg4[%c0_7, %c0_8, %c0_9], %10 {strides = array<i32>} : memref<1x8x512xbf16, #tpu.memory_space<vmem>>, vector<1x8x512xbf16>,
    return
  }
  func.func @transform_0(%arg0: i32) -> (i32, i32) {
    %c0_i32 = arith.constant 0 : i32
    %c0_i32_0 = arith.constant 0 : i32
    %c0_i32_1 = arith.constant 0 : i32
    return %c0_i32, %c0_i32_0 : i32, i32
  }
  func.func @transform_1(%arg0: i32) -> (i32, i32) {
    %c0_i32 = arith.constant 0 : i32
    %c0_i32_0 = arith.constant 0 : i32
    %c0_i32_1 = arith.constant 0 : i32
    return %c0_i32, %c0_i32_0 : i32, i32
  }
  func.func @transform_2(%arg0: i32) -> (i32, i32, i32) {
    %c0_i32 = arith.constant 0 : i32
    %c0_i32_0 = arith.constant 0 : i32
    %c0_i32_1 = arith.constant 0 : i32
    return %arg0, %c0_i32, %c0_i32_0 : i32, i32, i32
  }
  func.func @transform_3(%arg0: i32) -> (i32, i32, i32) {
    %c0_i32 = arith.constant 0 : i32
    %c0_i32_0 = arith.constant 0 : i32
    %c0_i32_1 = arith.constant 0 : i32
    return %arg0, %c0_i32, %c0_i32_0 : i32, i32, i32
  }
}

module attributes {stable_mosaic.version = 11 : i64} {
  func.func @_conv3x3_kernel(%arg0: i32, %arg1: memref<1x110x128xbf16, #tpu.memory_space<vmem>>, %arg2: memref<9x128x64xf32, #tpu.memory_space<vmem>>, %arg3: memref<1x64xf32, #tpu.memory_space<vmem>>, %arg4: memref<1x64xf32, #tpu.memory_space<vmem>>, %arg5: memref<1x80x64xbf16, #tpu.memory_space<vmem>>) attributes {dimension_semantics = [#tpu.dimension_semantics<parallel>], iteration_bounds = array<i64: 2>, scalar_prefetch = 0 : i64, scratch_operands = 0 : i64, tpu.core_type = #tpu.core_type<tc>, window_params = [{transform_indices = @transform_0, window_bounds = array<i64: 1, 110, 128>}, {pipeline_mode = #tpu.pipeline_mode<synchronous>, transform_indices = @transform_1, window_bounds = array<i64: 9, 128, 64>}, {pipeline_mode = #tpu.pipeline_mode<synchronous>, transform_indices = @transform_2, window_bounds = array<i64: 1, 64>}, {pipeline_mode = #tpu.pipeline_mode<synchronous>, transform_indices = @transform_3, window_bounds = array<i64: 1, 64>}, {transform_indices = @transform_4, window_bounds = array<i64: 1, 80, 64>}]} {
    %cst = arith.constant 0.000000e+00 : f32
    %0 = vector.broadcast %cst : f32 to vector<80x64xf32>
    %c0 = arith.constant 0 : index
    %c0_0 = arith.constant 0 : index
    %c0_1 = arith.constant 0 : index
    %1 = vector.load %arg1[%c0, %c0_0, %c0_1] : memref<1x110x128xbf16, #tpu.memory_space<vmem>>, vector<1x80x128xbf16>
    %2 = vector.shape_cast %1 : vector<1x80x128xbf16> to vector<80x128xbf16>
    %c0_2 = arith.constant 0 : index
    %c0_3 = arith.constant 0 : index
    %c0_4 = arith.constant 0 : index
    %3 = vector.load %arg2[%c0_2, %c0_3, %c0_4] : memref<9x128x64xf32, #tpu.memory_space<vmem>>, vector<1x128x64xf32>
    %4 = vector.shape_cast %3 : vector<1x128x64xf32> to vector<128x64xf32>
    %5 = arith.truncf %4 : vector<128x64xf32> to vector<128x64xbf16>
    %cst_5 = arith.constant dense<0.000000e+00> : vector<80x64xf32>
    %6 = tpu.matmul %2, %5, %cst_5 {dimension_numbers = #tpu.dot_dimension_numbers<[1], [0], [0], [1], [0, 0, 1, 1], [], []>} : vector<80x128xbf16>, vector<128x64xbf16>, vector<80x64xf32> -> vector<80x64xf32>
    %7 = arith.addf %0, %6 : vector<80x64xf32>
    %c0_6 = arith.constant 0 : index
    %c1 = arith.constant 1 : index
    %c0_7 = arith.constant 0 : index
    %8 = vector.load %arg1[%c0_6, %c1, %c0_7] : memref<1x110x128xbf16, #tpu.memory_space<vmem>>, vector<1x80x128xbf16>
    %9 = vector.shape_cast %8 : vector<1x80x128xbf16> to vector<80x128xbf16>
    %c1_8 = arith.constant 1 : index
    %c0_9 = arith.constant 0 : index
    %c0_10 = arith.constant 0 : index
    %10 = vector.load %arg2[%c1_8, %c0_9, %c0_10] : memref<9x128x64xf32, #tpu.memory_space<vmem>>, vector<1x128x64xf32>
    %11 = vector.shape_cast %10 : vector<1x128x64xf32> to vector<128x64xf32>
    %12 = arith.truncf %11 : vector<128x64xf32> to vector<128x64xbf16>
    %cst_11 = arith.constant dense<0.000000e+00> : vector<80x64xf32>
    %13 = tpu.matmul %9, %12, %cst_11 {dimension_numbers = #tpu.dot_dimension_numbers<[1], [0], [0], [1], [0, 0, 1, 1], [], []>} : vector<80x128xbf16>, vector<128x64xbf16>, vector<80x64xf32> -> vector<80x64xf32>
    %14 = arith.addf %7, %13 : vector<80x64xf32>
    %c0_12 = arith.constant 0 : index
    %c2 = arith.constant 2 : index
    %c0_13 = arith.constant 0 : index
    %15 = vector.load %arg1[%c0_12, %c2, %c0_13] : memref<1x110x128xbf16, #tpu.memory_space<vmem>>, vector<1x80x128xbf16>
    %16 = vector.shape_cast %15 : vector<1x80x128xbf16> to vector<80x128xbf16>
    %c2_14 = arith.constant 2 : index
    %c0_15 = arith.constant 0 : index
    %c0_16 = arith.constant 0 : index
    %17 = vector.load %arg2[%c2_14, %c0_15, %c0_16] : memref<9x128x64xf32, #tpu.memory_space<vmem>>, vector<1x128x64xf32>
    %18 = vector.shape_cast %17 : vector<1x128x64xf32> to vector<128x64xf32>
    %19 = arith.truncf %18 : vector<128x64xf32> to vector<128x64xbf16>
    %cst_17 = arith.constant dense<0.000000e+00> : vector<80x64xf32>
    %20 = tpu.matmul %16, %19, %cst_17 {dimension_numbers = #tpu.dot_dimension_numbers<[1], [0], [0], [1], [0, 0, 1, 1], [], []>} : vector<80x128xbf16>, vector<128x64xbf16>, vector<80x64xf32> -> vector<80x64xf32>
    %21 = arith.addf %14, %20 : vector<80x64xf32>
    %c0_18 = arith.constant 0 : index
    %c10 = arith.constant 10 : index
    %c0_19 = arith.constant 0 : index
    %22 = vector.load %arg1[%c0_18, %c10, %c0_19] : memref<1x110x128xbf16, #tpu.memory_space<vmem>>, vector<1x80x128xbf16>
    %23 = vector.shape_cast %22 : vector<1x80x128xbf16> to vector<80x128xbf16>
    %c3 = arith.constant 3 : index
    %c0_20 = arith.constant 0 : index
    %c0_21 = arith.constant 0 : index
    %24 = vector.load %arg2[%c3, %c0_20, %c0_21] : memref<9x128x64xf32, #tpu.memory_space<vmem>>, vector<1x128x64xf32>
    %25 = vector.shape_cast %24 : vector<1x128x64xf32> to vector<128x64xf32>
    %26 = arith.truncf %25 : vector<128x64xf32> to vector<128x64xbf16>
    %cst_22 = arith.constant dense<0.000000e+00> : vector<80x64xf32>
    %27 = tpu.matmul %23, %26, %cst_22 {dimension_numbers = #tpu.dot_dimension_numbers<[1], [0], [0], [1], [0, 0, 1, 1], [], []>} : vector<80x128xbf16>, vector<128x64xbf16>, vector<80x64xf32> -> vector<80x64xf32>
    %28 = arith.addf %21, %27 : vector<80x64xf32>
    %c0_23 = arith.constant 0 : index
    %c11 = arith.constant 11 : index
    %c0_24 = arith.constant 0 : index
    %29 = vector.load %arg1[%c0_23, %c11, %c0_24] : memref<1x110x128xbf16, #tpu.memory_space<vmem>>, vector<1x80x128xbf16>
    %30 = vector.shape_cast %29 : vector<1x80x128xbf16> to vector<80x128xbf16>
    %c4 = arith.constant 4 : index
    %c0_25 = arith.constant 0 : index
    %c0_26 = arith.constant 0 : index
    %31 = vector.load %arg2[%c4, %c0_25, %c0_26] : memref<9x128x64xf32, #tpu.memory_space<vmem>>, vector<1x128x64xf32>
    %32 = vector.shape_cast %31 : vector<1x128x64xf32> to vector<128x64xf32>
    %33 = arith.truncf %32 : vector<128x64xf32> to vector<128x64xbf16>
    %cst_27 = arith.constant dense<0.000000e+00> : vector<80x64xf32>
    %34 = tpu.matmul %30, %33, %cst_27 {dimension_numbers = #tpu.dot_dimension_numbers<[1], [0], [0], [1], [0, 0, 1, 1], [], []>} : vector<80x128xbf16>, vector<128x64xbf16>, vector<80x64xf32> -> vector<80x64xf32>
    %35 = arith.addf %28, %34 : vector<80x64xf32>
    %c0_28 = arith.constant 0 : index
    %c12 = arith.constant 12 : index
    %c0_29 = arith.constant 0 : index
    %36 = vector.load %arg1[%c0_28, %c12, %c0_29] : memref<1x110x128xbf16, #tpu.memory_space<vmem>>, vector<1x80x128xbf16>
    %37 = vector.shape_cast %36 : vector<1x80x128xbf16> to vector<80x128xbf16>
    %c5 = arith.constant 5 : index
    %c0_30 = arith.constant 0 : index
    %c0_31 = arith.constant 0 : index
    %38 = vector.load %arg2[%c5, %c0_30, %c0_31] : memref<9x128x64xf32, #tpu.memory_space<vmem>>, vector<1x128x64xf32>
    %39 = vector.shape_cast %38 : vector<1x128x64xf32> to vector<128x64xf32>
    %40 = arith.truncf %39 : vector<128x64xf32> to vector<128x64xbf16>
    %cst_32 = arith.constant dense<0.000000e+00> : vector<80x64xf32>
    %41 = tpu.matmul %37, %40, %cst_32 {dimension_numbers = #tpu.dot_dimension_numbers<[1], [0], [0], [1], [0, 0, 1, 1], [], []>} : vector<80x128xbf16>, vector<128x64xbf16>, vector<80x64xf32> -> vector<80x64xf32>
    %42 = arith.addf %35, %41 : vector<80x64xf32>
    %c0_33 = arith.constant 0 : index
    %c20 = arith.constant 20 : index
    %c0_34 = arith.constant 0 : index
    %43 = vector.load %arg1[%c0_33, %c20, %c0_34] : memref<1x110x128xbf16, #tpu.memory_space<vmem>>, vector<1x80x128xbf16>
    %44 = vector.shape_cast %43 : vector<1x80x128xbf16> to vector<80x128xbf16>
    %c6 = arith.constant 6 : index
    %c0_35 = arith.constant 0 : index
    %c0_36 = arith.constant 0 : index
    %45 = vector.load %arg2[%c6, %c0_35, %c0_36] : memref<9x128x64xf32, #tpu.memory_space<vmem>>, vector<1x128x64xf32>
    %46 = vector.shape_cast %45 : vector<1x128x64xf32> to vector<128x64xf32>
    %47 = arith.truncf %46 : vector<128x64xf32> to vector<128x64xbf16>
    %cst_37 = arith.constant dense<0.000000e+00> : vector<80x64xf32>
    %48 = tpu.matmul %44, %47, %cst_37 {dimension_numbers = #tpu.dot_dimension_numbers<[1], [0], [0], [1], [0, 0, 1, 1], [], []>} : vector<80x128xbf16>, vector<128x64xbf16>, vector<80x64xf32> -> vector<80x64xf32>
    %49 = arith.addf %42, %48 : vector<80x64xf32>
    %c0_38 = arith.constant 0 : index
    %c21 = arith.constant 21 : index
    %c0_39 = arith.constant 0 : index
    %50 = vector.load %arg1[%c0_38, %c21, %c0_39] : memref<1x110x128xbf16, #tpu.memory_space<vmem>>, vector<1x80x128xbf16>
    %51 = vector.shape_cast %50 : vector<1x80x128xbf16> to vector<80x128xbf16>
    %c7 = arith.constant 7 : index
    %c0_40 = arith.constant 0 : index
    %c0_41 = arith.constant 0 : index
    %52 = vector.load %arg2[%c7, %c0_40, %c0_41] : memref<9x128x64xf32, #tpu.memory_space<vmem>>, vector<1x128x64xf32>
    %53 = vector.shape_cast %52 : vector<1x128x64xf32> to vector<128x64xf32>
    %54 = arith.truncf %53 : vector<128x64xf32> to vector<128x64xbf16>
    %cst_42 = arith.constant dense<0.000000e+00> : vector<80x64xf32>
    %55 = tpu.matmul %51, %54, %cst_42 {dimension_numbers = #tpu.dot_dimension_numbers<[1], [0], [0], [1], [0, 0, 1, 1], [], []>} : vector<80x128xbf16>, vector<128x64xbf16>, vector<80x64xf32> -> vector<80x64xf32>
    %56 = arith.addf %49, %55 : vector<80x64xf32>
    %c0_43 = arith.constant 0 : index
    %c22 = arith.constant 22 : index
    %c0_44 = arith.constant 0 : index
    %57 = vector.load %arg1[%c0_43, %c22, %c0_44] : memref<1x110x128xbf16, #tpu.memory_space<vmem>>, vector<1x80x128xbf16>
    %58 = vector.shape_cast %57 : vector<1x80x128xbf16> to vector<80x128xbf16>
    %c8 = arith.constant 8 : index
    %c0_45 = arith.constant 0 : index
    %c0_46 = arith.constant 0 : index
    %59 = vector.load %arg2[%c8, %c0_45, %c0_46] : memref<9x128x64xf32, #tpu.memory_space<vmem>>, vector<1x128x64xf32>
    %60 = vector.shape_cast %59 : vector<1x128x64xf32> to vector<128x64xf32>
    %61 = arith.truncf %60 : vector<128x64xf32> to vector<128x64xbf16>
    %cst_47 = arith.constant dense<0.000000e+00> : vector<80x64xf32>
    %62 = tpu.matmul %58, %61, %cst_47 {dimension_numbers = #tpu.dot_dimension_numbers<[1], [0], [0], [1], [0, 0, 1, 1], [], []>} : vector<80x128xbf16>, vector<128x64xbf16>, vector<80x64xf32> -> vector<80x64xf32>
    %63 = arith.addf %56, %62 : vector<80x64xf32>
    %c0_48 = arith.constant 0 : index
    %c0_49 = arith.constant 0 : index
    %64 = vector.load %arg3[%c0_48, %c0_49] : memref<1x64xf32, #tpu.memory_space<vmem>>, vector<1x64xf32>
    %65 = vector.broadcast %64 : vector<1x64xf32> to vector<80x64xf32>
    %66 = arith.mulf %63, %65 : vector<80x64xf32>
    %c0_50 = arith.constant 0 : index
    %c0_51 = arith.constant 0 : index
    %67 = vector.load %arg4[%c0_50, %c0_51] : memref<1x64xf32, #tpu.memory_space<vmem>>, vector<1x64xf32>
    %68 = vector.broadcast %67 : vector<1x64xf32> to vector<80x64xf32>
    %69 = arith.addf %66, %68 : vector<80x64xf32>
    %cst_52 = arith.constant 0.000000e+00 : f32
    %70 = vector.broadcast %cst_52 : f32 to vector<80x64xf32>
    %71 = arith.maximumf %69, %70 : vector<80x64xf32>
    %72 = arith.truncf %71 : vector<80x64xf32> to vector<80x64xbf16>
    %c0_53 = arith.constant 0 : index
    %c0_54 = arith.constant 0 : index
    %c0_55 = arith.constant 0 : index
    %73 = vector.load %arg5[%c0_53, %c0_54, %c0_55] : memref<1x80x64xbf16, #tpu.memory_space<vmem>>, vector<1x80x64xbf16>
    %74 = vector.shape_cast %73 : vector<1x80x64xbf16> to vector<80x64xbf16>
    %75 = vector.shape_cast %72 : vector<80x64xbf16> to vector<1x80x64xbf16>
    tpu.vector_store %arg5[%c0_53, %c0_54, %c0_55], %75 {strides = array<i32>} : memref<1x80x64xbf16, #tpu.memory_space<vmem>>, vector<1x80x64xbf16>,
    return
  }
  func.func @transform_0(%arg0: i32) -> (i32, i32, i32) {
    %c0_i32 = arith.constant 0 : i32
    %c0_i32_0 = arith.constant 0 : i32
    %c0_i32_1 = arith.constant 0 : i32
    return %arg0, %c0_i32, %c0_i32_0 : i32, i32, i32
  }
  func.func @transform_1(%arg0: i32) -> (i32, i32, i32) {
    %c0_i32 = arith.constant 0 : i32
    %c0_i32_0 = arith.constant 0 : i32
    %c0_i32_1 = arith.constant 0 : i32
    %c0_i32_2 = arith.constant 0 : i32
    return %c0_i32, %c0_i32_0, %c0_i32_1 : i32, i32, i32
  }
  func.func @transform_2(%arg0: i32) -> (i32, i32) {
    %c0_i32 = arith.constant 0 : i32
    %c0_i32_0 = arith.constant 0 : i32
    %c0_i32_1 = arith.constant 0 : i32
    return %c0_i32, %c0_i32_0 : i32, i32
  }
  func.func @transform_3(%arg0: i32) -> (i32, i32) {
    %c0_i32 = arith.constant 0 : i32
    %c0_i32_0 = arith.constant 0 : i32
    %c0_i32_1 = arith.constant 0 : i32
    return %c0_i32, %c0_i32_0 : i32, i32
  }
  func.func @transform_4(%arg0: i32) -> (i32, i32, i32) {
    %c0_i32 = arith.constant 0 : i32
    %c0_i32_0 = arith.constant 0 : i32
    %c0_i32_1 = arith.constant 0 : i32
    return %arg0, %c0_i32, %c0_i32_0 : i32, i32, i32
  }
}

module attributes {stable_mosaic.version = 11 : i64} {
  func.func @_matmul_kernel(%arg0: i32, %arg1: i32, %arg2: memref<128x64xbf16, #tpu.memory_space<vmem>>, %arg3: memref<64x128xf32, #tpu.memory_space<vmem>>, %arg4: memref<1x128xf32, #tpu.memory_space<vmem>>, %arg5: memref<1x128xf32, #tpu.memory_space<vmem>>, %arg6: memref<128x128xf32, #tpu.memory_space<vmem>>) attributes {dimension_semantics = [#tpu.dimension_semantics<parallel>, #tpu.dimension_semantics<parallel>], iteration_bounds = array<i64: 1, 1>, scalar_prefetch = 0 : i64, scratch_operands = 0 : i64, tpu.core_type = #tpu.core_type<tc>, window_params = [{transform_indices = @transform_0, window_bounds = array<i64: 128, 64>}, {transform_indices = @transform_1, window_bounds = array<i64: 64, 128>}, {transform_indices = @transform_2, window_bounds = array<i64: 1, 128>}, {transform_indices = @transform_3, window_bounds = array<i64: 1, 128>}, {transform_indices = @transform_4, window_bounds = array<i64: 128, 128>}]} {
    %c0 = arith.constant 0 : index
    %c0_0 = arith.constant 0 : index
    %0 = vector.load %arg2[%c0, %c0_0] : memref<128x64xbf16, #tpu.memory_space<vmem>>, vector<128x64xbf16>
    %c0_1 = arith.constant 0 : index
    %c0_2 = arith.constant 0 : index
    %1 = vector.load %arg3[%c0_1, %c0_2] : memref<64x128xf32, #tpu.memory_space<vmem>>, vector<64x128xf32>
    %2 = arith.truncf %1 : vector<64x128xf32> to vector<64x128xbf16>
    %cst = arith.constant dense<0.000000e+00> : vector<128x128xf32>
    %3 = tpu.matmul %0, %2, %cst {dimension_numbers = #tpu.dot_dimension_numbers<[1], [0], [0], [1], [0, 0, 1, 1], [], []>} : vector<128x64xbf16>, vector<64x128xbf16>, vector<128x128xf32> -> vector<128x128xf32>
    %c0_3 = arith.constant 0 : index
    %c0_4 = arith.constant 0 : index
    %4 = vector.load %arg4[%c0_3, %c0_4] : memref<1x128xf32, #tpu.memory_space<vmem>>, vector<1x128xf32>
    %5 = vector.broadcast %4 : vector<1x128xf32> to vector<128x128xf32>
    %6 = arith.mulf %3, %5 : vector<128x128xf32>
    %c0_5 = arith.constant 0 : index
    %c0_6 = arith.constant 0 : index
    %7 = vector.load %arg5[%c0_5, %c0_6] : memref<1x128xf32, #tpu.memory_space<vmem>>, vector<1x128xf32>
    %8 = vector.broadcast %7 : vector<1x128xf32> to vector<128x128xf32>
    %9 = arith.addf %6, %8 : vector<128x128xf32>
    %c0_7 = arith.constant 0 : index
    %c0_8 = arith.constant 0 : index
    %10 = vector.load %arg6[%c0_7, %c0_8] : memref<128x128xf32, #tpu.memory_space<vmem>>, vector<128x128xf32>
    tpu.vector_store %arg6[%c0_7, %c0_8], %9 {strides = array<i32>} : memref<128x128xf32, #tpu.memory_space<vmem>>, vector<128x128xf32>,
    return
  }
  func.func @transform_0(%arg0: i32, %arg1: i32) -> (i32, i32) {
    %c0_i32 = arith.constant 0 : i32
    %c0_i32_0 = arith.constant 0 : i32
    return %arg0, %c0_i32 : i32, i32
  }
  func.func @transform_1(%arg0: i32, %arg1: i32) -> (i32, i32) {
    %c0_i32 = arith.constant 0 : i32
    %c0_i32_0 = arith.constant 0 : i32
    return %c0_i32, %arg1 : i32, i32
  }
  func.func @transform_2(%arg0: i32, %arg1: i32) -> (i32, i32) {
    %c0_i32 = arith.constant 0 : i32
    %c0_i32_0 = arith.constant 0 : i32
    return %c0_i32, %arg1 : i32, i32
  }
  func.func @transform_3(%arg0: i32, %arg1: i32) -> (i32, i32) {
    %c0_i32 = arith.constant 0 : i32
    %c0_i32_0 = arith.constant 0 : i32
    return %c0_i32, %arg1 : i32, i32
  }
  func.func @transform_4(%arg0: i32, %arg1: i32) -> (i32, i32) {
    %c0_i32 = arith.constant 0 : i32
    return %arg0, %arg1 : i32, i32
  }
}

module attributes {stable_mosaic.version = 11 : i64} {
  func.func @_resize_kernel(%arg0: i32, %arg1: memref<32x8xf32, #tpu.memory_space<vmem>>, %arg2: memref<24x96xf32, #tpu.memory_space<vmem>>, %arg3: memref<1x8x24xf32, #tpu.memory_space<vmem>>, %arg4: memref<1x32x96xf32, #tpu.memory_space<vmem>>) attributes {dimension_semantics = [#tpu.dimension_semantics<parallel>], iteration_bounds = array<i64: 2>, scalar_prefetch = 0 : i64, scratch_operands = 0 : i64, tpu.core_type = #tpu.core_type<tc>, window_params = [{pipeline_mode = #tpu.pipeline_mode<synchronous>, transform_indices = @transform_0, window_bounds = array<i64: 32, 8>}, {pipeline_mode = #tpu.pipeline_mode<synchronous>, transform_indices = @transform_1, window_bounds = array<i64: 24, 96>}, {transform_indices = @transform_2, window_bounds = array<i64: 1, 8, 24>}, {transform_indices = @transform_3, window_bounds = array<i64: 1, 32, 96>}]} {
    %c0 = arith.constant 0 : index
    %c0_0 = arith.constant 0 : index
    %c0_1 = arith.constant 0 : index
    %0 = vector.load %arg3[%c0, %c0_0, %c0_1] : memref<1x8x24xf32, #tpu.memory_space<vmem>>, vector<1x8x24xf32>
    %1 = vector.shape_cast %0 : vector<1x8x24xf32> to vector<8x24xf32>
    %c0_2 = arith.constant 0 : index
    %c0_3 = arith.constant 0 : index
    %2 = vector.load %arg1[%c0_2, %c0_3] : memref<32x8xf32, #tpu.memory_space<vmem>>, vector<32x8xf32>
    %cst = arith.constant dense<0.000000e+00> : vector<32x24xf32>
    %3 = tpu.matmul %2, %1, %cst {dimension_numbers = #tpu.dot_dimension_numbers<[1], [0], [0], [1], [0, 0, 1, 1], [], []>} : vector<32x8xf32>, vector<8x24xf32>, vector<32x24xf32> -> vector<32x24xf32>
    %c0_4 = arith.constant 0 : index
    %c0_5 = arith.constant 0 : index
    %4 = vector.load %arg2[%c0_4, %c0_5] : memref<24x96xf32, #tpu.memory_space<vmem>>, vector<24x96xf32>
    %cst_6 = arith.constant dense<0.000000e+00> : vector<32x96xf32>
    %5 = tpu.matmul %3, %4, %cst_6 {dimension_numbers = #tpu.dot_dimension_numbers<[1], [0], [0], [1], [0, 0, 1, 1], [], []>} : vector<32x24xf32>, vector<24x96xf32>, vector<32x96xf32> -> vector<32x96xf32>
    %c0_7 = arith.constant 0 : index
    %c0_8 = arith.constant 0 : index
    %c0_9 = arith.constant 0 : index
    %6 = vector.load %arg4[%c0_7, %c0_8, %c0_9] : memref<1x32x96xf32, #tpu.memory_space<vmem>>, vector<1x32x96xf32>
    %7 = vector.shape_cast %6 : vector<1x32x96xf32> to vector<32x96xf32>
    %8 = vector.shape_cast %5 : vector<32x96xf32> to vector<1x32x96xf32>
    tpu.vector_store %arg4[%c0_7, %c0_8, %c0_9], %8 {strides = array<i32>} : memref<1x32x96xf32, #tpu.memory_space<vmem>>, vector<1x32x96xf32>,
    return
  }
  func.func @transform_0(%arg0: i32) -> (i32, i32) {
    %c0_i32 = arith.constant 0 : i32
    %c0_i32_0 = arith.constant 0 : i32
    %c0_i32_1 = arith.constant 0 : i32
    return %c0_i32, %c0_i32_0 : i32, i32
  }
  func.func @transform_1(%arg0: i32) -> (i32, i32) {
    %c0_i32 = arith.constant 0 : i32
    %c0_i32_0 = arith.constant 0 : i32
    %c0_i32_1 = arith.constant 0 : i32
    return %c0_i32, %c0_i32_0 : i32, i32
  }
  func.func @transform_2(%arg0: i32) -> (i32, i32, i32) {
    %c0_i32 = arith.constant 0 : i32
    %c0_i32_0 = arith.constant 0 : i32
    %c0_i32_1 = arith.constant 0 : i32
    return %arg0, %c0_i32, %c0_i32_0 : i32, i32, i32
  }
  func.func @transform_3(%arg0: i32) -> (i32, i32, i32) {
    %c0_i32 = arith.constant 0 : i32
    %c0_i32_0 = arith.constant 0 : i32
    %c0_i32_1 = arith.constant 0 : i32
    return %arg0, %c0_i32, %c0_i32_0 : i32, i32, i32
  }
}

</mosaic_0001>

<bundles_post_ra>
// kernel: tg_forward.10
= control target key start
LH: loop header
LB: loop body
LE: loop exit
PB: predicated region body
PF: predicated region fallthrough
CT: control target
= control target key end

     0   :  { %vm86_vm0 = vcmask 523264   ;;  %s632_s1 = inlined_call_operand.vmem [shape: f32[64,64], index: 1, kind: input, shape index: {}]   ;;  %s633_s0 = inlined_call_operand.vmem [shape: bf16[128,64], index: 0, kind: input, shape index: {}]   ;;  %s634_s2 = inlined_call_operand.vmem [shape: f32[1,64], index: 2, kind: input, shape index: {}]   ;;  %s635_s3 = inlined_call_operand.vmem [shape: f32[1,64], index: 3, kind: input, shape index: {}]   ;;  %s636_s4 = inlined_call_operand.vmem [shape: bf16[128,64], index: 4, kind: output, shape index: {}]  }
   0x1   :  { %v34_v0 = vld [vmem:[%s632_s1] sm:$0xff]  ;;  %v35_v1 = vld [vmem:[%s632_s1 + $0x8] sm:$0xff]  ;;  %v36_v2 = vld [vmem:[%s632_s1 + $0x10] sm:$0xff] }
   0x2   :  { %v42_v3 = vpack.c.bf16 %v35_v1, %v34_v0  ;;  %v37_v4 = vld [vmem:[%s632_s1 + $0x18] sm:$0xff]  ;;  %v38_v6 = vld [vmem:[%s632_s1 + $0x20] sm:$0xff]  ;;  %v39_v7 = vld [vmem:[%s632_s1 + $0x28] sm:$0xff] }
   0x3   :  { %v43_v5 = vpack.c.bf16 %v37_v4, %v36_v2  ;;  %v495_v8 = vld [vmem:[%s633_s0] sm:$0xff]   ;;  %v44_v10 = vpack.c.bf16 %v39_v7, %v38_v6  ;;  %v40_v11 = vld [vmem:[%s632_s1 + $0x30] sm:$0xff]  ;;  %v41_v12 = vld [vmem:[%s632_s1 + $0x38] sm:$0xff] }
   0x4   :  { %463 = vmatprep.subr.bf16.mxu0 %v42_v3  ;;  %487 = vmatprep.subr.bf16.mxu1 %v42_v3  ;;  %v496_v9 = vld [vmem:[%s633_s0 + $0x20] sm:$0xff]   ;;  %v45_v13 = vpack.c.bf16 %v41_v12, %v40_v11  ;;  %v497_v14 = vld [vmem:[%s633_s0 + $0x8] sm:$0xff]   ;;  %v499_v16 = vld [vmem:[%s633_s0 + $0x10] sm:$0xff]  }
   0x5   :  { %464 = vmatpush3.bf16.msra.mxu0 %v42_v3  ;;  %491 = vmatpush3.bf16.msra.mxu1 %v42_v3  ;;  %v498_v15 = vld [vmem:[%s633_s0 + $0x28] sm:$0xff]   ;;  %v500_v17 = vld [vmem:[%s633_s0 + $0x30] sm:$0xff]   ;;  %v501_v18 = vld [vmem:[%s633_s0 + $0x18] sm:$0xff]  }
   0x6   :  { %465 = vmatprep.subr.bf16.mxu0 %v43_v5  ;;  %488 = vmatprep.subr.bf16.mxu1 %v43_v5  ;;  %v502_v19 = vld [vmem:[%s633_s0 + $0x38] sm:$0xff]   ;;  %v370_v20 = vld [vmem:[%s634_s2] ss:$0 sm:$0xff] }
   0x7   :  { %471 = vmatprep.mubr.msk.bf16.mxu0 %vm86_vm0, %v495_v8  ;;  %479 = vmatprep.mubr.msk.bf16.mxu1 %vm86_vm0, %v496_v9  ;;  %v590_v22 = vld [vmem:[%s635_s3] ss:$0 sm:$0xff] }
   0x9   :  { %466 = vmatpush3.bf16.msra.mxu0 %v43_v5  ;;  %492 = vmatpush3.bf16.msra.mxu1 %v43_v5 }
   0xa   :  { %467 = vmatprep.subr.bf16.mxu0 %v44_v10  ;;  %489 = vmatprep.subr.bf16.mxu1 %v44_v10 }
   0xd   :  { %468 = vmatpush3.bf16.msra.mxu0 %v44_v10  ;;  %493 = vmatpush3.bf16.msra.mxu1 %v44_v10 }
   0xe   :  { %469 = vmatprep.subr.bf16.mxu0 %v45_v13  ;;  %490 = vmatprep.subr.bf16.mxu1 %v45_v13 }
  0x11   :  { %470 = vmatpush3.bf16.msra.mxu0 %v45_v13  ;;  %494 = vmatpush3.bf16.msra.mxu1 %v45_v13 }
  0x14   :  { %472 = vmatmul.mubr.msk.bf16.vlgmr.msra.gmra.mrb[0].mxu0 %vm86_vm0, %v497_v14  ;;  %480 = vmatmul.mubr.msk.bf16.vlgmr.msra.gmra.mrb[0].mxu1 %vm86_vm0, %v498_v15 }
  0x15   :  { %475 = vmatprep.mubr.msk.bf16.mxu0 %vm86_vm0, %v499_v16  ;;  %483 = vmatprep.mubr.msk.bf16.mxu1 %vm86_vm0, %v500_v17 }
  0x1c   :  { %476 = vmatmul.mubr.msk.bf16.gmra.mrb[4].mxu0 %vm86_vm0, %v501_v18  ;;  %484 = vmatmul.mubr.msk.bf16.gmra.mrb[4].mxu1 %vm86_vm0, %v502_v19 }
  0xe7   :  { %v473_v21 = vpop.f32.mrb[0].mxu0  ;;  %v481_v23 = vpop.f32.mrb[0].mxu1 }
  0xe8   :  { %v217_v24 = vmul.f32 %v473_v21, %v370_v20  ;;  %v225_v25 = vmul.f32 %v481_v23, %v370_v20  ;;  %v145_v26 = vpop.f32.mrb[1].mxu0  ;;  %v177_v27 = vpop.f32.mrb[1].mxu1 }
  0xe9   :  { %v215_v28 = vmul.f32 %v370_v20, %v145_v26  ;;  %v223_v29 = vmul.f32 %v370_v20, %v177_v27  ;;  %v474_v30 = vpop.f32.mrb[2].mxu0  ;;  %v482_v31 = vpop.f32.mrb[2].mxu1 }
  0xea   :  { %v240_v32 = vadd.f32 %v590_v22, %v217_v24  ;;  %v248_v33 = vadd.f32 %v590_v22, %v225_v25  ;;  %v218_v34 = vmul.f32 %v474_v30, %v370_v20  ;;  %v226_v35 = vmul.f32 %v482_v31, %v370_v20  ;;  %v148_v36 = vpop.f32.mrb[3].mxu0  ;;  %v180_v37 = vpop.f32.mrb[3].mxu1 }
  0xeb   :  { %v238_v38 = vadd.f32 %v590_v22, %v215_v28  ;;  %v246_v39 = vadd.f32 %v590_v22, %v223_v29  ;;  %v216_v40 = vmul.f32 %v370_v20, %v148_v36  ;;  %v224_v41 = vmul.f32 %v370_v20, %v180_v37 }
  0xec   :  { %v241_v42 = vadd.f32 %v590_v22, %v218_v34  ;;  %v249_v43 = vadd.f32 %v590_v22, %v226_v35  ;;  %v256_v46 = vmax.f32 %v240_v32, 0.0  ;;  %v264_v47 = vmax.f32 %v248_v33, 0.0 }
  0xed   :  { %v239_v44 = vadd.f32 %v590_v22, %v216_v40  ;;  %v247_v45 = vadd.f32 %v590_v22, %v224_v41  ;;  %v254_v50 = vmax.f32 %v238_v38, 0.0  ;;  %v262_v51 = vmax.f32 %v246_v39, 0.0 }
  0xee   :  { %v257_v48 = vmax.f32 %v241_v42, 0.0  ;;  %v265_v49 = vmax.f32 %v249_v43, 0.0 }
  0xef   :  { %v255_v52 = vmax.f32 %v239_v44, 0.0  ;;  %v263_v53 = vmax.f32 %v247_v45, 0.0  ;;  %v477_v54 = vpop.f32.mrb[4].mxu0  ;;  %v485_v55 = vpop.f32.mrb[4].mxu1 }
  0xf0   :  { %v412_v56 = vpack.c.bf16 %v257_v48, %v256_v46  ;;  %v432_v57 = vpack.c.bf16 %v265_v49, %v264_v47  ;;  %v221_v58 = vmul.f32 %v477_v54, %v370_v20  ;;  %v229_v59 = vmul.f32 %v485_v55, %v370_v20  ;;  %v161_v60 = vpop.f32.mrb[5].mxu0  ;;  %v193_v61 = vpop.f32.mrb[5].mxu1 }
  0xf1   :  { %v407_v62 = vpack.c.bf16 %v255_v52, %v254_v50  ;;  %v427_v63 = vpack.c.bf16 %v263_v53, %v262_v51  ;;  %v219_v0 = vmul.f32 %v370_v20, %v161_v60  ;;  %v227_v1 = vmul.f32 %v370_v20, %v193_v61  ;;  %v478_v2 = vpop.f32.mrb[6].mxu0  ;;  %v486_v3 = vpop.f32.mrb[6].mxu1 }
  0xf2   :  { %444 = vst [vmem:[%s636_s4 + $0x8] sm:$0xff] %v412_v56   ;;  %448 = vst [vmem:[%s636_s4 + $0x28] sm:$0xff] %v432_v57   ;;  %v244_v4 = vadd.f32 %v590_v22, %v221_v58  ;;  %v252_v5 = vadd.f32 %v590_v22, %v229_v59  ;;  %v222_v6 = vmul.f32 %v478_v2, %v370_v20  ;;  %v164_v8 = vpop.f32.mrb[7].mxu0  ;;  %v196_v9 = vpop.f32.mrb[7].mxu1 }
  0xf3   :  { %v230_v7 = vmul.f32 %v486_v3, %v370_v20  ;;  %408 = vst [vmem:[%s636_s4] sm:$0xff] %v407_v62   ;;  %447 = vst [vmem:[%s636_s4 + $0x20] sm:$0xff] %v427_v63   ;;  %v242_v10 = vadd.f32 %v590_v22, %v219_v0  ;;  %v250_v11 = vadd.f32 %v590_v22, %v227_v1 }
  0xf4   :  { %v220_v12 = vmul.f32 %v370_v20, %v164_v8  ;;  %v228_v13 = vmul.f32 %v370_v20, %v196_v9  ;;  %v245_v14 = vadd.f32 %v590_v22, %v222_v6  ;;  %v260_v18 = vmax.f32 %v244_v4, 0.0 }
  0xf5   :  { %v253_v15 = vadd.f32 %v590_v22, %v230_v7  ;;  %v268_v19 = vmax.f32 %v252_v5, 0.0  ;;  %v258_v24 = vmax.f32 %v242_v10, 0.0  ;;  %v266_v25 = vmax.f32 %v250_v11, 0.0 }
  0xf6   :  { %v243_v16 = vadd.f32 %v590_v22, %v220_v12  ;;  %v251_v17 = vadd.f32 %v590_v22, %v228_v13  ;;  %v261_v21 = vmax.f32 %v245_v14, 0.0 }
  0xf7   :  { %v269_v23 = vmax.f32 %v253_v15, 0.0 }
  0xf8   :  { %v259_v26 = vmax.f32 %v243_v16, 0.0  ;;  %v267_v27 = vmax.f32 %v251_v17, 0.0  ;;  %v422_v28 = vpack.c.bf16 %v261_v21, %v260_v18 }
  0xf9   :  { %v442_v29 = vpack.c.bf16 %v269_v23, %v268_v19 }
  0xfa   :  { %v417_v30 = vpack.c.bf16 %v259_v26, %v258_v24  ;;  %v437_v20 = vpack.c.bf16 %v267_v27, %v266_v25  ;;  %446 = vst [vmem:[%s636_s4 + $0x18] sm:$0xff] %v422_v28  }
  0xfb   :  { %450 = vst [vmem:[%s636_s4 + $0x38] sm:$0xff] %v442_v29  }
  0xfc   :  { %445 = vst [vmem:[%s636_s4 + $0x10] sm:$0xff] %v417_v30   ;;  %449 = vst [vmem:[%s636_s4 + $0x30] sm:$0xff] %v437_v20  }

// kernel: tg_forward.8
= control target key start
LH: loop header
LB: loop body
LE: loop exit
PB: predicated region body
PF: predicated region fallthrough
CT: control target
= control target key end

     0   :  { %vm69_vm0 = vcmask 1040384   ;;  %vm70_vm1 = vcmask 1041408   ;;  %v438_v1 = vmov 65535   ;;  %vm44_vm2 = vcmask 23552   ;;  %s571_s1 = inlined_call_operand.vmem [shape: f32[3,64], index: 1, kind: input, shape index: {}]   ;;  %s572_s0 = inlined_call_operand.vmem [shape: f32[128,3], index: 0, kind: input, shape index: {}]   ;;  %s573_s2 = inlined_call_operand.vmem [shape: f32[1,64], index: 2, kind: input, shape index: {}]   ;;  %s574_s3 = inlined_call_operand.vmem [shape: f32[1,64], index: 3, kind: input, shape index: {}]   ;;  %s575_s4 = inlined_call_operand.vmem [shape: bf16[128,64], index: 4, kind: output, shape index: {}]  }
   0x1   :  { %v42_v0 = vld [vmem:[%s571_s1] sm:$0x7]  ;;  %v71_v2 = vsel %vm69_vm0, 4294967295, %v438_v1  ;;  %v19_v4 = vld [vmem:[%s572_s0 + $0x8] sm:$0xff]  ;;  %v20_v10 = vld [vmem:[%s572_s0 + $0x10] sm:$0xff] }
   0x2   :  { %v18_v3 = vld [vmem:[%s572_s0] sm:$0xff]  ;;  %v43_v5 = vpack.c.bf16 %v42_v0, %v42_v0  ;;  %v72_v6 = vsel %vm70_vm1, %v71_v2, 0  ;;  %v27_v9 = vld [vmem:[%s572_s0 + $0x48] sm:$0xff]  ;;  %v21_v12 = vld [vmem:[%s572_s0 + $0x18] sm:$0xff] }
   0x3   :  { %v34_v7 = vpack.c.bf16 %v19_v4, %v18_v3  ;;  %v26_v8 = vld [vmem:[%s572_s0 + $0x40] sm:$0xff]  ;;  %v28_v13 = vld [vmem:[%s572_s0 + $0x50] sm:$0xff]  ;;  %v29_v14 = vld [vmem:[%s572_s0 + $0x58] sm:$0xff]  ;;  %v35_v20 = vpack.c.bf16 %v21_v12, %v20_v10 }
   0x4   :  { %v38_v11 = vpack.c.bf16 %v27_v9, %v26_v8  ;;  %v74_v15 = vand.u32 %v72_v6, %v43_v5  ;;  %v22_v16 = vld [vmem:[%s572_s0 + $0x20] sm:$0xff]  ;;  %v23_v17 = vld [vmem:[%s572_s0 + $0x28] sm:$0xff]  ;;  %v39_v21 = vpack.c.bf16 %v29_v14, %v28_v13  ;;  %v24_v24 = vld [vmem:[%s572_s0 + $0x30] sm:$0xff] }
   0x5   :  { %419 = vmatprep.mubr.msk.bf16.mxu0 %vm44_vm2, %v34_v7  ;;  %v30_v18 = vld [vmem:[%s572_s0 + $0x60] sm:$0xff]  ;;  %v31_v19 = vld [vmem:[%s572_s0 + $0x68] sm:$0xff]  ;;  %v36_v22 = vpack.c.bf16 %v23_v17, %v22_v16  ;;  %v25_v25 = vld [vmem:[%s572_s0 + $0x38] sm:$0xff] }
   0x6   :  { %427 = vmatprep.mubr.msk.bf16.mxu1 %vm44_vm2, %v38_v11  ;;  %417 = vmatprep.subr.bf16.mxu0 %v74_v15  ;;  %v40_v23 = vpack.c.bf16 %v31_v19, %v30_v18  ;;  %v32_v26 = vld [vmem:[%s572_s0 + $0x70] sm:$0xff]  ;;  %v33_v27 = vld [vmem:[%s572_s0 + $0x78] sm:$0xff]  ;;  %v37_v28 = vpack.c.bf16 %v25_v25, %v24_v24  ;;  %v327_v30 = vld [vmem:[%s573_s2] ss:$0 sm:$0xff] }
   0x7   :  { %435 = vmatprep.subr.bf16.mxu1 %v74_v15  ;;  %418 = vmatpush3.bf16.msra.mxu0 %v74_v15  ;;  %v41_v29 = vpack.c.bf16 %v33_v27, %v32_v26  ;;  %v529_v32 = vld [vmem:[%s574_s3] ss:$0 sm:$0xff] }
   0x8   :  { %436 = vmatpush3.bf16.msra.mxu1 %v74_v15 }
   0xa   :  { %420 = vmatmul.mubr.msk.bf16.vlgmr.msra.gmra.mrb[0].mxu0 %vm44_vm2, %v35_v20 }
   0xb   :  { %428 = vmatmul.mubr.msk.bf16.vlgmr.msra.gmra.mrb[0].mxu1 %vm44_vm2, %v39_v21  ;;  %423 = vmatprep.mubr.msk.bf16.mxu0 %vm44_vm2, %v36_v22 }
   0xc   :  { %431 = vmatprep.mubr.msk.bf16.mxu1 %vm44_vm2, %v40_v23 }
  0x12   :  { %424 = vmatmul.mubr.msk.bf16.gmra.mrb[4].mxu0 %vm44_vm2, %v37_v28 }
  0x13   :  { %432 = vmatmul.mubr.msk.bf16.gmra.mrb[4].mxu1 %vm44_vm2, %v41_v29 }
  0xdd   :  { %v421_v31 = vpop.f32.mrb[0].mxu0 }
  0xde   :  { %v429_v33 = vpop.f32.mrb[0].mxu1  ;;  %v182_v34 = vmul.f32 %v421_v31, %v327_v30  ;;  %v110_v36 = vpop.f32.mrb[1].mxu0 }
  0xdf   :  { %v190_v35 = vmul.f32 %v429_v33, %v327_v30  ;;  %v142_v37 = vpop.f32.mrb[1].mxu1  ;;  %v180_v38 = vmul.f32 %v327_v30, %v110_v36  ;;  %v422_v40 = vpop.f32.mrb[2].mxu0 }
  0xe0   :  { %v188_v39 = vmul.f32 %v327_v30, %v142_v37  ;;  %v430_v41 = vpop.f32.mrb[2].mxu1  ;;  %v205_v42 = vadd.f32 %v529_v32, %v182_v34  ;;  %v183_v44 = vmul.f32 %v422_v40, %v327_v30  ;;  %v113_v46 = vpop.f32.mrb[3].mxu0 }
  0xe1   :  { %v213_v43 = vadd.f32 %v529_v32, %v190_v35  ;;  %v191_v45 = vmul.f32 %v430_v41, %v327_v30  ;;  %v145_v47 = vpop.f32.mrb[3].mxu1  ;;  %v203_v48 = vadd.f32 %v529_v32, %v180_v38  ;;  %v181_v50 = vmul.f32 %v327_v30, %v113_v46 }
  0xe2   :  { %v211_v49 = vadd.f32 %v529_v32, %v188_v39  ;;  %v189_v51 = vmul.f32 %v327_v30, %v145_v47  ;;  %v206_v52 = vadd.f32 %v529_v32, %v183_v44  ;;  %v221_v56 = vmax.f32 %v205_v42, 0.0 }
  0xe3   :  { %v214_v53 = vadd.f32 %v529_v32, %v191_v45  ;;  %v204_v54 = vadd.f32 %v529_v32, %v181_v50  ;;  %v229_v57 = vmax.f32 %v213_v43, 0.0  ;;  %v219_v60 = vmax.f32 %v203_v48, 0.0 }
  0xe4   :  { %v212_v55 = vadd.f32 %v529_v32, %v189_v51  ;;  %v222_v58 = vmax.f32 %v206_v52, 0.0  ;;  %v227_v61 = vmax.f32 %v211_v49, 0.0 }
  0xe5   :  { %v230_v59 = vmax.f32 %v214_v53, 0.0  ;;  %v220_v62 = vmax.f32 %v204_v54, 0.0  ;;  %v425_v0 = vpop.f32.mrb[4].mxu0 }
  0xe6   :  { %v228_v63 = vmax.f32 %v212_v55, 0.0  ;;  %v433_v1 = vpop.f32.mrb[4].mxu1  ;;  %v369_v2 = vpack.c.bf16 %v222_v58, %v221_v56  ;;  %v186_v4 = vmul.f32 %v425_v0, %v327_v30  ;;  %v126_v6 = vpop.f32.mrb[5].mxu0 }
  0xe7   :  { %v389_v3 = vpack.c.bf16 %v230_v59, %v229_v57  ;;  %v194_v5 = vmul.f32 %v433_v1, %v327_v30  ;;  %v158_v7 = vpop.f32.mrb[5].mxu1  ;;  %v364_v8 = vpack.c.bf16 %v220_v62, %v219_v60  ;;  %v184_v10 = vmul.f32 %v327_v30, %v126_v6  ;;  %v426_v12 = vpop.f32.mrb[6].mxu0 }
  0xe8   :  { %v384_v9 = vpack.c.bf16 %v228_v63, %v227_v61  ;;  %v192_v11 = vmul.f32 %v327_v30, %v158_v7  ;;  %v434_v13 = vpop.f32.mrb[6].mxu1  ;;  %401 = vst [vmem:[%s575_s4 + $0x8] sm:$0xff] %v369_v2   ;;  %v209_v14 = vadd.f32 %v529_v32, %v186_v4  ;;  %v187_v16 = vmul.f32 %v426_v12, %v327_v30  ;;  %v129_v18 = vpop.f32.mrb[7].mxu0 }
  0xe9   :  { %405 = vst [vmem:[%s575_s4 + $0x28] sm:$0xff] %v389_v3   ;;  %v217_v15 = vadd.f32 %v529_v32, %v194_v5  ;;  %v195_v17 = vmul.f32 %v434_v13, %v327_v30  ;;  %v161_v19 = vpop.f32.mrb[7].mxu1  ;;  %365 = vst [vmem:[%s575_s4] sm:$0xff] %v364_v8   ;;  %v207_v20 = vadd.f32 %v529_v32, %v184_v10 }
  0xea   :  { %404 = vst [vmem:[%s575_s4 + $0x20] sm:$0xff] %v384_v9   ;;  %v215_v21 = vadd.f32 %v529_v32, %v192_v11  ;;  %v185_v22 = vmul.f32 %v327_v30, %v129_v18  ;;  %v193_v23 = vmul.f32 %v327_v30, %v161_v19  ;;  %v210_v24 = vadd.f32 %v529_v32, %v187_v16 }
  0xeb   :  { %v218_v25 = vadd.f32 %v529_v32, %v195_v17  ;;  %v225_v28 = vmax.f32 %v209_v14, 0.0  ;;  %v233_v29 = vmax.f32 %v217_v15, 0.0  ;;  %v223_v34 = vmax.f32 %v207_v20, 0.0 }
  0xec   :  { %v208_v26 = vadd.f32 %v529_v32, %v185_v22  ;;  %v216_v27 = vadd.f32 %v529_v32, %v193_v23  ;;  %v226_v31 = vmax.f32 %v210_v24, 0.0  ;;  %v231_v35 = vmax.f32 %v215_v21, 0.0 }
  0xed   :  { %v234_v33 = vmax.f32 %v218_v25, 0.0 }
  0xee   :  { %v224_v36 = vmax.f32 %v208_v26, 0.0  ;;  %v232_v37 = vmax.f32 %v216_v27, 0.0  ;;  %v379_v38 = vpack.c.bf16 %v226_v31, %v225_v28 }
  0xef   :  { %v399_v39 = vpack.c.bf16 %v234_v33, %v233_v29 }
  0xf0   :  { %v374_v40 = vpack.c.bf16 %v224_v36, %v223_v34  ;;  %v394_v30 = vpack.c.bf16 %v232_v37, %v231_v35  ;;  %403 = vst [vmem:[%s575_s4 + $0x18] sm:$0xff] %v379_v38  }
  0xf1   :  { %407 = vst [vmem:[%s575_s4 + $0x38] sm:$0xff] %v399_v39  }
  0xf2   :  { %402 = vst [vmem:[%s575_s4 + $0x10] sm:$0xff] %v374_v40   ;;  %406 = vst [vmem:[%s575_s4 + $0x30] sm:$0xff] %v394_v30  }

// kernel: tg_forward.11
= control target key start
LH: loop header
LB: loop body
LE: loop exit
PB: predicated region body
PF: predicated region fallthrough
CT: control target
= control target key end

     0   :  { %s660_s1 = inlined_call_operand.vmem [shape: f32[512,64], index: 1, kind: input, shape index: {}]   ;;  %s661_s0 = inlined_call_operand.vmem [shape: bf16[32,512], index: 0, kind: input, shape index: {}]   ;;  %s662_s2 = inlined_call_operand.vmem [shape: f32[1,64], index: 2, kind: input, shape index: {}]   ;;  %s663_s3 = inlined_call_operand.vmem [shape: f32[1,64], index: 3, kind: input, shape index: {}]   ;;  %s664_s4 = inlined_call_operand.vmem [shape: bf16[32,64], index: 4, kind: output, shape index: {}]  }
   0x1   :  { %v42_v0 = vld [vmem:[%s660_s1 + $0x80] sm:$0xff]  ;;  %v43_v1 = vld [vmem:[%s660_s1 + $0x88] sm:$0xff]  ;;  %v44_v11 = vld [vmem:[%s660_s1 + $0x90] sm:$0xff] }
   0x2   :  { %v74_v2 = vld [vmem:[%s660_s1 + $0x180] sm:$0xff]  ;;  %v98_v3 = vpack.c.bf16 %v43_v1, %v42_v0  ;;  %v75_v4 = vld [vmem:[%s660_s1 + $0x188] sm:$0xff]  ;;  %v45_v13 = vld [vmem:[%s660_s1 + $0x98] sm:$0xff] }
   0x3   :  { %v26_v5 = vld [vmem:[%s660_s1] sm:$0xff]  ;;  %v27_v6 = vld [vmem:[%s660_s1 + $0x8] sm:$0xff]  ;;  %v114_v7 = vpack.c.bf16 %v75_v4, %v74_v2  ;;  %v76_v14 = vld [vmem:[%s660_s1 + $0x190] sm:$0xff]  ;;  %v99_v16 = vpack.c.bf16 %v45_v13, %v44_v11 }
   0x4   :  { %v90_v8 = vpack.c.bf16 %v27_v6, %v26_v5  ;;  %v58_v9 = vld [vmem:[%s660_s1 + $0x100] sm:$0xff]  ;;  %v59_v10 = vld [vmem:[%s660_s1 + $0x108] sm:$0xff]  ;;  %339 = vmatprep.subr.bf16.mxu0 %v98_v3  ;;  %v77_v15 = vld [vmem:[%s660_s1 + $0x198] sm:$0xff] }
   0x5   :  { %v106_v12 = vpack.c.bf16 %v59_v10, %v58_v9  ;;  %367 = vmatprep.subr.bf16.mxu1 %v114_v7  ;;  %v115_v17 = vpack.c.bf16 %v77_v15, %v76_v14  ;;  %v28_v18 = vld [vmem:[%s660_s1 + $0x10] sm:$0xff]  ;;  %v29_v19 = vld [vmem:[%s660_s1 + $0x18] sm:$0xff]  ;;  %v46_v23 = vld [vmem:[%s660_s1 + $0xa0] sm:$0xff] }
   0x6   :  { %340 = vmatpush3.bf16.msra.mxu0 %v90_v8  ;;  %v60_v20 = vld [vmem:[%s660_s1 + $0x110] sm:$0xff]  ;;  %v91_v21 = vpack.c.bf16 %v29_v19, %v28_v18  ;;  %v61_v22 = vld [vmem:[%s660_s1 + $0x118] sm:$0xff]  ;;  %v47_v24 = vld [vmem:[%s660_s1 + $0xa8] sm:$0xff] }
   0x7   :  { %368 = vmatpush3.bf16.msra.mxu1 %v106_v12  ;;  %341 = vmatprep.subr.bf16.mxu0 %v99_v16  ;;  %v107_v25 = vpack.c.bf16 %v61_v22, %v60_v20  ;;  %v100_v26 = vpack.c.bf16 %v47_v24, %v46_v23  ;;  %v78_v27 = vld [vmem:[%s660_s1 + $0x1a0] sm:$0xff]  ;;  %v79_v28 = vld [vmem:[%s660_s1 + $0x1a8] sm:$0xff]  ;;  %v48_v35 = vld [vmem:[%s660_s1 + $0xb0] sm:$0xff] }
   0x8   :  { %369 = vmatprep.subr.bf16.mxu1 %v115_v17  ;;  %v30_v29 = vld [vmem:[%s660_s1 + $0x20] sm:$0xff]  ;;  %v116_v30 = vpack.c.bf16 %v79_v28, %v78_v27  ;;  %v31_v31 = vld [vmem:[%s660_s1 + $0x28] sm:$0xff]  ;;  %v49_v36 = vld [vmem:[%s660_s1 + $0xb8] sm:$0xff] }
   0x9   :  { %v62_v32 = vld [vmem:[%s660_s1 + $0x120] sm:$0xff]  ;;  %v63_v33 = vld [vmem:[%s660_s1 + $0x128] sm:$0xff]  ;;  %v92_v34 = vpack.c.bf16 %v31_v31, %v30_v29  ;;  %v80_v37 = vld [vmem:[%s660_s1 + $0x1b0] sm:$0xff]  ;;  %v101_v39 = vpack.c.bf16 %v49_v36, %v48_v35 }
   0xa   :  { %342 = vmatpush3.bf16.msra.mxu0 %v91_v21  ;;  %v108_v38 = vpack.c.bf16 %v63_v33, %v62_v32  ;;  %v81_v40 = vld [vmem:[%s660_s1 + $0x1b8] sm:$0xff]  ;;  %v32_v41 = vld [vmem:[%s660_s1 + $0x30] sm:$0xff]  ;;  %v50_v46 = vld [vmem:[%s660_s1 + $0xc0] sm:$0xff] }
   0xb   :  { %370 = vmatpush3.bf16.msra.mxu1 %v107_v25  ;;  %343 = vmatprep.subr.bf16.mxu0 %v100_v26  ;;  %v33_v42 = vld [vmem:[%s660_s1 + $0x38] sm:$0xff]  ;;  %v117_v43 = vpack.c.bf16 %v81_v40, %v80_v37  ;;  %v64_v44 = vld [vmem:[%s660_s1 + $0x130] sm:$0xff]  ;;  %v51_v47 = vld [vmem:[%s660_s1 + $0xc8] sm:$0xff] }
   0xc   :  { %371 = vmatprep.subr.bf16.mxu1 %v116_v30  ;;  %v65_v45 = vld [vmem:[%s660_s1 + $0x138] sm:$0xff]  ;;  %v82_v48 = vld [vmem:[%s660_s1 + $0x1c0] sm:$0xff]  ;;  %v83_v49 = vld [vmem:[%s660_s1 + $0x1c8] sm:$0xff]  ;;  %v93_v50 = vpack.c.bf16 %v33_v42, %v32_v41  ;;  %v102_v52 = vpack.c.bf16 %v51_v47, %v50_v46 }
   0xd   :  { %v109_v51 = vpack.c.bf16 %v65_v45, %v64_v44  ;;  %v34_v53 = vld [vmem:[%s660_s1 + $0x40] sm:$0xff]  ;;  %v35_v54 = vld [vmem:[%s660_s1 + $0x48] sm:$0xff]  ;;  %v118_v56 = vpack.c.bf16 %v83_v49, %v82_v48  ;;  %v52_v58 = vld [vmem:[%s660_s1 + $0xd0] sm:$0xff] }
   0xe   :  { %344 = vmatpush3.bf16.msra.mxu0 %v92_v34  ;;  %v66_v55 = vld [vmem:[%s660_s1 + $0x140] sm:$0xff]  ;;  %v67_v57 = vld [vmem:[%s660_s1 + $0x148] sm:$0xff]  ;;  %v53_v59 = vld [vmem:[%s660_s1 + $0xd8] sm:$0xff]  ;;  %v94_v62 = vpack.c.bf16 %v35_v54, %v34_v53 }
   0xf   :  { %372 = vmatpush3.bf16.msra.mxu1 %v108_v38  ;;  %345 = vmatprep.subr.bf16.mxu0 %v101_v39  ;;  %v84_v60 = vld [vmem:[%s660_s1 + $0x1d0] sm:$0xff]  ;;  %v85_v61 = vld [vmem:[%s660_s1 + $0x1d8] sm:$0xff]  ;;  %v110_v0 = vpack.c.bf16 %v67_v57, %v66_v55  ;;  %v103_v1 = vpack.c.bf16 %v53_v59, %v52_v58  ;;  %v54_v6 = vld [vmem:[%s660_s1 + $0xe0] sm:$0xff] }
  0x10   :  { %373 = vmatprep.subr.bf16.mxu1 %v117_v43  ;;  %v36_v63 = vld [vmem:[%s660_s1 + $0x50] sm:$0xff]  ;;  %v37_v2 = vld [vmem:[%s660_s1 + $0x58] sm:$0xff]  ;;  %v119_v5 = vpack.c.bf16 %v85_v61, %v84_v60  ;;  %v55_v7 = vld [vmem:[%s660_s1 + $0xe8] sm:$0xff] }
  0x11   :  { %v68_v3 = vld [vmem:[%s660_s1 + $0x150] sm:$0xff]  ;;  %v69_v4 = vld [vmem:[%s660_s1 + $0x158] sm:$0xff]  ;;  %v86_v8 = vld [vmem:[%s660_s1 + $0x1e0] sm:$0xff]  ;;  %v95_v12 = vpack.c.bf16 %v37_v2, %v36_v63  ;;  %v104_v17 = vpack.c.bf16 %v55_v7, %v54_v6 }
  0x12   :  { %346 = vmatpush3.bf16.msra.mxu0 %v93_v50  ;;  %v87_v9 = vld [vmem:[%s660_s1 + $0x1e8] sm:$0xff]  ;;  %v38_v10 = vld [vmem:[%s660_s1 + $0x60] sm:$0xff]  ;;  %v56_v15 = vld [vmem:[%s660_s1 + $0xf0] sm:$0xff]  ;;  %v111_v16 = vpack.c.bf16 %v69_v4, %v68_v3 }
  0x13   :  { %374 = vmatpush3.bf16.msra.mxu1 %v109_v51  ;;  %347 = vmatprep.subr.bf16.mxu0 %v102_v52  ;;  %v39_v11 = vld [vmem:[%s660_s1 + $0x68] sm:$0xff]  ;;  %v70_v13 = vld [vmem:[%s660_s1 + $0x160] sm:$0xff]  ;;  %v57_v18 = vld [vmem:[%s660_s1 + $0xf8] sm:$0xff]  ;;  %v120_v19 = vpack.c.bf16 %v87_v9, %v86_v8 }
  0x14   :  { %375 = vmatprep.subr.bf16.mxu1 %v118_v56  ;;  %v71_v14 = vld [vmem:[%s660_s1 + $0x168] sm:$0xff]  ;;  %v88_v20 = vld [vmem:[%s660_s1 + $0x1f0] sm:$0xff]  ;;  %v89_v22 = vld [vmem:[%s660_s1 + $0x1f8] sm:$0xff]  ;;  %v96_v24 = vpack.c.bf16 %v39_v11, %v38_v10  ;;  %v105_v27 = vpack.c.bf16 %v57_v18, %v56_v15 }
  0x15   :  { %v397_v21 = vld [vmem:[%s661_s0 + $0x4] ss:$16 sps:$4 sm:$0xff]   ;;  %v400_v23 = vld [vmem:[%s661_s0 + $0xc] ss:$16 sps:$4 sm:$0xff]   ;;  %v112_v26 = vpack.c.bf16 %v71_v14, %v70_v13  ;;  %v121_v29 = vpack.c.bf16 %v89_v22, %v88_v20  ;;  %v395_v34 = vld [vmem:[%s661_s0] ss:$16 sps:$4 sm:$0xff]  }
  0x16   :  { %348 = vmatpush3.bf16.msra.mxu0 %v94_v62  ;;  %v40_v25 = vld [vmem:[%s660_s1 + $0x70] sm:$0xff]  ;;  %194 = vmatprep.mubr.bf16.mxu0 %v397_v21  ;;  %v41_v28 = vld [vmem:[%s660_s1 + $0x78] sm:$0xff]  ;;  %v318_v49 = vld [vmem:[%s662_s2] ss:$0 sm:$0xff] }
  0x17   :  { %376 = vmatpush3.bf16.msra.mxu1 %v110_v0  ;;  %349 = vmatprep.subr.bf16.mxu0 %v103_v1  ;;  %v72_v30 = vld [vmem:[%s660_s1 + $0x170] sm:$0xff]  ;;  %v73_v31 = vld [vmem:[%s660_s1 + $0x178] sm:$0xff]  ;;  %v97_v32 = vpack.c.bf16 %v41_v28, %v40_v25  ;;  %v319_v54 = vld [vmem:[%s663_s3] ss:$0 sm:$0xff] }
  0x18   :  { %377 = vmatprep.subr.bf16.mxu1 %v119_v5  ;;  %243 = vmatprep.mubr.bf16.mxu1 %v400_v23  ;;  %v113_v33 = vpack.c.bf16 %v73_v31, %v72_v30  ;;  %v398_v35 = vld [vmem:[%s661_s0 + $0x8] ss:$16 sps:$4 sm:$0xff]   ;;  %v401_v36 = vld [vmem:[%s661_s0 + $0x24] ss:$16 sps:$4 sm:$0xff]   ;;  %v403_v37 = vld [vmem:[%s661_s0 + $0x2c] ss:$16 sps:$4 sm:$0xff]  }
  0x19   :  { %v405_v38 = vld [vmem:[%s661_s0 + $0x20] ss:$16 sps:$4 sm:$0xff]   ;;  %v406_v39 = vld [vmem:[%s661_s0 + $0x28] ss:$16 sps:$4 sm:$0xff]  }
  0x1a   :  { %350 = vmatpush3.bf16.msra.mxu0 %v95_v12 }
  0x1b   :  { %378 = vmatpush3.bf16.msra.mxu1 %v111_v16  ;;  %351 = vmatprep.subr.bf16.mxu0 %v104_v17 }
  0x1c   :  { %379 = vmatprep.subr.bf16.mxu1 %v120_v19 }
  0x1e   :  { %352 = vmatpush3.bf16.msra.mxu0 %v96_v24 }
  0x1f   :  { %380 = vmatpush3.bf16.msra.mxu1 %v112_v26  ;;  %353 = vmatprep.subr.bf16.mxu0 %v105_v27 }
  0x20   :  { %381 = vmatprep.subr.bf16.mxu1 %v121_v29 }
  0x22   :  { %354 = vmatpush3.bf16.msra.mxu0 %v97_v32 }
  0x23   :  { %382 = vmatpush3.bf16.msra.mxu1 %v113_v33 }
  0x25   :  { %195 = vmatmul.mubr.bf16.vlgmr.msra.gmra.mrb[0].mxu0 %v395_v34 }
  0x26   :  { %244 = vmatmul.mubr.bf16.vlgmr.msra.gmra.mrb[0].mxu1 %v398_v35  ;;  %202 = vmatprep.mubr.bf16.mxu0 %v401_v36 }
  0x27   :  { %251 = vmatprep.mubr.bf16.mxu1 %v403_v37 }
  0x2d   :  { %203 = vmatmul.mubr.bf16.gmra.mrb[4].mxu0 %v405_v38 }
  0x2e   :  { %252 = vmatmul.mubr.bf16.gmra.mrb[4].mxu1 %v406_v39 }
  0xf8   :  { %v355_v40 = vpop.f32.mrb[0].mxu0 }
  0xf9   :  { %v383_v41 = vpop.f32.mrb[0].mxu1  ;;  %v356_v42 = vpop.f32.mrb[1].mxu0 }
  0xfa   :  { %v357_v43 = vadd.f32 %v356_v42, %v355_v40  ;;  %v384_v44 = vpop.f32.mrb[1].mxu1  ;;  %v358_v45 = vpop.f32.mrb[2].mxu0 }
  0xfb   :  { %v385_v46 = vadd.f32 %v384_v44, %v383_v41  ;;  %v386_v47 = vpop.f32.mrb[2].mxu1  ;;  %v359_v48 = vpop.f32.mrb[3].mxu0 }
  0xfc   :  { %v360_v50 = vadd.f32 %v359_v48, %v358_v45  ;;  %v387_v51 = vpop.f32.mrb[3].mxu1 }
  0xfd   :  { %v246_v52 = vadd.f32 %v385_v46, %v357_v43  ;;  %v388_v53 = vadd.f32 %v387_v51, %v386_v47 }
  0xff   :  { %v267_v55 = vmul.f32 %v318_v49, %v246_v52  ;;  %v249_v56 = vadd.f32 %v388_v53, %v360_v50 }
 0x100   :  { %v361_v57 = vpop.f32.mrb[4].mxu0 }
 0x101   :  { %v278_v58 = vadd.f32 %v319_v54, %v267_v55  ;;  %v268_v59 = vmul.f32 %v318_v49, %v249_v56  ;;  %v389_v60 = vpop.f32.mrb[4].mxu1  ;;  %v362_v61 = vpop.f32.mrb[5].mxu0 }
 0x102   :  { %v363_v62 = vadd.f32 %v362_v61, %v361_v57  ;;  %v390_v63 = vpop.f32.mrb[5].mxu1  ;;  %v364_v0 = vpop.f32.mrb[6].mxu0 }
 0x103   :  { %v279_v1 = vadd.f32 %v319_v54, %v268_v59  ;;  %v391_v2 = vadd.f32 %v390_v63, %v389_v60  ;;  %v392_v3 = vpop.f32.mrb[6].mxu1  ;;  %v365_v4 = vpop.f32.mrb[7].mxu0  ;;  %v282_v7 = vmax.f32 %v278_v58, 0.0 }
 0x104   :  { %v366_v5 = vadd.f32 %v365_v4, %v364_v0  ;;  %v393_v6 = vpop.f32.mrb[7].mxu1 }
 0x105   :  { %v283_v8 = vmax.f32 %v279_v1, 0.0  ;;  %v254_v9 = vadd.f32 %v391_v2, %v363_v62  ;;  %v394_v10 = vadd.f32 %v393_v6, %v392_v3 }
 0x107   :  { %v331_v11 = vpack.c.bf16 %v283_v8, %v282_v7  ;;  %v269_v12 = vmul.f32 %v318_v49, %v254_v9  ;;  %v257_v13 = vadd.f32 %v394_v10, %v366_v5 }
 0x109   :  { %332 = vst [vmem:[%s664_s4] sm:$0xff] %v331_v11   ;;  %v280_v14 = vadd.f32 %v319_v54, %v269_v12  ;;  %v270_v15 = vmul.f32 %v318_v49, %v257_v13 }
 0x10b   :  { %v281_v16 = vadd.f32 %v319_v54, %v270_v15  ;;  %v284_v17 = vmax.f32 %v280_v14, 0.0 }
 0x10d   :  { %v285_v18 = vmax.f32 %v281_v16, 0.0 }
 0x10f   :  { %v336_v19 = vpack.c.bf16 %v285_v18, %v284_v17 }
 0x111   :  { %338 = vst [vmem:[%s664_s4 + $0x8] sm:$0xff] %v336_v19  }

// kernel: tg_forward.9
= control target key start
LH: loop header
LB: loop body
LE: loop exit
PB: predicated region body
PF: predicated region fallthrough
CT: control target
= control target key end

     0   :  { %s720_s15 = smov 0   ;;  %s722_s16 = smov 0   ;;  %s812_s0 = inlined_call_operand.vmem [shape: f32[32,3], index: 0, kind: input, shape index: {}]   ;;  %s813_s1 = inlined_call_operand.vmem [shape: f32[3,512], index: 1, kind: input, shape index: {}]   ;;  %s814_s2 = inlined_call_operand.vmem [shape: f32[1,512], index: 2, kind: input, shape index: {}]   ;;  %s815_s3 = inlined_call_operand.vmem [shape: f32[1,512], index: 3, kind: input, shape index: {}]   ;;  %s816_s4 = inlined_call_operand.vmem [shape: bf16[32,512], index: 4, kind: output, shape index: {}]  }
   0x1   :  { %s724_s17 = smov 0   ;;  %s726_s18 = smov 0  }
   0x2   :  { %s728_s19 = smov 0  }
   0x3 LB: > { %s581_s20 = sadd.s32 4294967295, %s691_s19   ;;  %s23_s21 = sadd.s32 1, %s687_s18  ;;  %s691_s19 = sphi %s728_s19, %s14_s19   ;;  %s687_s18 = sphi %s726_s18, %s821_s18   ;;  %s683_s17 = sphi %s724_s17, %s820_s17   ;;  %s679_s16 = sphi %s722_s16, %s819_s16   ;;  %s675_s15 = sphi %s720_s15, %s818_s15  }
   0x4   : > { %p24_p0 = scmp.ge.s32.totalorder %s23_s21, 2  ;;  %s139_s22 = sadd.s32 1, %s679_s16 }
   0x5   : > { %p149_p1 = scmp.ne.s32.totalorder %s679_s16, %s675_s15  ;;  %p150_p2 = scmp.eq.s32.totalorder %s581_s20, 1 }
   0x6   : > { %s823_s21 = smov (%p24_p0, %s23_s21), 0  ;;  %p586_p4 = scmp.ge.s32.totalorder %s691_s19, 1 }
   0x7   : > { %p752_p3 = por %p150_p2, %p149_p1  ;;  %s135_s24 = ssub.s32 %s687_s18, %s823_s21 }
   0x8   : > { %p208_p5 = scmp.lt.s32.totalorder %s691_s19, 3  ;;  %p137_p6 = scmp.eq.s32.totalorder %s135_s24, 0 }
   0xa   : > { %p209_p7 = pnand %p586_p4, %p208_p5 }
   0xb   : > { %s761_s25 = scalar_select %p137_p6, %s679_s16, %s139_s22  }
   0xc   : > { %212 = sbr.rel (%p209_p7) target bundleno = 265 (0x109), region = 36  ;;  %s588_s26 = sshll.u32 (!%p209_p7), %s683_s17, 1  ;;  %v693_v0 = vmov (!%p209_p7), 0   ;;  %vm290_vm0 = vcmask (!%p209_p7), 1040384   ;;  %vm291_vm1 = vcmask (!%p209_p7), 1041408   ;;  %v694_v1 = vmov (!%p209_p7), 65535  }
   0xd   : > { %p253_p8 = scmp.lt.s32.totalorder (!%p209_p7), %s588_s26, 3  ;;  %332 = vmatprep.mubr.bf16.mxu0 (!%p209_p7), %v693_v0  ;;  %342 = vmatprep.mubr.bf16.mxu1 (!%p209_p7), %v693_v0  ;;  %v292_v2 = vsel (!%p209_p7), %vm290_vm0, 4294967295, %v694_v1  ;;  %v271_v8 = vld [vmem:[%s812_s0] sm:$0xff] (!%p209_p7)  ;;  %v272_v10 = vld [vmem:[%s812_s0 + $0x8] sm:$0xff] (!%p209_p7)  ;;  %v273_v11 = vld [vmem:[%s812_s0 + $0x10] sm:$0xff] (!%p209_p7)  ;;  %vm283_vm2 = vcmask (!%p209_p7), 23552   ;;  %v355_v16 = vlaneseq (!%p209_p7) }
   0xe   : > { %v293_v5 = vsel (!%p209_p7), %vm291_vm1, %v292_v2, 0  ;;  %v274_v12 = vld [vmem:[%s812_s0 + $0x18] sm:$0xff] (!%p209_p7)  ;;  %v275_v14 = vpack.c.bf16 (!%p209_p7), %v272_v10, %v271_v8  ;;  %s243_s28 = sand.u32 (!%p209_p7), 1, %s675_s15  }
   0xf   : > { %v276_v15 = vpack.c.bf16 (!%p209_p7), %v274_v12, %v273_v11  ;;  %v356_v17 = vshrl.u32 (!%p209_p7), %v355_v16, 7 }
  0x11   : > { %v357_v18 = vsub.s32 (!%p209_p7), 0, %v356_v17  ;;  %v361_v20 = vsub.s32 (!%p209_p7), 1, %v356_v17 }
  0x13   : > { %s825_s26 = smov (!%p253_p8, %s588_s26), 3  ;;  %s607_s29 = sshll.u32 (%p752_p3), %s683_s17, 3 }
  0x14   : > { %s589_s27 = sshll.u32 %s825_s26, 2  ;;  %s261_s20 = scalar_lea.vmem %s814_s2, %s825_s26 }
  0x15   : > { %s256_s30 = scalar_lea.vmem %s813_s1, %s589_s27  ;;  %s266_s27 = scalar_lea.vmem %s815_s3, %s825_s26  ;;  %v353_v19 = vld [vmem:[%s261_s20] sm:$0x3] }
  0x16   : > { %v277_v3 = vld [vmem:[%s256_s30] sm:$0x77]  ;;  %v358_v22 = vrot.slane %v353_v19, %v357_v18  ;;  %v362_v23 = vrot.slane %v353_v19, %v361_v20  ;;  %s587_s26 = sshll.u32 %s243_s28, 5  ;;  %s441_s6 = scalar_lea.vmem (%p752_p3), %s816_s4, %s607_s29 }
  0x17   : > { %v279_v4 = vcombine.high %v277_v3, %v277_v3  ;;  %v281_v6 = vpack.c.bf16 %v277_v3, %v277_v3  ;;  %v373_v21 = vld [vmem:[%s266_s27] sm:$0x3]  ;;  %s245_s15 = scalar_lea.vmem [#allocation2], %s587_s26 }
  0x18   : > { %v378_v24 = vrot.slane %v373_v21, %v357_v18  ;;  %v382_v27 = vrot.slane %v373_v21, %v361_v20 }
  0x19   : > { %v282_v7 = vpack.c.bf16 %v279_v4, %v279_v4  ;;  %v295_v9 = vand.u32 %v293_v5, %v281_v6 }
  0x1b   : > { %v298_v13 = vand.u32 %v293_v5, %v282_v7 }
  0x1d   : > { %300 = vmatprep.subr.bf16.mxu0 %v298_v13  ;;  %608 = vmatprep.subr.bf16.mxu1 %v298_v13 }
  0x1e   : > { %301 = vmatpush1.bf16.msra.mxu0 %v295_v9  ;;  %609 = vmatpush1.bf16.msra.mxu1 %v295_v9 }
  0x21   : > { %592 = vmatmul.mubr.msk.bf16.vlgmr.msra.gmra.mrb[0].mxu0 %vm283_vm2, %v275_v14  ;;  %593 = vmatmul.mubr.msk.bf16.vlgmr.msra.gmra.mrb[0].mxu1 %vm283_vm2, %v276_v15 }
  0xf4   : > { %v334_v25 = vpop.f32.mrb[0].mxu0  ;;  %v344_v26 = vpop.f32.mrb[0].mxu1 }
  0xf5   : > { %v365_v28 = vmul.f32 %v358_v22, %v334_v25  ;;  %v369_v29 = vmul.f32 %v358_v22, %v344_v26  ;;  %v336_v30 = vpop.f32.mrb[1].mxu0  ;;  %v346_v31 = vpop.f32.mrb[1].mxu1 }
  0xf6   : > { %v366_v32 = vmul.f32 %v362_v23, %v336_v30  ;;  %v370_v33 = vmul.f32 %v362_v23, %v346_v31  ;;  %v338_v34 = vpop.f32.mrb[2].mxu0  ;;  %v348_v35 = vpop.f32.mrb[2].mxu1 }
  0xf7   : > { %v385_v36 = vadd.f32 %v378_v24, %v365_v28  ;;  %v389_v37 = vadd.f32 %v378_v24, %v369_v29  ;;  %v367_v38 = vmul.f32 %v358_v22, %v338_v34  ;;  %v371_v39 = vmul.f32 %v358_v22, %v348_v35  ;;  %v340_v40 = vpop.f32.mrb[3].mxu0  ;;  %v350_v41 = vpop.f32.mrb[3].mxu1 }
  0xf8   : > { %v386_v42 = vadd.f32 %v382_v27, %v366_v32  ;;  %v390_v43 = vadd.f32 %v382_v27, %v370_v33  ;;  %v368_v44 = vmul.f32 %v362_v23, %v340_v40  ;;  %v372_v45 = vmul.f32 %v362_v23, %v350_v41 }
  0xf9   : > { %v393_v46 = vmax.f32 %v385_v36, 0.0  ;;  %v397_v47 = vmax.f32 %v389_v37, 0.0  ;;  %v387_v48 = vadd.f32 %v378_v24, %v367_v38  ;;  %v391_v49 = vadd.f32 %v378_v24, %v371_v39 }
  0xfa   : > { %v394_v50 = vmax.f32 %v386_v42, 0.0  ;;  %v398_v51 = vmax.f32 %v390_v43, 0.0  ;;  %v388_v52 = vadd.f32 %v382_v27, %v368_v44  ;;  %v392_v53 = vadd.f32 %v382_v27, %v372_v45  ;;  %435 = sbr.rel (!%p752_p3) target bundleno = 265 (0x109), region = 40 }
  0xfb   : > { %v395_v54 = vmax.f32 %v387_v48, 0.0  ;;  %v399_v55 = vmax.f32 %v391_v49, 0.0 }
  0xfc   : > { %v603_v56 = vpack.c.bf16 %v394_v50, %v393_v46  ;;  %v605_v57 = vpack.c.bf16 %v398_v51, %v397_v47  ;;  %v396_v58 = vmax.f32 %v388_v52, 0.0  ;;  %v400_v59 = vmax.f32 %v392_v53, 0.0 }
  0xfe   : > { %425 = vst [vmem:[%s245_s15] sm:$0xff] %v603_v56  ;;  %427 = vst [vmem:[%s245_s15 + $0x10] sm:$0xff] %v605_v57  ;;  %v604_v60 = vpack.c.bf16 %v396_v58, %v395_v54  ;;  %v606_v61 = vpack.c.bf16 %v400_v59, %v399_v55 }
 0x100   : > { %426 = vst [vmem:[%s245_s15 + $0x8] sm:$0xff] %v604_v60  ;;  %428 = vst [vmem:[%s245_s15 + $0x18] sm:$0xff] %v606_v61 }
 0x105   : > { %v475_v62 = vld [vmem:[%s245_s15] sm:$0xff]  ;;  %v479_v0 = vld [vmem:[%s245_s15 + $0x10] sm:$0xff] }
 0x106   : > { %476 = vst [vmem:[%s441_s6] sm:$0xff] %v475_v62  ;;  %480 = vst [vmem:[%s441_s6 + $0x20] sm:$0xff] %v479_v0 }
 0x107   : > { %v477_v63 = vld [vmem:[%s245_s15 + $0x8] sm:$0xff]  ;;  %v481_v1 = vld [vmem:[%s245_s15 + $0x18] sm:$0xff] }
 0x108   : > { %478 = vst [vmem:[%s441_s6 + $0x10] sm:$0xff] %v477_v63  ;;  %482 = vst [vmem:[%s441_s6 + $0x30] sm:$0xff] %v481_v1 }
 0x109 PF: > { %s14_s19 = sadd.s32 1, %s691_s19   ;;  %s818_s15 = smov %s679_s16 }
 0x10a   : > { %p11_p9 = scmp.ge.s32.totalorder %s14_s19, 4   ;;  %s819_s16 = smov %s761_s25 }
 0x10b   : > { %s820_s17 = smov %s687_s18  ;;  %s821_s18 = smov %s823_s21 }
 0x10c   :  { %13 = sbr.rel (!%p11_p9) target bundleno = 3 (0x3), region = 113 }

// kernel: tg_forward.12
= control target key start
LH: loop header
LB: loop body
LE: loop exit
PB: predicated region body
PF: predicated region fallthrough
CT: control target
= control target key end

     0   :  { %s785_s12 = smov 0   ;;  %s1196_s0 = inlined_call_operand.vmem [shape: f32[8,4], index: 0, kind: input, shape index: {}]   ;;  %s1197_s1 = inlined_call_operand.vmem [shape: f32[256,512], index: 1, kind: input, shape index: {}]   ;;  %s1198_s2 = inlined_call_operand.vmem [shape: bf16[2,4,256], index: 2, kind: input, shape index: {}]   ;;  %s1199_s3 = inlined_call_operand.vmem [shape: bf16[2,8,512], index: 3, kind: output, shape index: {}]  }
   0x1 LB: > { %s599_s13 = sadd.s32 4294967295, %s762_s12   ;;  %p603_p0 = scmp.ge.s32.totalorder %s762_s12, 1  ;;  %s762_s12 = sphi %s785_s12, %s13_s12  }
   0x2   : > { %p137_p1 = scmp.lt.s32.totalorder %s762_s12, 3 }
   0x4   : > { %p138_p2 = pnand %p603_p0, %p137_p1 }
   0x5   : > { %p161_p3 = scmp.lt.s32.totalorder (!%p138_p2), %s599_s13, 1  ;;  %v257_v0 = vld [vmem:[%s1197_s1 + $0x8] sm:$0xff] (!%p138_p2)  ;;  %v764_v1 = vmov (!%p138_p2), 0.0   ;;  %v256_v4 = vld [vmem:[%s1197_s1] sm:$0xff] (!%p138_p2)  ;;  %v259_v11 = vld [vmem:[%s1197_s1 + $0x18] sm:$0xff] (!%p138_p2)  ;;  %vm180_vm0 = vcmask (!%p138_p2), 1043456  }
   0x6   : > { %141 = sbr.rel (%p138_p2) target bundleno = 453 (0x1c5), region = 32  ;;  %249 = vmatprep.mubr.f32.mxu0 (!%p138_p2), %v764_v1  ;;  %v261_v2 = vld [vmem:[%s1197_s1 + $0x28] sm:$0xff] (!%p138_p2)  ;;  %v260_v5 = vld [vmem:[%s1197_s1 + $0x20] sm:$0xff] (!%p138_p2)  ;;  %v263_v12 = vld [vmem:[%s1197_s1 + $0x38] sm:$0xff] (!%p138_p2)  ;;  %vm176_vm1 = vcmask (!%p138_p2), 31744  }
   0x7   : > { %v619_v3 = vpack.c.bf16 (!%p138_p2), %v261_v2, %v257_v0  ;;  %v621_v6 = vpack.c.bf16 (!%p138_p2), %v260_v5, %v256_v4  ;;  %v265_v7 = vld [vmem:[%s1197_s1 + $0x48] sm:$0xff] (!%p138_p2)  ;;  %v264_v10 = vld [vmem:[%s1197_s1 + $0x40] sm:$0xff] (!%p138_p2)  ;;  %v258_v19 = vld [vmem:[%s1197_s1 + $0x10] sm:$0xff] (!%p138_p2)  ;;  %v683_v27 = vpack.c.bf16 (!%p138_p2), %v263_v12, %v259_v11 }
   0x8   : > { %v269_v8 = vld [vmem:[%s1197_s1 + $0x68] sm:$0xff] (!%p138_p2)  ;;  %v268_v13 = vld [vmem:[%s1197_s1 + $0x60] sm:$0xff] (!%p138_p2)  ;;  %v262_v20 = vld [vmem:[%s1197_s1 + $0x30] sm:$0xff] (!%p138_p2) }
   0x9   : > { %620 = vmatprep.subr.bf16.mxu1 (!%p138_p2), %v619_v3  ;;  %v623_v9 = vpack.c.bf16 (!%p138_p2), %v269_v8, %v265_v7  ;;  %v625_v15 = vpack.c.bf16 (!%p138_p2), %v268_v13, %v264_v10  ;;  %v273_v16 = vld [vmem:[%s1197_s1 + $0x88] sm:$0xff] (!%p138_p2)  ;;  %v272_v22 = vld [vmem:[%s1197_s1 + $0x80] sm:$0xff] (!%p138_p2)  ;;  %v267_v23 = vld [vmem:[%s1197_s1 + $0x58] sm:$0xff] (!%p138_p2)  ;;  %v685_v31 = vpack.c.bf16 (!%p138_p2), %v262_v20, %v258_v19 }
   0xa   : > { %622 = vmatpush1.bf16.msra.mxu1 (!%p138_p2), %v621_v6  ;;  %v277_v17 = vld [vmem:[%s1197_s1 + $0xa8] sm:$0xff] (!%p138_p2)  ;;  %v271_v24 = vld [vmem:[%s1197_s1 + $0x78] sm:$0xff] (!%p138_p2)  ;;  %v276_v25 = vld [vmem:[%s1197_s1 + $0xa0] sm:$0xff] (!%p138_p2) }
   0xb   : > { %624 = vmatprep.subr.bf16.mxu1 (!%p138_p2), %v623_v9  ;;  %v627_v21 = vpack.c.bf16 (!%p138_p2), %v277_v17, %v273_v16  ;;  %v281_v28 = vld [vmem:[%s1197_s1 + $0xc8] sm:$0xff] (!%p138_p2)  ;;  %v173_v30 = vld [vmem:[%s1196_s0] sm:$0xff] (!%p138_p2)  ;;  %v266_v32 = vld [vmem:[%s1197_s1 + $0x50] sm:$0xff] (!%p138_p2)  ;;  %v629_v34 = vpack.c.bf16 (!%p138_p2), %v276_v25, %v272_v22  ;;  %v687_v35 = vpack.c.bf16 (!%p138_p2), %v271_v24, %v267_v23 }
   0xc   : > { %v285_v29 = vld [vmem:[%s1197_s1 + $0xe8] sm:$0xff] (!%p138_p2)  ;;  %v270_v33 = vld [vmem:[%s1197_s1 + $0x70] sm:$0xff] (!%p138_p2)  ;;  %v275_v36 = vld [vmem:[%s1197_s1 + $0x98] sm:$0xff] (!%p138_p2) }
   0xd   : > { %s1201_s13 = smov (!%p161_p3, %s599_s13), 1  ;;  %v631_v37 = vpack.c.bf16 %v285_v29, %v281_v28  ;;  %v280_v38 = vld [vmem:[%s1197_s1 + $0xc0] sm:$0xff]  ;;  %v279_v40 = vld [vmem:[%s1197_s1 + $0xb8] sm:$0xff]  ;;  %v289_v41 = vld [vmem:[%s1197_s1 + $0x108] sm:$0xff]  ;;  %v689_v43 = vpack.c.bf16 %v270_v33, %v266_v32 }
   0xe   : > { %s615_s26 = sshll.u32 %s1201_s13, 2  ;;  %626 = vmatpush1.bf16.msra.mxu1 %v625_v15  ;;  %v284_v39 = vld [vmem:[%s1197_s1 + $0xe0] sm:$0xff]  ;;  %v293_v42 = vld [vmem:[%s1197_s1 + $0x128] sm:$0xff]  ;;  %v274_v44 = vld [vmem:[%s1197_s1 + $0x90] sm:$0xff]  ;;  %v691_v47 = vpack.c.bf16 %v279_v40, %v275_v36 }
   0xf   : > { %s165_s4 = scalar_lea.vmem %s1198_s2, %s615_s26  ;;  %628 = vmatprep.subr.bf16.mxu1 %v627_v21  ;;  %v278_v45 = vld [vmem:[%s1197_s1 + $0xb0] sm:$0xff]  ;;  %v633_v46 = vpack.c.bf16 %v284_v39, %v280_v38  ;;  %v283_v48 = vld [vmem:[%s1197_s1 + $0xd8] sm:$0xff]  ;;  %v635_v49 = vpack.c.bf16 %v293_v42, %v289_v41  ;;  %v288_v50 = vld [vmem:[%s1197_s1 + $0x100] sm:$0xff]  ;;  %s616_s26 = sshll.u32 %s1201_s13, 4 }
  0x10   : > { %v171_v14 = vld [vmem:[%s165_s4] sm:$0xf]  ;;  %v287_v52 = vld [vmem:[%s1197_s1 + $0xf8] sm:$0xff]  ;;  %v297_v53 = vld [vmem:[%s1197_s1 + $0x148] sm:$0xff]  ;;  %v693_v55 = vpack.c.bf16 %v278_v45, %v274_v44  ;;  %s170_s29 = scalar_lea.vmem %s1199_s3, %s616_s26 }
  0x11   : > { %v172_v18 = vunpack.c.l.bf16 %v171_v14  ;;  %v292_v51 = vld [vmem:[%s1197_s1 + $0x120] sm:$0xff]  ;;  %v301_v54 = vld [vmem:[%s1197_s1 + $0x168] sm:$0xff]  ;;  %v282_v56 = vld [vmem:[%s1197_s1 + $0xd0] sm:$0xff]  ;;  %v695_v59 = vpack.c.bf16 %v287_v52, %v283_v48 }
  0x12   : > { %630 = vmatpush1.bf16.msra.mxu1 %v629_v34  ;;  %v286_v57 = vld [vmem:[%s1197_s1 + $0xf0] sm:$0xff]  ;;  %v637_v58 = vpack.c.bf16 %v292_v51, %v288_v50  ;;  %v291_v60 = vld [vmem:[%s1197_s1 + $0x118] sm:$0xff]  ;;  %v639_v61 = vpack.c.bf16 %v301_v54, %v297_v53  ;;  %v296_v62 = vld [vmem:[%s1197_s1 + $0x140] sm:$0xff] }
  0x13   : > { %v175_v26 = vcombine.high %v172_v18, %v172_v18  ;;  %632 = vmatprep.subr.bf16.mxu1 %v631_v37  ;;  %v300_v63 = vld [vmem:[%s1197_s1 + $0x160] sm:$0xff]  ;;  %v295_v0 = vld [vmem:[%s1197_s1 + $0x138] sm:$0xff]  ;;  %v305_v1 = vld [vmem:[%s1197_s1 + $0x188] sm:$0xff]  ;;  %v697_v3 = vpack.c.bf16 %v286_v57, %v282_v56 }
  0x14   : > { %v309_v2 = vld [vmem:[%s1197_s1 + $0x1a8] sm:$0xff]  ;;  %v290_v4 = vld [vmem:[%s1197_s1 + $0x110] sm:$0xff]  ;;  %v641_v6 = vpack.c.bf16 %v300_v63, %v296_v62  ;;  %v699_v7 = vpack.c.bf16 %v295_v0, %v291_v60  ;;  %v299_v8 = vld [vmem:[%s1197_s1 + $0x158] sm:$0xff] }
  0x15   : > { %608 = vmatprep.subr.msk.mxu0 %vm180_vm0, %v175_v26  ;;  %v294_v5 = vld [vmem:[%s1197_s1 + $0x130] sm:$0xff]  ;;  %v643_v9 = vpack.c.bf16 %v309_v2, %v305_v1  ;;  %v304_v10 = vld [vmem:[%s1197_s1 + $0x180] sm:$0xff]  ;;  %v303_v12 = vld [vmem:[%s1197_s1 + $0x178] sm:$0xff] }
  0x16   : > { %609 = vmatpush1.msk.msra.mxu0 %vm180_vm0, %v172_v18  ;;  %634 = vmatpush1.bf16.msra.mxu1 %v633_v46  ;;  %v308_v11 = vld [vmem:[%s1197_s1 + $0x1a0] sm:$0xff]  ;;  %v313_v13 = vld [vmem:[%s1197_s1 + $0x1c8] sm:$0xff]  ;;  %v701_v15 = vpack.c.bf16 %v294_v5, %v290_v4  ;;  %v298_v16 = vld [vmem:[%s1197_s1 + $0x150] sm:$0xff]  ;;  %v703_v19 = vpack.c.bf16 %v303_v12, %v299_v8 }
  0x17   : > { %610 = vmatmul.mubr.msk.f32.vlgmr.msra.gmra.mrb[0].mxu0 %vm176_vm1, %v173_v30  ;;  %684 = vmatprep.subr.bf16.mxu0 %v683_v27  ;;  %v317_v14 = vld [vmem:[%s1197_s1 + $0x1e8] sm:$0xff]  ;;  %v302_v17 = vld [vmem:[%s1197_s1 + $0x170] sm:$0xff]  ;;  %v645_v18 = vpack.c.bf16 %v308_v11, %v304_v10  ;;  %v307_v20 = vld [vmem:[%s1197_s1 + $0x198] sm:$0xff] }
  0x18   : > { %686 = vmatpush1.bf16.msra.mxu0 %v685_v31  ;;  %636 = vmatprep.subr.bf16.mxu1 %v635_v49  ;;  %v647_v21 = vpack.c.bf16 %v317_v14, %v313_v13  ;;  %v312_v22 = vld [vmem:[%s1197_s1 + $0x1c0] sm:$0xff]  ;;  %v311_v24 = vld [vmem:[%s1197_s1 + $0x1b8] sm:$0xff]  ;;  %v321_v25 = vld [vmem:[%s1197_s1 + $0x208] sm:$0xff]  ;;  %v705_v27 = vpack.c.bf16 %v302_v17, %v298_v16 }
  0x19   : > { %688 = vmatprep.subr.bf16.mxu0 %v687_v35  ;;  %v316_v23 = vld [vmem:[%s1197_s1 + $0x1e0] sm:$0xff]  ;;  %v325_v26 = vld [vmem:[%s1197_s1 + $0x228] sm:$0xff]  ;;  %v306_v28 = vld [vmem:[%s1197_s1 + $0x190] sm:$0xff]  ;;  %v707_v31 = vpack.c.bf16 %v311_v24, %v307_v20 }
  0x1a   : > { %638 = vmatpush1.bf16.msra.mxu1 %v637_v58  ;;  %v310_v29 = vld [vmem:[%s1197_s1 + $0x1b0] sm:$0xff]  ;;  %v649_v30 = vpack.c.bf16 %v316_v23, %v312_v22  ;;  %v315_v32 = vld [vmem:[%s1197_s1 + $0x1d8] sm:$0xff]  ;;  %v651_v33 = vpack.c.bf16 %v325_v26, %v321_v25  ;;  %v320_v34 = vld [vmem:[%s1197_s1 + $0x200] sm:$0xff] }
  0x1b   : > { %640 = vmatprep.subr.bf16.mxu1 %v639_v61  ;;  %v324_v35 = vld [vmem:[%s1197_s1 + $0x220] sm:$0xff]  ;;  %v319_v36 = vld [vmem:[%s1197_s1 + $0x1f8] sm:$0xff]  ;;  %v329_v37 = vld [vmem:[%s1197_s1 + $0x248] sm:$0xff]  ;;  %v709_v39 = vpack.c.bf16 %v310_v29, %v306_v28 }
  0x1c   : > { %690 = vmatpush1.bf16.msra.mxu0 %v689_v43  ;;  %v333_v38 = vld [vmem:[%s1197_s1 + $0x268] sm:$0xff]  ;;  %v314_v40 = vld [vmem:[%s1197_s1 + $0x1d0] sm:$0xff]  ;;  %v653_v42 = vpack.c.bf16 %v324_v35, %v320_v34  ;;  %v711_v43 = vpack.c.bf16 %v319_v36, %v315_v32  ;;  %v323_v44 = vld [vmem:[%s1197_s1 + $0x218] sm:$0xff] }
  0x1d   : > { %692 = vmatprep.subr.bf16.mxu0 %v691_v47  ;;  %v318_v41 = vld [vmem:[%s1197_s1 + $0x1f0] sm:$0xff]  ;;  %v655_v45 = vpack.c.bf16 %v333_v38, %v329_v37  ;;  %v328_v46 = vld [vmem:[%s1197_s1 + $0x240] sm:$0xff]  ;;  %v327_v48 = vld [vmem:[%s1197_s1 + $0x238] sm:$0xff] }
  0x1e   : > { %642 = vmatpush1.bf16.msra.mxu1 %v641_v6  ;;  %v332_v47 = vld [vmem:[%s1197_s1 + $0x260] sm:$0xff]  ;;  %v337_v49 = vld [vmem:[%s1197_s1 + $0x288] sm:$0xff]  ;;  %v713_v51 = vpack.c.bf16 %v318_v41, %v314_v40  ;;  %v322_v52 = vld [vmem:[%s1197_s1 + $0x210] sm:$0xff] }
  0x1f   : > { %644 = vmatprep.subr.bf16.mxu1 %v643_v9  ;;  %v341_v50 = vld [vmem:[%s1197_s1 + $0x2a8] sm:$0xff]  ;;  %v326_v53 = vld [vmem:[%s1197_s1 + $0x230] sm:$0xff]  ;;  %v657_v54 = vpack.c.bf16 %v332_v47, %v328_v46  ;;  %v331_v56 = vld [vmem:[%s1197_s1 + $0x258] sm:$0xff] }
  0x20   : > { %694 = vmatpush1.bf16.msra.mxu0 %v693_v55  ;;  %v715_v55 = vpack.c.bf16 %v327_v48, %v323_v44  ;;  %v659_v57 = vpack.c.bf16 %v341_v50, %v337_v49  ;;  %v336_v58 = vld [vmem:[%s1197_s1 + $0x280] sm:$0xff]  ;;  %v335_v60 = vld [vmem:[%s1197_s1 + $0x278] sm:$0xff]  ;;  %v345_v61 = vld [vmem:[%s1197_s1 + $0x2c8] sm:$0xff]  ;;  %v717_v63 = vpack.c.bf16 %v326_v53, %v322_v52 }
  0x21   : > { %696 = vmatprep.subr.bf16.mxu0 %v695_v59  ;;  %v340_v59 = vld [vmem:[%s1197_s1 + $0x2a0] sm:$0xff]  ;;  %v349_v62 = vld [vmem:[%s1197_s1 + $0x2e8] sm:$0xff]  ;;  %v330_v0 = vld [vmem:[%s1197_s1 + $0x250] sm:$0xff] }
  0x22   : > { %646 = vmatpush1.bf16.msra.mxu1 %v645_v18  ;;  %v334_v1 = vld [vmem:[%s1197_s1 + $0x270] sm:$0xff]  ;;  %v661_v2 = vpack.c.bf16 %v340_v59, %v336_v58  ;;  %v339_v4 = vld [vmem:[%s1197_s1 + $0x298] sm:$0xff]  ;;  %v663_v5 = vpack.c.bf16 %v349_v62, %v345_v61  ;;  %v344_v6 = vld [vmem:[%s1197_s1 + $0x2c0] sm:$0xff] }
  0x23   : > { %648 = vmatprep.subr.bf16.mxu1 %v647_v21  ;;  %v343_v8 = vld [vmem:[%s1197_s1 + $0x2b8] sm:$0xff]  ;;  %v353_v9 = vld [vmem:[%s1197_s1 + $0x308] sm:$0xff]  ;;  %v721_v11 = vpack.c.bf16 %v334_v1, %v330_v0  ;;  %v338_v12 = vld [vmem:[%s1197_s1 + $0x290] sm:$0xff] }
  0x24   : > { %698 = vmatpush1.bf16.msra.mxu0 %v697_v3  ;;  %v719_v3 = vpack.c.bf16 %v335_v60, %v331_v56  ;;  %v357_v10 = vld [vmem:[%s1197_s1 + $0x328] sm:$0xff]  ;;  %v342_v13 = vld [vmem:[%s1197_s1 + $0x2b0] sm:$0xff]  ;;  %v347_v16 = vld [vmem:[%s1197_s1 + $0x2d8] sm:$0xff] }
  0x25   : > { %700 = vmatprep.subr.bf16.mxu0 %v699_v7  ;;  %v348_v7 = vld [vmem:[%s1197_s1 + $0x2e0] sm:$0xff]  ;;  %v667_v17 = vpack.c.bf16 %v357_v10, %v353_v9  ;;  %v351_v20 = vld [vmem:[%s1197_s1 + $0x2f8] sm:$0xff]  ;;  %v361_v21 = vld [vmem:[%s1197_s1 + $0x348] sm:$0xff]  ;;  %v725_v23 = vpack.c.bf16 %v342_v13, %v338_v12 }
  0x26   : > { %650 = vmatpush1.bf16.msra.mxu1 %v649_v30  ;;  %v665_v14 = vpack.c.bf16 %v348_v7, %v344_v6  ;;  %v352_v18 = vld [vmem:[%s1197_s1 + $0x300] sm:$0xff]  ;;  %v365_v22 = vld [vmem:[%s1197_s1 + $0x368] sm:$0xff]  ;;  %v346_v24 = vld [vmem:[%s1197_s1 + $0x2d0] sm:$0xff] }
  0x27   : > { %652 = vmatprep.subr.bf16.mxu1 %v651_v33  ;;  %v350_v25 = vld [vmem:[%s1197_s1 + $0x2f0] sm:$0xff]  ;;  %v355_v28 = vld [vmem:[%s1197_s1 + $0x318] sm:$0xff]  ;;  %v671_v29 = vpack.c.bf16 %v365_v22, %v361_v21  ;;  %v360_v30 = vld [vmem:[%s1197_s1 + $0x340] sm:$0xff] }
  0x28   : > { %702 = vmatpush1.bf16.msra.mxu0 %v701_v15  ;;  %v723_v15 = vpack.c.bf16 %v343_v8, %v339_v4  ;;  %v359_v32 = vld [vmem:[%s1197_s1 + $0x338] sm:$0xff]  ;;  %v369_v33 = vld [vmem:[%s1197_s1 + $0x388] sm:$0xff]  ;;  %v729_v35 = vpack.c.bf16 %v350_v25, %v346_v24  ;;  %v354_v36 = vld [vmem:[%s1197_s1 + $0x310] sm:$0xff] }
  0x29   : > { %704 = vmatprep.subr.bf16.mxu0 %v703_v19  ;;  %v356_v19 = vld [vmem:[%s1197_s1 + $0x320] sm:$0xff]  ;;  %v373_v34 = vld [vmem:[%s1197_s1 + $0x3a8] sm:$0xff]  ;;  %v358_v37 = vld [vmem:[%s1197_s1 + $0x330] sm:$0xff] }
  0x2a   : > { %654 = vmatpush1.bf16.msra.mxu1 %v653_v42  ;;  %v669_v26 = vpack.c.bf16 %v356_v19, %v352_v18  ;;  %v363_v40 = vld [vmem:[%s1197_s1 + $0x358] sm:$0xff]  ;;  %v675_v41 = vpack.c.bf16 %v373_v34, %v369_v33  ;;  %v368_v42 = vld [vmem:[%s1197_s1 + $0x380] sm:$0xff]  ;;  %v381_v46 = vld [vmem:[%s1197_s1 + $0x3e8] sm:$0xff]  ;;  %v733_v47 = vpack.c.bf16 %v358_v37, %v354_v36 }
  0x2b   : > { %656 = vmatprep.subr.bf16.mxu1 %v655_v45  ;;  %v367_v44 = vld [vmem:[%s1197_s1 + $0x378] sm:$0xff]  ;;  %v377_v45 = vld [vmem:[%s1197_s1 + $0x3c8] sm:$0xff]  ;;  %v362_v50 = vld [vmem:[%s1197_s1 + $0x350] sm:$0xff] }
  0x2c   : > { %706 = vmatpush1.bf16.msra.mxu0 %v705_v27  ;;  %v727_v27 = vpack.c.bf16 %v351_v20, %v347_v16  ;;  %v735_v49 = vpack.c.bf16 %v367_v44, %v363_v40  ;;  %v679_v52 = vpack.c.bf16 %v381_v46, %v377_v45  ;;  %v371_v53 = vld [vmem:[%s1197_s1 + $0x398] sm:$0xff]  ;;  %v374_v58 = vld [vmem:[%s1197_s1 + $0x3b0] sm:$0xff]  ;;  %v380_v0 = vld [vmem:[%s1197_s1 + $0x3e0] sm:$0xff] }
  0x2d   : > { %708 = vmatprep.subr.bf16.mxu0 %v707_v31  ;;  %v364_v31 = vld [vmem:[%s1197_s1 + $0x360] sm:$0xff]  ;;  %v379_v59 = vld [vmem:[%s1197_s1 + $0x3d8] sm:$0xff]  ;;  %v378_v1 = vld [vmem:[%s1197_s1 + $0x3d0] sm:$0xff] }
  0x2e   : > { %658 = vmatpush1.bf16.msra.mxu1 %v657_v54  ;;  %v673_v38 = vpack.c.bf16 %v364_v31, %v360_v30  ;;  %v375_v54 = vld [vmem:[%s1197_s1 + $0x3b8] sm:$0xff] }
  0x2f   : > { %660 = vmatprep.subr.bf16.mxu1 %v659_v57  ;;  %v739_v56 = vpack.c.bf16 %v375_v54, %v371_v53  ;;  %v370_v57 = vld [vmem:[%s1197_s1 + $0x390] sm:$0xff]  ;;  %v383_v60 = vld [vmem:[%s1197_s1 + $0x3f8] sm:$0xff] }
  0x30   : > { %710 = vmatpush1.bf16.msra.mxu0 %v709_v39  ;;  %v731_v39 = vpack.c.bf16 %v359_v32, %v355_v28  ;;  %v741_v61 = vpack.c.bf16 %v374_v58, %v370_v57  ;;  %v743_v62 = vpack.c.bf16 %v383_v60, %v379_v59 }
  0x31   : > { %712 = vmatprep.subr.bf16.mxu0 %v711_v43  ;;  %v372_v43 = vld [vmem:[%s1197_s1 + $0x3a0] sm:$0xff] }
  0x32   : > { %662 = vmatpush1.bf16.msra.mxu1 %v661_v2  ;;  %v677_v48 = vpack.c.bf16 %v372_v43, %v368_v42 }
  0x33   : > { %664 = vmatprep.subr.bf16.mxu1 %v663_v5 }
  0x34   : > { %714 = vmatpush1.bf16.msra.mxu0 %v713_v51  ;;  %v366_v51 = vld [vmem:[%s1197_s1 + $0x370] sm:$0xff] }
  0x35   : > { %716 = vmatprep.subr.bf16.mxu0 %v715_v55  ;;  %v737_v55 = vpack.c.bf16 %v366_v51, %v362_v50 }
  0x36   : > { %666 = vmatpush1.bf16.msra.mxu1 %v665_v14 }
  0x37   : > { %668 = vmatprep.subr.bf16.mxu1 %v667_v17 }
  0x38   : > { %718 = vmatpush1.bf16.msra.mxu0 %v717_v63  ;;  %v376_v63 = vld [vmem:[%s1197_s1 + $0x3c0] sm:$0xff] }
  0x39   : > { %720 = vmatprep.subr.bf16.mxu0 %v719_v3  ;;  %v681_v2 = vpack.c.bf16 %v380_v0, %v376_v63  ;;  %v382_v3 = vld [vmem:[%s1197_s1 + $0x3f0] sm:$0xff] }
  0x3a   : > { %670 = vmatpush1.bf16.msra.mxu1 %v669_v26  ;;  %v745_v4 = vpack.c.bf16 %v382_v3, %v378_v1 }
  0x3b   : > { %672 = vmatprep.subr.bf16.mxu1 %v671_v29 }
  0x3c   : > { %722 = vmatpush1.bf16.msra.mxu0 %v721_v11 }
  0x3d   : > { %724 = vmatprep.subr.bf16.mxu0 %v723_v15 }
  0x3e   : > { %674 = vmatpush1.bf16.msra.mxu1 %v673_v38 }
  0x3f   : > { %676 = vmatprep.subr.bf16.mxu1 %v675_v41 }
  0x40   : > { %726 = vmatpush1.bf16.msra.mxu0 %v725_v23 }
  0x41   : > { %728 = vmatprep.subr.bf16.mxu0 %v727_v27 }
  0x42   : > { %678 = vmatpush1.bf16.msra.mxu1 %v677_v48 }
  0x43   : > { %680 = vmatprep.subr.bf16.mxu1 %v679_v52 }
  0x44   : > { %730 = vmatpush1.bf16.msra.mxu0 %v729_v35 }
  0x45   : > { %732 = vmatprep.subr.bf16.mxu0 %v731_v39 }
  0x46   : > { %682 = vmatpush1.bf16.msra.mxu1 %v681_v2 }
  0x48   : > { %734 = vmatpush1.bf16.msra.mxu0 %v733_v47 }
  0x49   : > { %736 = vmatprep.subr.bf16.mxu0 %v735_v49 }
  0x4c   : > { %738 = vmatpush1.bf16.msra.mxu0 %v737_v55 }
  0x4d   : > { %740 = vmatprep.subr.bf16.mxu0 %v739_v56 }
  0x50   : > { %742 = vmatpush1.bf16.msra.mxu0 %v741_v61 }
  0x51   : > { %744 = vmatprep.subr.bf16.mxu0 %v743_v62 }
  0x54   : > { %746 = vmatpush1.bf16.msra.mxu0 %v745_v4 }
  0xea   : > { %v251_v5 = vpop.f32.mrb[0].mxu0 }
  0xeb   : > { %v253_v6 = vpop.f32.mrb[1].mxu0 }
  0xec   : > { %448 = vmatprep.mubr.f32.mxu1 %v253_v6  ;;  %519 = vmatprep.mubr.f32.mxu0 %v253_v6 }
  0xed   : > { %449 = vmatmul.mubr.f32.vlgmr.msra.gmra.mrb[0].mxu1 %v251_v5  ;;  %520 = vmatmul.mubr.f32.vlgmr.msra.gmra.mrb[2].mxu0 %v251_v5 }
 0x1c0   : > { %v450_v7 = vpop.f32.mrb[0].mxu1  ;;  %v521_v8 = vpop.f32.mrb[2].mxu0 }
 0x1c1   : > { %v452_v9 = vpop.f32.mrb[1].mxu1  ;;  %v523_v10 = vpop.f32.mrb[3].mxu0 }
 0x1c2   : > { %v617_v11 = vpack.c.bf16 %v452_v9, %v450_v7  ;;  %v618_v12 = vpack.c.bf16 %v523_v10, %v521_v8 }
 0x1c4   : > { %542 = vst [vmem:[%s170_s29] sm:$0xff] %v617_v11  ;;  %543 = vst [vmem:[%s170_s29 + $0x8] sm:$0xff] %v618_v12 }
 0x1c5 PF: > { %s13_s12 = sadd.s32 1, %s762_s12  }
 0x1c6   : > { %p10_p4 = scmp.ge.s32.totalorder %s13_s12, 4  }
 0x1c8   :  { %12 = sbr.rel (!%p10_p4) target bundleno = 1 (0x1), region = 62 }

// kernel: tg_forward.14
= control target key start
LH: loop header
LB: loop body
LE: loop exit
PB: predicated region body
PF: predicated region fallthrough
CT: control target
= control target key end

     0   :  { %vm86_vm0 = vcmask 523264   ;;  %s479_s1 = inlined_call_operand.vmem [shape: f32[64,3], index: 1, kind: input, shape index: {}]   ;;  %s480_s0 = inlined_call_operand.vmem [shape: bf16[128,64], index: 0, kind: input, shape index: {}]   ;;  %s481_s2 = inlined_call_operand.vmem [shape: f32[1,3], index: 2, kind: input, shape index: {}]   ;;  %s482_s3 = inlined_call_operand.vmem [shape: f32[1,3], index: 3, kind: input, shape index: {}]   ;;  %s483_s4 = inlined_call_operand.vmem [shape: f32[128,3], index: 4, kind: output, shape index: {}]  }
   0x1   :  { %v34_v0 = vld [vmem:[%s479_s1] sm:$0xff]  ;;  %v35_v1 = vld [vmem:[%s479_s1 + $0x8] sm:$0xff]  ;;  %v36_v2 = vld [vmem:[%s479_s1 + $0x10] sm:$0xff] }
   0x2   :  { %v42_v3 = vpack.c.bf16 %v35_v1, %v34_v0  ;;  %v37_v4 = vld [vmem:[%s479_s1 + $0x18] sm:$0xff]  ;;  %v38_v6 = vld [vmem:[%s479_s1 + $0x20] sm:$0xff]  ;;  %v39_v7 = vld [vmem:[%s479_s1 + $0x28] sm:$0xff] }
   0x3   :  { %v43_v5 = vpack.c.bf16 %v37_v4, %v36_v2  ;;  %v336_v8 = vld [vmem:[%s480_s0] sm:$0xff]   ;;  %v44_v10 = vpack.c.bf16 %v39_v7, %v38_v6  ;;  %v40_v11 = vld [vmem:[%s479_s1 + $0x30] sm:$0xff]  ;;  %v41_v12 = vld [vmem:[%s479_s1 + $0x38] sm:$0xff] }
   0x4   :  { %304 = vmatprep.subr.bf16.mxu0 %v42_v3  ;;  %328 = vmatprep.subr.bf16.mxu1 %v42_v3  ;;  %v337_v9 = vld [vmem:[%s480_s0 + $0x20] sm:$0xff]   ;;  %v45_v13 = vpack.c.bf16 %v41_v12, %v40_v11  ;;  %v338_v14 = vld [vmem:[%s480_s0 + $0x8] sm:$0xff]   ;;  %v340_v16 = vld [vmem:[%s480_s0 + $0x10] sm:$0xff]  }
   0x5   :  { %305 = vmatpush3.bf16.msra.mxu0 %v42_v3  ;;  %332 = vmatpush3.bf16.msra.mxu1 %v42_v3  ;;  %v339_v15 = vld [vmem:[%s480_s0 + $0x28] sm:$0xff]   ;;  %v341_v17 = vld [vmem:[%s480_s0 + $0x30] sm:$0xff]   ;;  %v342_v18 = vld [vmem:[%s480_s0 + $0x18] sm:$0xff]  }
   0x6   :  { %306 = vmatprep.subr.bf16.mxu0 %v43_v5  ;;  %329 = vmatprep.subr.bf16.mxu1 %v43_v5  ;;  %v343_v19 = vld [vmem:[%s480_s0 + $0x38] sm:$0xff]   ;;  %v290_v20 = vld [vmem:[%s481_s2] ss:$0 sm:$0xff] }
   0x7   :  { %312 = vmatprep.mubr.msk.bf16.mxu0 %vm86_vm0, %v336_v8  ;;  %320 = vmatprep.mubr.msk.bf16.mxu1 %vm86_vm0, %v337_v9  ;;  %v291_v22 = vld [vmem:[%s482_s3] ss:$0 sm:$0xff] }
   0x9   :  { %307 = vmatpush3.bf16.msra.mxu0 %v43_v5  ;;  %333 = vmatpush3.bf16.msra.mxu1 %v43_v5 }
   0xa   :  { %308 = vmatprep.subr.bf16.mxu0 %v44_v10  ;;  %330 = vmatprep.subr.bf16.mxu1 %v44_v10 }
   0xd   :  { %309 = vmatpush3.bf16.msra.mxu0 %v44_v10  ;;  %334 = vmatpush3.bf16.msra.mxu1 %v44_v10 }
   0xe   :  { %310 = vmatprep.subr.bf16.mxu0 %v45_v13  ;;  %331 = vmatprep.subr.bf16.mxu1 %v45_v13 }
  0x11   :  { %311 = vmatpush3.bf16.msra.mxu0 %v45_v13  ;;  %335 = vmatpush3.bf16.msra.mxu1 %v45_v13 }
  0x14   :  { %313 = vmatmul.mubr.msk.bf16.vlgmr.msra.gmra.mrb[0].mxu0 %vm86_vm0, %v338_v14  ;;  %321 = vmatmul.mubr.msk.bf16.vlgmr.msra.gmra.mrb[0].mxu1 %vm86_vm0, %v339_v15 }
  0x15   :  { %316 = vmatprep.mubr.msk.bf16.mxu0 %vm86_vm0, %v340_v16  ;;  %324 = vmatprep.mubr.msk.bf16.mxu1 %vm86_vm0, %v341_v17 }
  0x1c   :  { %317 = vmatmul.mubr.msk.bf16.gmra.mrb[4].mxu0 %vm86_vm0, %v342_v18  ;;  %325 = vmatmul.mubr.msk.bf16.gmra.mrb[4].mxu1 %vm86_vm0, %v343_v19 }
  0xe7   :  { %v314_v21 = vpop.f32.mrb[0].mxu0  ;;  %v322_v23 = vpop.f32.mrb[0].mxu1 }
  0xe8   :  { %v217_v24 = vmul.f32 %v314_v21, %v290_v20  ;;  %v225_v25 = vmul.f32 %v322_v23, %v290_v20  ;;  %v145_v26 = vpop.f32.mrb[1].mxu0  ;;  %v177_v27 = vpop.f32.mrb[1].mxu1 }
  0xe9   :  { %v215_v28 = vmul.f32 %v290_v20, %v145_v26  ;;  %v223_v29 = vmul.f32 %v290_v20, %v177_v27  ;;  %v315_v30 = vpop.f32.mrb[2].mxu0  ;;  %v323_v31 = vpop.f32.mrb[2].mxu1 }
  0xea   :  { %v240_v32 = vadd.f32 %v291_v22, %v217_v24  ;;  %v248_v33 = vadd.f32 %v291_v22, %v225_v25  ;;  %v218_v34 = vmul.f32 %v315_v30, %v290_v20  ;;  %v226_v35 = vmul.f32 %v323_v31, %v290_v20  ;;  %v148_v36 = vpop.f32.mrb[3].mxu0  ;;  %v180_v37 = vpop.f32.mrb[3].mxu1 }
  0xeb   :  { %v238_v38 = vadd.f32 %v291_v22, %v215_v28  ;;  %v246_v39 = vadd.f32 %v291_v22, %v223_v29  ;;  %v216_v40 = vmul.f32 %v290_v20, %v148_v36  ;;  %v224_v41 = vmul.f32 %v290_v20, %v180_v37 }
  0xec   :  { %256 = vst [vmem:[%s483_s4 + $0x10] sm:$0xff] %v240_v32  ;;  %264 = vst [vmem:[%s483_s4 + $0x50] sm:$0xff] %v248_v33  ;;  %v241_v42 = vadd.f32 %v291_v22, %v218_v34  ;;  %v249_v43 = vadd.f32 %v291_v22, %v226_v35 }
  0xed   :  { %254 = vst [vmem:[%s483_s4] sm:$0xff] %v238_v38  ;;  %262 = vst [vmem:[%s483_s4 + $0x40] sm:$0xff] %v246_v39  ;;  %v239_v44 = vadd.f32 %v291_v22, %v216_v40  ;;  %v247_v45 = vadd.f32 %v291_v22, %v224_v41 }
  0xee   :  { %257 = vst [vmem:[%s483_s4 + $0x18] sm:$0xff] %v241_v42  ;;  %265 = vst [vmem:[%s483_s4 + $0x58] sm:$0xff] %v249_v43 }
  0xef   :  { %255 = vst [vmem:[%s483_s4 + $0x8] sm:$0xff] %v239_v44  ;;  %263 = vst [vmem:[%s483_s4 + $0x48] sm:$0xff] %v247_v45  ;;  %v318_v46 = vpop.f32.mrb[4].mxu0  ;;  %v326_v47 = vpop.f32.mrb[4].mxu1 }
  0xf0   :  { %v221_v48 = vmul.f32 %v318_v46, %v290_v20  ;;  %v229_v49 = vmul.f32 %v326_v47, %v290_v20  ;;  %v161_v50 = vpop.f32.mrb[5].mxu0  ;;  %v193_v51 = vpop.f32.mrb[5].mxu1 }
  0xf1   :  { %v219_v52 = vmul.f32 %v290_v20, %v161_v50  ;;  %v227_v53 = vmul.f32 %v290_v20, %v193_v51  ;;  %v319_v54 = vpop.f32.mrb[6].mxu0  ;;  %v327_v55 = vpop.f32.mrb[6].mxu1 }
  0xf2   :  { %v244_v56 = vadd.f32 %v291_v22, %v221_v48  ;;  %v252_v57 = vadd.f32 %v291_v22, %v229_v49  ;;  %v222_v58 = vmul.f32 %v319_v54, %v290_v20  ;;  %v230_v59 = vmul.f32 %v327_v55, %v290_v20  ;;  %v164_v60 = vpop.f32.mrb[7].mxu0  ;;  %v196_v61 = vpop.f32.mrb[7].mxu1 }
  0xf3   :  { %v242_v62 = vadd.f32 %v291_v22, %v219_v52  ;;  %v250_v63 = vadd.f32 %v291_v22, %v227_v53  ;;  %v220_v0 = vmul.f32 %v290_v20, %v164_v60  ;;  %v228_v1 = vmul.f32 %v290_v20, %v196_v61 }
  0xf4   :  { %260 = vst [vmem:[%s483_s4 + $0x30] sm:$0xff] %v244_v56  ;;  %268 = vst [vmem:[%s483_s4 + $0x70] sm:$0xff] %v252_v57  ;;  %v245_v2 = vadd.f32 %v291_v22, %v222_v58  ;;  %v253_v3 = vadd.f32 %v291_v22, %v230_v59 }
  0xf5   :  { %258 = vst [vmem:[%s483_s4 + $0x20] sm:$0xff] %v242_v62  ;;  %266 = vst [vmem:[%s483_s4 + $0x60] sm:$0xff] %v250_v63  ;;  %v243_v4 = vadd.f32 %v291_v22, %v220_v0  ;;  %v251_v5 = vadd.f32 %v291_v22, %v228_v1 }
  0xf6   :  { %261 = vst [vmem:[%s483_s4 + $0x38] sm:$0xff] %v245_v2  ;;  %269 = vst [vmem:[%s483_s4 + $0x78] sm:$0xff] %v253_v3 }
  0xf7   :  { %259 = vst [vmem:[%s483_s4 + $0x28] sm:$0xff] %v243_v4  ;;  %267 = vst [vmem:[%s483_s4 + $0x68] sm:$0xff] %v251_v5 }

// kernel: tg_forward.13
= control target key start
LH: loop header
LB: loop body
LE: loop exit
PB: predicated region body
PF: predicated region fallthrough
CT: control target
= control target key end

     0   :  { %s2548_s15 = smov 0   ;;  %s3472_s0 = inlined_call_operand.vmem [shape: bf16[2,110,128], index: 0, kind: input, shape index: {}]   ;;  %s3473_s1 = inlined_call_operand.vmem [shape: f32[9,128,64], index: 1, kind: input, shape index: {}]   ;;  %s3474_s2 = inlined_call_operand.vmem [shape: f32[1,64], index: 2, kind: input, shape index: {}]   ;;  %s3475_s3 = inlined_call_operand.vmem [shape: f32[1,64], index: 3, kind: input, shape index: {}]   ;;  %s3476_s4 = inlined_call_operand.vmem [shape: bf16[2,80,64], index: 4, kind: output, shape index: {}]  }
   0x1 LB: > { %s1693_s16 = sadd.s32 4294967295, %s2519_s15   ;;  %p1697_p0 = scmp.ge.s32.totalorder %s2519_s15, 1  ;;  %s2519_s15 = sphi %s2548_s15, %s14_s15  }
   0x2   : > { %p162_p1 = scmp.lt.s32.totalorder %s2519_s15, 3 }
   0x4   : > { %p163_p2 = pnand %p1697_p0, %p162_p1 }
   0x5   : > { %v1700_v0 = vld [vmem:[%s3473_s1 + $0x80] sm:$0xff] (!%p163_p2)  ;;  %v1701_v1 = vld [vmem:[%s3473_s1 + $0x88] sm:$0xff] (!%p163_p2)  ;;  %p2565_p3 = scmp.lt.s32.totalorder (!%p163_p2), %s1693_s16, 1  ;;  %v2521_v3 = vmov (!%p163_p2), 0.0   ;;  %v1702_v6 = vld [vmem:[%s3473_s1 + $0x90] sm:$0xff] (!%p163_p2)  ;;  %vm2522_vm0 = vmmov (!%p163_p2), 0  }
   0x6   : > { %166 = sbr.rel (%p163_p2) target bundleno = 441 (0x1b9), region = 36  ;;  %v1761_v2 = vld [vmem:[%s3473_s1 + $0x200] sm:$0xff] (!%p163_p2)  ;;  %1992 = vmatprep.subr.bf16.mxu1 (!%p163_p2), %v2521_v3  ;;  %2136 = vmatprep.subr.bf16.mxu0 (!%p163_p2), %v2521_v3  ;;  %v251_v4 = vpack.c.bf16 (!%p163_p2), %v1701_v1, %v1700_v0  ;;  %v1762_v5 = vld [vmem:[%s3473_s1 + $0x208] sm:$0xff] (!%p163_p2)  ;;  %v1703_v7 = vld [vmem:[%s3473_s1 + $0x98] sm:$0xff] (!%p163_p2)  ;;  %vm287_vm1 = vsmask.f32 (!%p163_p2), 7424 }
   0x7   : > { %v798_v8 = vpack.c.bf16 (!%p163_p2), %v1762_v5, %v1761_v2  ;;  %v1763_v9 = vld [vmem:[%s3473_s1 + $0x210] sm:$0xff] (!%p163_p2)  ;;  %v1764_v10 = vld [vmem:[%s3473_s1 + $0x218] sm:$0xff] (!%p163_p2)  ;;  %2008 = vmatprep.mubr.msk.bf16.mxu1 (!%p163_p2), %vm2522_vm0, %v2521_v3  ;;  %2152 = vmatprep.mubr.msk.bf16.mxu0 (!%p163_p2), %vm2522_vm0, %v2521_v3  ;;  %v252_v11 = vpack.c.bf16 (!%p163_p2), %v1703_v7, %v1702_v6  ;;  %v1704_v13 = vld [vmem:[%s3473_s1 + $0xa0] sm:$0xff] (!%p163_p2)  ;;  %vm809_vm2 = vsmask.f32 (!%p163_p2), 6400  ;;  %vm517_vm3 = vcmask (!%p163_p2), 1046528  }
   0x8   : > { %1993 = vmatpush3.bf16.msra.mxu1 (!%p163_p2), %v251_v4  ;;  %v799_v12 = vpack.c.bf16 (!%p163_p2), %v1764_v10, %v1763_v9  ;;  %v1705_v14 = vld [vmem:[%s3473_s1 + $0xa8] sm:$0xff] (!%p163_p2)  ;;  %v1765_v15 = vld [vmem:[%s3473_s1 + $0x220] sm:$0xff] (!%p163_p2)  ;;  %v1706_v19 = vld [vmem:[%s3473_s1 + $0xb0] sm:$0xff] (!%p163_p2)  ;;  %vm980_vm4 = vcmask (!%p163_p2), 1045504   ;;  %vm1443_vm5 = vcmask (!%p163_p2), 1044480   ;;  %vm1627_vm7 = vcmask (!%p163_p2), 519168  }
   0x9   : > { %2137 = vmatpush3.bf16.msra.mxu0 (!%p163_p2), %v798_v8  ;;  %1994 = vmatprep.subr.bf16.mxu1 (!%p163_p2), %v2521_v3  ;;  %v1766_v16 = vld [vmem:[%s3473_s1 + $0x228] sm:$0xff] (!%p163_p2)  ;;  %v253_v17 = vpack.c.bf16 (!%p163_p2), %v1705_v14, %v1704_v13  ;;  %v1707_v20 = vld [vmem:[%s3473_s1 + $0xb8] sm:$0xff] (!%p163_p2)  ;;  %v1767_v21 = vld [vmem:[%s3473_s1 + $0x230] sm:$0xff] (!%p163_p2)  ;;  %vm1272_vm6 = vsmask.f32 (!%p163_p2), 5376 }
   0xa   : > { %2138 = vmatprep.subr.bf16.mxu0 (!%p163_p2), %v2521_v3  ;;  %v800_v18 = vpack.c.bf16 (!%p163_p2), %v1766_v16, %v1765_v15  ;;  %v1768_v22 = vld [vmem:[%s3473_s1 + $0x238] sm:$0xff] (!%p163_p2)  ;;  %v1708_v23 = vld [vmem:[%s3473_s1 + $0xc0] sm:$0xff] (!%p163_p2)  ;;  %v1709_v24 = vld [vmem:[%s3473_s1 + $0xc8] sm:$0xff] (!%p163_p2)  ;;  %v254_v25 = vpack.c.bf16 (!%p163_p2), %v1707_v20, %v1706_v19 }
   0xb   : > { %v1769_v26 = vld [vmem:[%s3473_s1 + $0x240] sm:$0xff] (!%p163_p2)  ;;  %v1770_v27 = vld [vmem:[%s3473_s1 + $0x248] sm:$0xff] (!%p163_p2)  ;;  %v801_v28 = vpack.c.bf16 (!%p163_p2), %v1768_v22, %v1767_v21  ;;  %v1710_v33 = vld [vmem:[%s3473_s1 + $0xd0] sm:$0xff] (!%p163_p2)  ;;  %v255_v34 = vpack.c.bf16 (!%p163_p2), %v1709_v24, %v1708_v23 }
   0xc   : > { %1995 = vmatpush3.bf16.msra.mxu1 (!%p163_p2), %v252_v11  ;;  %v1711_v35 = vld [vmem:[%s3473_s1 + $0xd8] sm:$0xff] (!%p163_p2)  ;;  %v1771_v36 = vld [vmem:[%s3473_s1 + $0x250] sm:$0xff] (!%p163_p2)  ;;  %v802_v39 = vpack.c.bf16 (!%p163_p2), %v1770_v27, %v1769_v26  ;;  %v1712_v42 = vld [vmem:[%s3473_s1 + $0xe0] sm:$0xff] (!%p163_p2) }
   0xd   : > { %s3479_s16 = smov (!%p2565_p3, %s1693_s16), 1  ;;  %2139 = vmatpush3.bf16.msra.mxu0 %v799_v12  ;;  %1996 = vmatprep.subr.bf16.mxu1 %v2521_v3  ;;  %v1772_v37 = vld [vmem:[%s3473_s1 + $0x258] sm:$0xff]  ;;  %v1713_v43 = vld [vmem:[%s3473_s1 + $0xe8] sm:$0xff]  ;;  %v256_v44 = vpack.c.bf16 %v1711_v35, %v1710_v33  ;;  %v1773_v46 = vld [vmem:[%s3473_s1 + $0x260] sm:$0xff] }
   0xe   : > { %s2478_s18 = smul.u32 56, %s3479_s16  ;;  %2140 = vmatprep.subr.bf16.mxu0 %v2521_v3  ;;  %v803_v45 = vpack.c.bf16 %v1772_v37, %v1771_v36  ;;  %v1774_v47 = vld [vmem:[%s3473_s1 + $0x268] sm:$0xff]  ;;  %v257_v54 = vpack.c.bf16 %v1713_v43, %v1712_v42  ;;  %v1714_v56 = vld [vmem:[%s3473_s1 + $0xf0] sm:$0xff]  ;;  %v1715_v57 = vld [vmem:[%s3473_s1 + $0xf8] sm:$0xff] }
   0xf   : > { %v804_v55 = vpack.c.bf16 %v1774_v47, %v1773_v46  ;;  %v1775_v58 = vld [vmem:[%s3473_s1 + $0x270] sm:$0xff]  ;;  %v1776_v62 = vld [vmem:[%s3473_s1 + $0x278] sm:$0xff]  ;;  %v258_v5 = vpack.c.bf16 %v1715_v57, %v1714_v56  ;;  %v1778_v14 = vld [vmem:[%s3473_s1 + $0x280] sm:$0xff]  ;;  %s2479_s10 = smul.u32 40, %s3479_s16 }
  0x10   : > { %s2626_s29 = scalar_lea.vmem %s3472_s0, %s2478_s18  ;;  %1997 = vmatpush3.bf16.msra.mxu1 %v253_v17  ;;  %v805_v6 = vpack.c.bf16 %v1776_v62, %v1775_v58  ;;  %v1779_v15 = vld [vmem:[%s3473_s1 + $0x288] sm:$0xff]  ;;  %v209_v16 = vld [vmem:[%s3473_s1] sm:$0xff]  ;;  %v1780_v26 = vld [vmem:[%s3473_s1 + $0x290] sm:$0xff] }
  0x11   : > { %2141 = vmatpush3.bf16.msra.mxu0 %v800_v18  ;;  %1998 = vmatprep.subr.bf16.mxu1 %v2521_v3  ;;  %v199_v29 = vld [vmem:[%s2626_s29] sm:$0xf]  ;;  %v2643_v30 = vld [vmem:[%s2626_s29 + $0x4] sm:$0xf]  ;;  %v2648_v32 = vld [vmem:[%s2626_s29 + $0x8] sm:$0xf]  ;;  %v969_v22 = vpack.c.bf16 %v1779_v15, %v1778_v14  ;;  %s3430_s13 = scalar_lea.vmem %s3476_s4, %s2479_s10 }
  0x12   : > { %v617_v31 = vld [vmem:[%s2626_s29 + $0x4] sm:$0xe]  ;;  %2142 = vmatprep.subr.bf16.mxu0 %v2521_v3  ;;  %v2663_v38 = vcombine.low %v199_v29, %v2643_v30  ;;  %v2670_v41 = vld [vmem:[%s2626_s29 + $0xc] sm:$0xff]   ;;  %v2711_v4 = vld [vmem:[%s2626_s29 + $0x14] sm:$0xff]  }
  0x13   : > { %v2667_v40 = vcombine.low %v617_v31, %v2648_v32  ;;  %v2686_v48 = vld [vmem:[%s2626_s29 + $0x8] sm:$0xff]   ;;  %v819_v52 = vshrl.u32 %v2670_v41, 16  ;;  %v822_v53 = vshll.u32 %v2670_v41, 16  ;;  %v2715_v9 = vld [vmem:[%s2626_s29 + $0x10] sm:$0xff]   ;;  %v828_v12 = vshrl.u32 %v2711_v4, 16  ;;  %v1781_v27 = vld [vmem:[%s3473_s1 + $0x298] sm:$0xff] }
  0x14   : > { %1999 = vmatpush3.bf16.msra.mxu1 %v254_v25  ;;  %v291_v49 = vshll.u32 %v2663_v38, 16  ;;  %v289_v59 = vshrl.u32 %v2663_v38, 16  ;;  %v296_v61 = vshll.u32 %v2686_v48, 16  ;;  %v831_v13 = vshll.u32 %v2711_v4, 16  ;;  %v210_v17 = vld [vmem:[%s3473_s1 + $0x8] sm:$0xff]  ;;  %v2739_v25 = vld [vmem:[%s2626_s29 + $0x1c] sm:$0xff]  }
  0x15   : > { %2143 = vmatpush3.bf16.msra.mxu0 %v801_v28  ;;  %2000 = vmatprep.subr.bf16.mxu1 %v2521_v3  ;;  %v811_v50 = vshrl.u32 %v2667_v40, 16  ;;  %v814_v51 = vshll.u32 %v2667_v40, 16  ;;  %v821_v1 = vrot.slane %v819_v52, 1  ;;  %v824_v2 = vrot.slane %v822_v53, 2  ;;  %v211_v29 = vld [vmem:[%s3473_s1 + $0x10] sm:$0xff]  ;;  %v212_v31 = vld [vmem:[%s3473_s1 + $0x18] sm:$0xff] }
  0x16   : > { %2144 = vmatprep.subr.bf16.mxu0 %v2521_v3  ;;  %v293_v60 = vrot.slane %v291_v49, 1  ;;  %v298_v8 = vrot.slane %v296_v61, 1  ;;  %v300_v19 = vshrl.u32 %v2686_v48, 16  ;;  %v304_v20 = vshll.u32 %v2715_v9, 16  ;;  %v2757_v35 = vld [vmem:[%s2626_s29 + $0x18] sm:$0xff]   ;;  %v1782_v43 = vld [vmem:[%s3473_s1 + $0x2a0] sm:$0xff] }
  0x17   : > { %v813_v63 = vrot.slane %v811_v50, 1  ;;  %v816_v0 = vrot.slane %v814_v51, 2  ;;  %v825_v11 = vor.u32 %v824_v2, %v821_v1  ;;  %v830_v23 = vrot.slane %v828_v12, 1  ;;  %v213_v46 = vld [vmem:[%s3473_s1 + $0x20] sm:$0xff]  ;;  %v214_v47 = vld [vmem:[%s3473_s1 + $0x28] sm:$0xff]  ;;  %v1784_v57 = vld [vmem:[%s3473_s1 + $0x2b0] sm:$0xff] }
  0x18   : > { %2001 = vmatpush3.bf16.msra.mxu1 %v255_v34  ;;  %v294_v7 = vor.u32 %v293_v60, %v289_v59  ;;  %v833_v24 = vrot.slane %v831_v13, 2  ;;  %v225_v28 = vpack.c.bf16 %v210_v17, %v209_v16  ;;  %v302_v33 = vor.u32 %v300_v19, %v298_v8  ;;  %v2782_v56 = vld [vmem:[%s2626_s29 + $0x24] sm:$0xff]   ;;  %v1785_v58 = vld [vmem:[%s3473_s1 + $0x2b8] sm:$0xff]  ;;  %v215_v60 = vld [vmem:[%s3473_s1 + $0x30] sm:$0xff] }
  0x19   : > { %2145 = vmatpush3.bf16.msra.mxu0 %v802_v39  ;;  %2002 = vmatprep.subr.bf16.mxu1 %v2521_v3  ;;  %v817_v10 = vor.u32 %v816_v0, %v813_v63  ;;  %v306_v34 = vrot.slane %v304_v20, 1  ;;  %v970_v36 = vpack.c.bf16 %v1781_v27, %v1780_v26  ;;  %v837_v39 = vshrl.u32 %v2739_v25, 16  ;;  %v216_v61 = vld [vmem:[%s3473_s1 + $0x38] sm:$0xff]  ;;  %v2802_v1 = vld [vmem:[%s2626_s29 + $0x20] sm:$0xff]   ;;  %v1787_v12 = vld [vmem:[%s3473_s1 + $0x2c8] sm:$0xff] }
  0x1a   : > { %2146 = vmatprep.subr.bf16.mxu0 %v2521_v3  ;;  %v299_v18 = vsel %vm287_vm1, %v294_v7, %v298_v8  ;;  %v834_v37 = vor.u32 %v833_v24, %v830_v23  ;;  %v840_v42 = vshll.u32 %v2739_v25, 16  ;;  %v308_v50 = vshrl.u32 %v2715_v9, 16  ;;  %v2812_v8 = vld [vmem:[%s2626_s29] sm:$0xe]  ;;  %v218_v17 = vld [vmem:[%s3473_s1 + $0x48] sm:$0xff] }
  0x1b   : > { %v826_v21 = vsel %vm809_vm2, %v817_v10, %v825_v11  ;;  %v307_v49 = vsel %vm287_vm1, %v302_v33, %v306_v34  ;;  %v312_v51 = vshll.u32 %v2757_v35, 16  ;;  %v227_v59 = vpack.c.bf16 %v214_v47, %v213_v46  ;;  %v217_v16 = vld [vmem:[%s3473_s1 + $0x40] sm:$0xff]  ;;  %v1789_v33 = vld [vmem:[%s3473_s1 + $0x2d8] sm:$0xff] }
  0x1c   : > { %2003 = vmatpush3.bf16.msra.mxu1 %v256_v44  ;;  %v1783_v44 = vld [vmem:[%s3473_s1 + $0x2a8] sm:$0xff]  ;;  %v835_v52 = vsel %vm809_vm2, %v825_v11, %v834_v37  ;;  %v681_v62 = vrot.slane %v2667_v40, 1  ;;  %v310_v63 = vor.u32 %v308_v50, %v306_v34  ;;  %v682_v2 = vrot.slane %v2670_v41, 1  ;;  %v1786_v11 = vld [vmem:[%s3473_s1 + $0x2c0] sm:$0xff]  ;;  %v219_v34 = vld [vmem:[%s3473_s1 + $0x50] sm:$0xff] }
  0x1d   : > { %2147 = vmatpush3.bf16.msra.mxu0 %v803_v45  ;;  %2004 = vmatprep.subr.bf16.mxu1 %v2521_v3  ;;  %v226_v45 = vpack.c.bf16 %v212_v31, %v211_v29  ;;  %v971_v53 = vpack.c.bf16 %v1783_v44, %v1782_v43  ;;  %v314_v0 = vrot.slane %v312_v51, 1  ;;  %v846_v40 = vshrl.u32 %v2782_v56, 16  ;;  %v1788_v31 = vld [vmem:[%s3473_s1 + $0x2d0] sm:$0xff] }
  0x1e   : > { %2148 = vmatprep.subr.bf16.mxu0 %v2521_v3  ;;  %v849_v7 = vshll.u32 %v2782_v56, 16  ;;  %v228_v10 = vpack.c.bf16 %v216_v61, %v215_v60  ;;  %v1738_v13 = vcombine.low %v2812_v8, %v2643_v30  ;;  %v2824_v14 = vsel %vm517_vm3, %v681_v62, %v682_v2  ;;  %v2899_v61 = vld [vmem:[%s2626_s29 + $0x28] sm:$0xff]   ;;  %v1739_v30 = vld [vmem:[%s3473_s1 + $0x180] sm:$0xff] }
  0x1f   : > { %v316_v15 = vshrl.u32 %v2757_v35, 16  ;;  %v315_v19 = vsel %vm287_vm1, %v310_v63, %v314_v0  ;;  %v320_v20 = vshll.u32 %v2802_v1, 16  ;;  %v688_v23 = vrot.slane %v2782_v56, 1 }
  0x20   : > { %2005 = vmatpush3.bf16.msra.mxu1 %v257_v54  ;;  %v839_v54 = vrot.slane %v837_v39, 1  ;;  %v973_v26 = vpack.c.bf16 %v1787_v12, %v1786_v11  ;;  %v848_v27 = vrot.slane %v846_v40, 1  ;;  %v229_v29 = vpack.c.bf16 %v218_v17, %v217_v16  ;;  %v1792_v40 = vld [vmem:[%s3473_s1 + $0x2f0] sm:$0xff]  ;;  %v224_v12 = vld [vmem:[%s3473_s1 + $0x78] sm:$0xff] }
  0x21   : > { %2149 = vmatpush3.bf16.msra.mxu0 %v804_v55  ;;  %2006 = vmatprep.subr.bf16.mxu1 %v2521_v3  ;;  %v842_v55 = vrot.slane %v840_v42, 2  ;;  %v318_v42 = vor.u32 %v316_v15, %v314_v0  ;;  %v322_v43 = vrot.slane %v320_v20, 1  ;;  %v974_v47 = vpack.c.bf16 %v1789_v33, %v1788_v31  ;;  %v223_v11 = vld [vmem:[%s3473_s1 + $0x70] sm:$0xff] }
  0x22   : > { %2150 = vmatprep.subr.bf16.mxu0 %v2521_v3 }
  0x24   : > { %2007 = vmatpush3.bf16.msra.mxu1 %v258_v5  ;;  %v2807_v5 = vor.u32 %v842_v55, %v839_v54  ;;  %v2886_v54 = vld [vmem:[%s2626_s29 + $0x20] sm:$0xff]   ;;  %v324_v55 = vshrl.u32 %v2802_v1, 16 }
  0x25   : > { %2151 = vmatpush3.bf16.msra.mxu0 %v805_v6  ;;  %2028 = vmatprep.subr.bf16.mxu1 %v2521_v3  ;;  %v972_v6 = vpack.c.bf16 %v1785_v58, %v1784_v57  ;;  %v221_v57 = vld [vmem:[%s3473_s1 + $0x60] sm:$0xff]  ;;  %v222_v58 = vld [vmem:[%s3473_s1 + $0x68] sm:$0xff]  ;;  %v1449_v33 = vrot.slane %v2886_v54, 3 }
  0x26   : > { %2172 = vmatprep.subr.bf16.mxu0 %v2521_v3  ;;  %v844_v24 = vsel %vm809_vm2, %v834_v37, %v2807_v5  ;;  %v2859_v37 = vld [vmem:[%s2626_s29 + $0x28] ss:$0 sps:$4 sm:$0x11]   ;;  %v326_v15 = vor.u32 %v324_v55, %v322_v43 }
  0x27   : > { %2009 = vmatmul.mubr.bf16.vlgmr.msra.gmra.mrb[0].mxu1 %v299_v18  ;;  %v684_v18 = vrot.slane %v2711_v4, 1  ;;  %v328_v60 = vshll.u32 %v2859_v37, 16  ;;  %v1796_v55 = vld [vmem:[%s3473_s1 + $0x308] sm:$0xff] }
  0x28   : > { %2153 = vmatmul.mubr.bf16.vlgmr.msra.gmra.mrb[0].mxu0 %v826_v21  ;;  %2012 = vmatprep.mubr.msk.bf16.mxu1 %vm2522_vm0, %v2521_v3  ;;  %v2838_v21 = vld [vmem:[%s2626_s29 + $0x2c] ss:$0 sps:$4 sm:$0x33]  }
  0x29   : > { %2173 = vmatpush3.bf16.msra.mxu0 %v969_v22  ;;  %2156 = vmatprep.mubr.msk.bf16.mxu0 %vm2522_vm0, %v2521_v3  ;;  %v686_v22 = vrot.slane %v2739_v25, 1  ;;  %v2862_v39 = vsel %vm517_vm3, %v682_v2, %v684_v18  ;;  %v858_v50 = vshll.u32 %v2838_v21, 16  ;;  %v330_v16 = vrot.slane %v328_v60, 1 }
  0x2a   : > { %2174 = vmatprep.subr.bf16.mxu0 %v2521_v3  ;;  %2029 = vmatpush3.bf16.msra.mxu1 %v225_v28  ;;  %v851_v28 = vrot.slane %v849_v7, 2  ;;  %v1793_v7 = vld [vmem:[%s3473_s1 + $0x2f8] sm:$0xff] }
  0x2b   : > { %2030 = vmatprep.subr.bf16.mxu1 %v2521_v3  ;;  %v2867_v44 = vsel %vm517_vm3, %v684_v18, %v686_v22  ;;  %v860_v2 = vrot.slane %v858_v50, 2  ;;  %v2509_v18 = vld [vmem:[%s2626_s29 + $0x30] ss:$0 sps:$4 sm:$0x33]   ;;  %v976_v20 = vpack.c.bf16 %v1793_v7, %v1792_v40  ;;  %v1798_v40 = vld [vmem:[%s3473_s1 + $0x318] sm:$0xff] }
  0x2c   : > { %v852_v46 = vor.u32 %v851_v28, %v848_v27  ;;  %v331_v27 = vsel %vm287_vm1, %v326_v15, %v330_v16  ;;  %v984_v15 = vrot.slane %v2711_v4, 2  ;;  %v1799_v16 = vld [vmem:[%s3473_s1 + $0x320] sm:$0xff] }
  0x2d   : > { %2175 = vmatpush3.bf16.msra.mxu0 %v970_v36  ;;  %v220_v36 = vld [vmem:[%s3473_s1 + $0x58] sm:$0xff]  ;;  %v1726_v4 = vld [vmem:[%s3473_s1 + $0x120] sm:$0xff] }
  0x2e   : > { %2176 = vmatprep.subr.bf16.mxu0 %v2521_v3  ;;  %2031 = vmatpush3.bf16.msra.mxu1 %v226_v45  ;;  %v2872_v45 = vsel %vm517_vm3, %v686_v22, %v688_v23  ;;  %v230_v51 = vpack.c.bf16 %v220_v36, %v219_v34  ;;  %v853_v62 = vsel %vm809_vm2, %v2807_v5, %v852_v46  ;;  %v1151_v5 = vrot.slane %v2899_v61, 2  ;;  %v2941_v34 = vld [vmem:[%s2626_s29 + $0x10] sm:$0xff]  }
  0x2f   : > { %2013 = vmatmul.mubr.bf16.gmra.mrb[4].mxu1 %v307_v49  ;;  %2032 = vmatprep.subr.bf16.mxu1 %v2521_v3  ;;  %v855_v49 = vshrl.u32 %v2838_v21, 16  ;;  %v232_v22 = vpack.c.bf16 %v224_v12, %v223_v11  ;;  %v1451_v36 = vrot.slane %v2899_v61, 3  ;;  %v1725_v11 = vld [vmem:[%s3473_s1 + $0x118] sm:$0xff] }
  0x30   : > { %2157 = vmatmul.mubr.bf16.gmra.mrb[4].mxu0 %v835_v52  ;;  %2016 = vmatprep.mubr.msk.bf16.mxu1 %vm2522_vm0, %v2521_v3  ;;  %v1790_v52 = vld [vmem:[%s3473_s1 + $0x2e0] sm:$0xff] }
  0x31   : > { %2177 = vmatpush3.bf16.msra.mxu0 %v971_v53  ;;  %2160 = vmatprep.mubr.msk.bf16.mxu0 %vm2522_vm0, %v2521_v3  ;;  %v1791_v53 = vld [vmem:[%s3473_s1 + $0x2e8] sm:$0xff]  ;;  %v857_v0 = vrot.slane %v855_v49, 1 }
  0x32   : > { %2178 = vmatprep.subr.bf16.mxu0 %v2521_v3  ;;  %2033 = vmatpush3.bf16.msra.mxu1 %v227_v59  ;;  %v323_v59 = vsel %vm287_vm1, %v318_v42, %v322_v43  ;;  %v975_v63 = vpack.c.bf16 %v1791_v53, %v1790_v52  ;;  %v2946_v42 = vld [vmem:[%s2626_s29 + $0x18] sm:$0xff]   ;;  %v2510_v43 = vld [vmem:[%s2626_s29 + $0x2c] ss:$0 sps:$4 sm:$0x11]   ;;  %v1445_v52 = vrot.slane %v2941_v34, 3 }
  0x33   : > { %2034 = vmatprep.subr.bf16.mxu1 %v2521_v3  ;;  %v690_v50 = vrot.slane %v2510_v43, 1  ;;  %v1447_v53 = vrot.slane %v2946_v42, 3  ;;  %v986_v43 = vrot.slane %v2739_v25, 2  ;;  %v1731_v25 = vld [vmem:[%s3473_s1 + $0x148] sm:$0xff] }
  0x35   : > { %2179 = vmatpush3.bf16.msra.mxu0 %v972_v6  ;;  %v231_v6 = vpack.c.bf16 %v222_v58, %v221_v57  ;;  %v1722_v58 = vld [vmem:[%s3473_s1 + $0x100] sm:$0xff]  ;;  %v2981_v60 = vsel %vm517_vm3, %v688_v23, %v690_v50  ;;  %v1724_v23 = vld [vmem:[%s3473_s1 + $0x110] sm:$0xff] }
  0x36   : > { %2180 = vmatprep.subr.bf16.mxu0 %v2521_v3  ;;  %2035 = vmatpush3.bf16.msra.mxu1 %v228_v10  ;;  %v1149_v10 = vrot.slane %v2886_v54, 2  ;;  %v1803_v50 = vld [vmem:[%s3473_s1 + $0x340] sm:$0xff] }
  0x37   : > { %2017 = vmatmul.mubr.bf16.gmra.mrb[8].mxu1 %v315_v19  ;;  %2036 = vmatprep.subr.bf16.mxu1 %v2521_v3  ;;  %v861_v19 = vor.u32 %v860_v2, %v857_v0 }
  0x38   : > { %2161 = vmatmul.mubr.bf16.gmra.mrb[8].mxu0 %v844_v24  ;;  %2020 = vmatprep.mubr.msk.bf16.mxu1 %vm2522_vm0, %v2521_v3  ;;  %v2924_v17 = vsel %vm980_vm4, %v1149_v10, %v1151_v5  ;;  %v951_v24 = vld [vmem:[%s2626_s29 + $0x4] sm:$0xc] }
  0x39   : > { %2181 = vmatpush3.bf16.msra.mxu0 %v973_v26  ;;  %2164 = vmatprep.mubr.msk.bf16.mxu0 %vm2522_vm0, %v2521_v3  ;;  %v1153_v26 = vrot.slane %v2509_v18, 2  ;;  %v1794_v31 = vcombine.low %v951_v24, %v2648_v32  ;;  %v982_v32 = vrot.slane %v2670_v41, 2  ;;  %v1795_v41 = vld [vmem:[%s3473_s1 + $0x300] sm:$0xff]  ;;  %v1800_v18 = vld [vmem:[%s3473_s1 + $0x328] sm:$0xff] }
  0x3a   : > { %2037 = vmatpush3.bf16.msra.mxu1 %v229_v29  ;;  %2182 = vmatprep.subr.bf16.mxu0 %v2521_v3  ;;  %v862_v29 = vsel %vm809_vm2, %v852_v46, %v861_v19  ;;  %v2953_v46 = vld [vmem:[%s2626_s29 + $0xc] sm:$0xf]  ;;  %v1108_v2 = vpack.c.bf16 %v1796_v55, %v1795_v41  ;;  %v507_v19 = vpack.c.bf16 %v1725_v11, %v1724_v23  ;;  %v1734_v23 = vld [vmem:[%s3473_s1 + $0x160] sm:$0xff] }
  0x3b   : > { %2038 = vmatprep.subr.bf16.mxu1 %v2521_v3  ;;  %v2934_v28 = vsel %vm980_vm4, %v1151_v5, %v1153_v26  ;;  %v981_v49 = vrot.slane %v1794_v31, 2  ;;  %v1110_v24 = vpack.c.bf16 %v1800_v18, %v1799_v16  ;;  %v1801_v26 = vld [vmem:[%s3473_s1 + $0x330] sm:$0xff]  ;;  %v1810_v18 = vld [vmem:[%s3473_s1 + $0x378] sm:$0xff] }
  0x3c   : > { %v1728_v31 = vld [vmem:[%s3473_s1 + $0x130] sm:$0xff] }
  0x3d   : > { %2183 = vmatpush3.bf16.msra.mxu0 %v974_v47  ;;  %v2958_v47 = vsel %vm1443_vm5, %v1449_v33, %v1451_v36  ;;  %v983_v0 = vsel %vm980_vm4, %v981_v49, %v982_v32  ;;  %v1809_v16 = vld [vmem:[%s3473_s1 + $0x370] sm:$0xff] }
  0x3e   : > { %2039 = vmatpush3.bf16.msra.mxu1 %v230_v51  ;;  %2184 = vmatprep.subr.bf16.mxu0 %v2521_v3  ;;  %v1414_v51 = vld [vmem:[%s2626_s29 + $0x8] sm:$0x8] }
  0x3f   : > { %2021 = vmatmul.mubr.bf16.gmra.mrb[12].mxu1 %v323_v59  ;;  %2040 = vmatprep.subr.bf16.mxu1 %v2521_v3  ;;  %v1850_v57 = vcombine.low %v1414_v51, %v2953_v46  ;;  %v1723_v59 = vld [vmem:[%s3473_s1 + $0x108] sm:$0xff] }
  0x40   : > { %2165 = vmatmul.mubr.bf16.gmra.mrb[12].mxu0 %v853_v62  ;;  %2024 = vmatprep.mubr.msk.bf16.mxu1 %vm2522_vm0, %v2521_v3  ;;  %v2984_v62 = vsel %vm1443_vm5, %v1445_v52, %v1447_v53  ;;  %v506_v7 = vpack.c.bf16 %v1723_v59, %v1722_v58  ;;  %v1804_v51 = vld [vmem:[%s3473_s1 + $0x348] sm:$0xff]  ;;  %v1806_v58 = vld [vmem:[%s3473_s1 + $0x358] sm:$0xff]  ;;  %v1732_v59 = vld [vmem:[%s3473_s1 + $0x150] sm:$0xff] }
  0x41   : > { %2168 = vmatprep.mubr.msk.bf16.mxu0 %vm2522_vm0, %v2521_v3  ;;  %2185 = vmatpush3.bf16.msra.mxu0 %v975_v63  ;;  %v1444_v63 = vrot.slane %v1850_v57, 3  ;;  %v1112_v41 = vpack.c.bf16 %v1804_v51, %v1803_v50  ;;  %v1805_v57 = vld [vmem:[%s3473_s1 + $0x350] sm:$0xff]  ;;  %v1820_v51 = vld [vmem:[%s3473_s1 + $0x398] sm:$0xff] }
  0x42   : > { %2041 = vmatpush3.bf16.msra.mxu1 %v231_v6  ;;  %2186 = vmatprep.subr.bf16.mxu0 %v2521_v3  ;;  %v1797_v6 = vld [vmem:[%s3473_s1 + $0x310] sm:$0xff] }
  0x43   : > { %2042 = vmatprep.subr.bf16.mxu1 %v2521_v3  ;;  %v2994_v5 = vsel %vm1443_vm5, %v1444_v63, %v1445_v52  ;;  %v1109_v12 = vpack.c.bf16 %v1798_v40, %v1797_v6  ;;  %v1730_v52 = vld [vmem:[%s3473_s1 + $0x140] sm:$0xff]  ;;  %v1733_v63 = vld [vmem:[%s3473_s1 + $0x158] sm:$0xff]  ;;  %v1819_v50 = vld [vmem:[%s3473_s1 + $0x390] sm:$0xff] }
  0x44   : > { %v510_v55 = vpack.c.bf16 %v1731_v25, %v1730_v52  ;;  %v511_v6 = vpack.c.bf16 %v1733_v63, %v1732_v59  ;;  %v1807_v40 = vld [vmem:[%s3473_s1 + $0x360] sm:$0xff]  ;;  %v1741_v25 = vld [vmem:[%s3473_s1 + $0x190] sm:$0xff]  ;;  %v1822_v59 = vld [vmem:[%s3473_s1 + $0x3a8] sm:$0xff] }
  0x45   : > { %2187 = vmatpush3.bf16.msra.mxu0 %v976_v20  ;;  %v1727_v20 = vld [vmem:[%s3473_s1 + $0x128] sm:$0xff] }
  0x46   : > { %2043 = vmatpush3.bf16.msra.mxu1 %v232_v22  ;;  %2208 = vmatprep.subr.bf16.mxu0 %v2521_v3  ;;  %v985_v22 = vsel %vm980_vm4, %v982_v32, %v984_v15 }
  0x47   : > { %2025 = vmatmul.mubr.bf16.gmra.mrb[16].mxu1 %v331_v27  ;;  %2064 = vmatprep.subr.bf16.mxu1 %v2521_v3  ;;  %v1802_v27 = vld [vmem:[%s3473_s1 + $0x338] sm:$0xff] }
  0x48   : > { %2169 = vmatmul.mubr.bf16.gmra.mrb[16].mxu0 %v862_v29  ;;  %2044 = vmatprep.mubr.msk.bf16.mxu1 %vm2522_vm0, %v2521_v3  ;;  %v508_v29 = vpack.c.bf16 %v1727_v20, %v1726_v4  ;;  %v1111_v32 = vpack.c.bf16 %v1802_v27, %v1801_v26  ;;  %v1737_v4 = vld [vmem:[%s3473_s1 + $0x178] sm:$0xff]  ;;  %v990_v20 = vrot.slane %v2838_v21, 2  ;;  %v1080_v26 = vld [vmem:[%s2626_s29 + $0x8] sm:$0xc]  ;;  %v518_v21 = vrot.slane %v1738_v13, 1 }
  0x49   : > { %2188 = vmatprep.mubr.msk.bf16.mxu0 %vm2522_vm0, %v2521_v3 }
  0x4f   : > { %2045 = vmatmul.mubr.bf16.vlgmr.msra.gmra.mrb[0].mxu1 %v2663_v38  ;;  %v3009_v38 = vsel %vm1443_vm5, %v1447_v53, %v1449_v33  ;;  %v1729_v33 = vld [vmem:[%s3473_s1 + $0x138] sm:$0xff]  ;;  %v987_v53 = vsel %vm980_vm4, %v984_v15, %v986_v43 }
  0x50   : > { %2189 = vmatmul.mubr.bf16.vlgmr.msra.gmra.mrb[0].mxu0 %v983_v0  ;;  %2048 = vmatprep.mubr.msk.bf16.mxu1 %vm2522_vm0, %v2521_v3  ;;  %v509_v49 = vpack.c.bf16 %v1729_v33, %v1728_v31  ;;  %v988_v0 = vrot.slane %v2782_v56, 2  ;;  %v1735_v56 = vld [vmem:[%s3473_s1 + $0x168] sm:$0xff]  ;;  %v519_v31 = vrot.slane %v2686_v48, 1  ;;  %v1145_v33 = vrot.slane %v2941_v34, 2 }
  0x51   : > { %2209 = vmatpush3.bf16.msra.mxu0 %v1108_v2  ;;  %2192 = vmatprep.mubr.msk.bf16.mxu0 %vm2522_vm0, %v2521_v3  ;;  %v1113_v2 = vpack.c.bf16 %v1806_v58, %v1805_v57  ;;  %v512_v15 = vpack.c.bf16 %v1735_v56, %v1734_v23  ;;  %v1147_v57 = vrot.slane %v2946_v42, 2  ;;  %v1821_v58 = vld [vmem:[%s3473_s1 + $0x3a0] sm:$0xff]  ;;  %v1824_v23 = vld [vmem:[%s3473_s1 + $0x3b8] sm:$0xff] }
  0x52   : > { %2210 = vmatprep.subr.bf16.mxu0 %v2521_v3  ;;  %2065 = vmatpush3.bf16.msra.mxu1 %v506_v7  ;;  %v1808_v7 = vld [vmem:[%s3473_s1 + $0x368] sm:$0xff]  ;;  %v989_v11 = vsel %vm980_vm4, %v986_v43, %v988_v0  ;;  %v991_v27 = vsel %vm980_vm4, %v988_v0, %v990_v20  ;;  %v1817_v43 = vld [vmem:[%s3473_s1 + $0x380] sm:$0xff]  ;;  %v520_v8 = vsel %vm517_vm3, %v518_v21, %v519_v31  ;;  %v1827_v21 = vld [vmem:[%s3473_s1 + $0x3d0] sm:$0xff] }
  0x53   : > { %2066 = vmatprep.subr.bf16.mxu1 %v2521_v3  ;;  %v1744_v0 = vld [vmem:[%s3473_s1 + $0x1a8] sm:$0xff] }
  0x54   : > { %v1748_v20 = vld [vmem:[%s3473_s1 + $0x1c8] sm:$0xff] }
  0x55   : > { %2211 = vmatpush3.bf16.msra.mxu0 %v1109_v12  ;;  %v1114_v12 = vpack.c.bf16 %v1808_v7, %v1807_v40  ;;  %v1263_v40 = vpack.c.bf16 %v1822_v59, %v1821_v58  ;;  %v1823_v7 = vld [vmem:[%s3473_s1 + $0x3b0] sm:$0xff]  ;;  %v1282_v59 = vshrl.u32 %v2941_v34, 16 }
  0x56   : > { %2212 = vmatprep.subr.bf16.mxu0 %v2521_v3  ;;  %2067 = vmatpush3.bf16.msra.mxu1 %v507_v19  ;;  %v1736_v19 = vld [vmem:[%s3473_s1 + $0x170] sm:$0xff] }
  0x57   : > { %2049 = vmatmul.mubr.bf16.gmra.mrb[4].mxu1 %v2686_v48  ;;  %2068 = vmatprep.subr.bf16.mxu1 %v2521_v3  ;;  %v1740_v48 = vld [vmem:[%s3473_s1 + $0x188] sm:$0xff] }
  0x58   : > { %2193 = vmatmul.mubr.bf16.gmra.mrb[4].mxu0 %v985_v22  ;;  %2052 = vmatprep.mubr.msk.bf16.mxu1 %vm2522_vm0, %v2521_v3  ;;  %v1115_v22 = vpack.c.bf16 %v1810_v18, %v1809_v16  ;;  %v645_v52 = vpack.c.bf16 %v1740_v48, %v1739_v30  ;;  %v1264_v16 = vpack.c.bf16 %v1824_v23, %v1823_v7  ;;  %v1829_v30 = vld [vmem:[%s3473_s1 + $0x3e0] sm:$0xff]  ;;  %v1830_v48 = vld [vmem:[%s3473_s1 + $0x3e8] sm:$0xff]  ;;  %v1294_v7 = vshll.u32 %v2946_v42, 16 }
  0x59   : > { %2213 = vmatpush3.bf16.msra.mxu0 %v1110_v24  ;;  %2196 = vmatprep.mubr.msk.bf16.mxu0 %vm2522_vm0, %v2521_v3  ;;  %v513_v24 = vpack.c.bf16 %v1737_v4, %v1736_v19  ;;  %v1825_v19 = vld [vmem:[%s3473_s1 + $0x3c0] sm:$0xff]  ;;  %v1826_v4 = vld [vmem:[%s3473_s1 + $0x3c8] sm:$0xff] }
  0x5a   : > { %2214 = vmatprep.subr.bf16.mxu0 %v2521_v3  ;;  %2069 = vmatpush3.bf16.msra.mxu1 %v508_v29  ;;  %v3121_v29 = vcombine.low %v1080_v26, %v2953_v46  ;;  %v1265_v26 = vpack.c.bf16 %v1826_v4, %v1825_v19  ;;  %v1834_v23 = vld [vmem:[%s3473_s1 + $0x400] sm:$0xff]  ;;  %v1300_v4 = vshrl.u32 %v2886_v54, 16 }
  0x5b   : > { %2070 = vmatprep.subr.bf16.mxu1 %v2521_v3 }
  0x5c   : > { %v1144_v46 = vrot.slane %v3121_v29, 2  ;;  %v1277_v58 = vshll.u32 %v3121_v29, 16 }
  0x5d   : > { %2215 = vmatpush3.bf16.msra.mxu0 %v1111_v32  ;;  %v1818_v32 = vld [vmem:[%s3473_s1 + $0x388] sm:$0xff] }
  0x5e   : > { %2216 = vmatprep.subr.bf16.mxu0 %v2521_v3  ;;  %2071 = vmatpush3.bf16.msra.mxu1 %v509_v49  ;;  %v1146_v13 = vsel %vm980_vm4, %v1144_v46, %v1145_v33  ;;  %v1261_v49 = vpack.c.bf16 %v1818_v32, %v1817_v43  ;;  %v1750_v46 = vld [vmem:[%s3473_s1 + $0x1d8] sm:$0xff] }
  0x5f   : > { %2053 = vmatmul.mubr.bf16.gmra.mrb[8].mxu1 %v2715_v9  ;;  %2072 = vmatprep.subr.bf16.mxu1 %v2521_v3 }
  0x60   : > { %2197 = vmatmul.mubr.bf16.gmra.mrb[8].mxu0 %v987_v53  ;;  %2056 = vmatprep.mubr.msk.bf16.mxu1 %vm2522_vm0, %v2521_v3  ;;  %v1742_v53 = vld [vmem:[%s3473_s1 + $0x198] sm:$0xff] }
  0x61   : > { %2217 = vmatpush3.bf16.msra.mxu0 %v1112_v41  ;;  %2200 = vmatprep.mubr.msk.bf16.mxu0 %vm2522_vm0, %v2521_v3  ;;  %v521_v41 = vrot.slane %v2715_v9, 1  ;;  %v646_v63 = vpack.c.bf16 %v1742_v53, %v1741_v25  ;;  %v1743_v9 = vld [vmem:[%s3473_s1 + $0x1a0] sm:$0xff]  ;;  %v1753_v25 = vld [vmem:[%s3473_s1 + $0x1f0] sm:$0xff]  ;;  %v1754_v53 = vld [vmem:[%s3473_s1 + $0x1f8] sm:$0xff] }
  0x62   : > { %2073 = vmatpush3.bf16.msra.mxu1 %v510_v55  ;;  %2218 = vmatprep.subr.bf16.mxu0 %v2521_v3  ;;  %v1262_v55 = vpack.c.bf16 %v1820_v51, %v1819_v50  ;;  %v647_v56 = vpack.c.bf16 %v1744_v0, %v1743_v9  ;;  %v1831_v51 = vld [vmem:[%s3473_s1 + $0x3f0] sm:$0xff]  ;;  %v1279_v0 = vrot.slane %v1277_v58, 3 }
  0x63   : > { %2074 = vmatprep.subr.bf16.mxu1 %v2521_v3 }
  0x65   : > { %2219 = vmatpush3.bf16.msra.mxu0 %v1113_v2  ;;  %v522_v2 = vsel %vm517_vm3, %v519_v31, %v521_v41  ;;  %v1828_v31 = vld [vmem:[%s3473_s1 + $0x3d8] sm:$0xff] }
  0x66   : > { %2075 = vmatpush3.bf16.msra.mxu1 %v511_v6  ;;  %2220 = vmatprep.subr.bf16.mxu0 %v2521_v3  ;;  %v1148_v6 = vsel %vm980_vm4, %v1145_v33, %v1147_v57  ;;  %v525_v33 = vrot.slane %v2802_v1, 1  ;;  %v1266_v43 = vpack.c.bf16 %v1828_v31, %v1827_v21  ;;  %v1841_v21 = vld [vmem:[%s3473_s1 + $0x438] sm:$0xff] }
  0x67   : > { %2057 = vmatmul.mubr.bf16.gmra.mrb[12].mxu1 %v2757_v35  ;;  %2076 = vmatprep.subr.bf16.mxu1 %v2521_v3 }
  0x68   : > { %2201 = vmatmul.mubr.bf16.gmra.mrb[12].mxu0 %v989_v11  ;;  %2060 = vmatprep.mubr.msk.bf16.mxu1 %vm2522_vm0, %v2521_v3  ;;  %v1745_v11 = vld [vmem:[%s3473_s1 + $0x1b0] sm:$0xff] }
  0x69   : > { %2204 = vmatprep.mubr.msk.bf16.mxu0 %vm2522_vm0, %v2521_v3  ;;  %2221 = vmatpush3.bf16.msra.mxu0 %v1114_v12  ;;  %v1746_v12 = vld [vmem:[%s3473_s1 + $0x1b8] sm:$0xff] }
  0x6a   : > { %2077 = vmatpush3.bf16.msra.mxu1 %v512_v15  ;;  %2222 = vmatprep.subr.bf16.mxu0 %v2521_v3  ;;  %v523_v15 = vrot.slane %v2757_v35, 1  ;;  %v648_v18 = vpack.c.bf16 %v1746_v12, %v1745_v11  ;;  %v1747_v35 = vld [vmem:[%s3473_s1 + $0x1c0] sm:$0xff] }
  0x6b   : > { %2078 = vmatprep.subr.bf16.mxu1 %v2521_v3 }
  0x6d   : > { %2223 = vmatpush3.bf16.msra.mxu0 %v1115_v22  ;;  %v524_v22 = vsel %vm517_vm3, %v521_v41, %v523_v15  ;;  %v527_v41 = vrot.slane %v2859_v37, 1 }
  0x6e   : > { %2079 = vmatpush3.bf16.msra.mxu1 %v513_v24  ;;  %2244 = vmatprep.subr.bf16.mxu0 %v2521_v3  ;;  %v1150_v24 = vsel %vm980_vm4, %v1147_v57, %v1149_v10  ;;  %v1749_v10 = vld [vmem:[%s3473_s1 + $0x1d0] sm:$0xff] }
  0x6f   : > { %2061 = vmatmul.mubr.bf16.gmra.mrb[16].mxu1 %v2802_v1  ;;  %2100 = vmatprep.subr.bf16.mxu1 %v2521_v3  ;;  %v650_v32 = vpack.c.bf16 %v1750_v46, %v1749_v10  ;;  %v1751_v1 = vld [vmem:[%s3473_s1 + $0x1e0] sm:$0xff]  ;;  %v528_v37 = vsel %vm517_vm3, %v525_v33, %v527_v41  ;;  %v1309_v46 = vshrl.u32 %v2899_v61, 16 }
  0x70   : > { %2205 = vmatmul.mubr.bf16.gmra.mrb[16].mxu0 %v991_v27  ;;  %2080 = vmatprep.mubr.msk.bf16.mxu1 %vm2522_vm0, %v2521_v3  ;;  %v649_v27 = vpack.c.bf16 %v1748_v20, %v1747_v35  ;;  %v1303_v35 = vshll.u32 %v2886_v54, 16  ;;  %v1839_v20 = vld [vmem:[%s3473_s1 + $0x428] sm:$0xff]  ;;  %v1840_v54 = vld [vmem:[%s3473_s1 + $0x430] sm:$0xff] }
  0x71   : > { %2224 = vmatprep.mubr.msk.bf16.mxu0 %vm2522_vm0, %v2521_v3  ;;  %v1435_v10 = vpack.c.bf16 %v1841_v21, %v1840_v54  ;;  %v3412_v54 = vld [vmem:[%s3474_s2] ss:$0 sm:$0xff] }
  0x77   : > { %2081 = vmatmul.mubr.bf16.vlgmr.msra.gmra.mrb[0].mxu1 %v520_v8  ;;  %v1752_v8 = vld [vmem:[%s3473_s1 + $0x1e8] sm:$0xff] }
  0x78   : > { %2225 = vmatmul.mubr.bf16.vlgmr.msra.gmra.mrb[0].mxu0 %v1146_v13  ;;  %2084 = vmatprep.mubr.msk.bf16.mxu1 %vm2522_vm0, %v2521_v3  ;;  %v526_v13 = vsel %vm517_vm3, %v523_v15, %v525_v33  ;;  %v651_v50 = vpack.c.bf16 %v1752_v8, %v1751_v1  ;;  %v1296_v15 = vrot.slane %v1294_v7, 3  ;;  %v1312_v33 = vshll.u32 %v2899_v61, 16  ;;  %v2511_v8 = vld [vmem:[%s2626_s29 + $0x30] ss:$0 sps:$4 sm:$0x77]  }
  0x79   : > { %2245 = vmatpush3.bf16.msra.mxu0 %v1261_v49  ;;  %2228 = vmatprep.mubr.msk.bf16.mxu0 %vm2522_vm0, %v2521_v3  ;;  %v1267_v49 = vpack.c.bf16 %v1830_v48, %v1829_v30  ;;  %v1311_v48 = vrot.slane %v1309_v46, 2 }
  0x7a   : > { %2246 = vmatprep.subr.bf16.mxu0 %v2521_v3  ;;  %2101 = vmatpush3.bf16.msra.mxu1 %v645_v52  ;;  %v1832_v52 = vld [vmem:[%s3473_s1 + $0x3f8] sm:$0xff]  ;;  %v1314_v1 = vrot.slane %v1312_v33, 3 }
  0x7b   : > { %2102 = vmatprep.subr.bf16.mxu1 %v2521_v3  ;;  %v1268_v57 = vpack.c.bf16 %v1832_v52, %v1831_v51  ;;  %v1318_v52 = vshrl.u32 %v2511_v8, 16 }
  0x7d   : > { %2247 = vmatpush3.bf16.msra.mxu0 %v1262_v55  ;;  %v1274_v55 = vshrl.u32 %v3121_v29, 16 }
  0x7e   : > { %2248 = vmatprep.subr.bf16.mxu0 %v2521_v3  ;;  %2103 = vmatpush3.bf16.msra.mxu1 %v646_v63  ;;  %v1285_v63 = vshll.u32 %v2941_v34, 16 }
  0x7f   : > { %2085 = vmatmul.mubr.bf16.gmra.mrb[4].mxu1 %v522_v2  ;;  %2104 = vmatprep.subr.bf16.mxu1 %v2521_v3  ;;  %v1276_v9 = vrot.slane %v1274_v55, 2  ;;  %v1284_v2 = vrot.slane %v1282_v59, 2  ;;  %v1848_v59 = vld [vmem:[%s3473_s1 + $0x470] sm:$0xff] }
  0x80   : > { %2229 = vmatmul.mubr.bf16.gmra.mrb[4].mxu0 %v1148_v6  ;;  %2088 = vmatprep.mubr.msk.bf16.mxu1 %vm2522_vm0, %v2521_v3  ;;  %v1287_v6 = vrot.slane %v1285_v63, 3  ;;  %v1849_v63 = vld [vmem:[%s3473_s1 + $0x478] sm:$0xff] }
  0x81   : > { %2249 = vmatpush3.bf16.msra.mxu0 %v1263_v40  ;;  %2232 = vmatprep.mubr.msk.bf16.mxu0 %vm2522_vm0, %v2521_v3  ;;  %v1280_v34 = vor.u32 %v1279_v0, %v1276_v9  ;;  %v1291_v40 = vshrl.u32 %v2946_v42, 16  ;;  %v1837_v42 = vld [vmem:[%s3473_s1 + $0x418] sm:$0xff] }
  0x82   : > { %2250 = vmatprep.subr.bf16.mxu0 %v2521_v3  ;;  %2105 = vmatpush3.bf16.msra.mxu1 %v647_v56  ;;  %v1288_v29 = vor.u32 %v1287_v6, %v1284_v2 }
  0x83   : > { %2106 = vmatprep.subr.bf16.mxu1 %v2521_v3  ;;  %v1293_v12 = vrot.slane %v1291_v40, 2 }
  0x84   : > { %v1289_v56 = vsel %vm1272_vm6, %v1280_v34, %v1288_v29 }
  0x85   : > { %2251 = vmatpush3.bf16.msra.mxu0 %v1264_v16  ;;  %v1836_v16 = vld [vmem:[%s3473_s1 + $0x410] sm:$0xff]  ;;  %v1297_v19 = vor.u32 %v1296_v15, %v1293_v12 }
  0x86   : > { %2252 = vmatprep.subr.bf16.mxu0 %v2521_v3  ;;  %2107 = vmatpush3.bf16.msra.mxu1 %v648_v18  ;;  %v1433_v18 = vpack.c.bf16 %v1837_v42, %v1836_v16 }
  0x87   : > { %2089 = vmatmul.mubr.bf16.gmra.mrb[8].mxu1 %v524_v22  ;;  %2108 = vmatprep.subr.bf16.mxu1 %v2521_v3  ;;  %v1298_v22 = vsel %vm1272_vm6, %v1288_v29, %v1297_v19 }
  0x88   : > { %2233 = vmatmul.mubr.bf16.gmra.mrb[8].mxu0 %v1150_v24  ;;  %2092 = vmatprep.mubr.msk.bf16.mxu1 %vm2522_vm0, %v2521_v3 }
  0x89   : > { %2253 = vmatpush3.bf16.msra.mxu0 %v1265_v26  ;;  %2236 = vmatprep.mubr.msk.bf16.mxu0 %vm2522_vm0, %v2521_v3  ;;  %v1302_v26 = vrot.slane %v1300_v4, 2 }
  0x8a   : > { %2109 = vmatpush3.bf16.msra.mxu1 %v649_v27  ;;  %2254 = vmatprep.subr.bf16.mxu0 %v2521_v3  ;;  %v1305_v27 = vrot.slane %v1303_v35, 3 }
  0x8b   : > { %2110 = vmatprep.subr.bf16.mxu1 %v2521_v3 }
  0x8c   : > { %v1306_v31 = vor.u32 %v1305_v27, %v1302_v26 }
  0x8d   : > { %2255 = vmatpush3.bf16.msra.mxu0 %v1266_v43  ;;  %v1843_v43 = vld [vmem:[%s3473_s1 + $0x448] sm:$0xff] }
  0x8e   : > { %2111 = vmatpush3.bf16.msra.mxu1 %v650_v32  ;;  %2256 = vmatprep.subr.bf16.mxu0 %v2521_v3  ;;  %v1307_v32 = vsel %vm1272_vm6, %v1297_v19, %v1306_v31 }
  0x8f   : > { %2093 = vmatmul.mubr.bf16.gmra.mrb[12].mxu1 %v526_v13  ;;  %2112 = vmatprep.subr.bf16.mxu1 %v2521_v3  ;;  %v1844_v13 = vld [vmem:[%s3473_s1 + $0x450] sm:$0xff] }
  0x90   : > { %2237 = vmatmul.mubr.bf16.gmra.mrb[12].mxu0 %v2924_v17  ;;  %2096 = vmatprep.mubr.msk.bf16.mxu1 %vm2522_vm0, %v2521_v3  ;;  %v652_v17 = vpack.c.bf16 %v1754_v53, %v1753_v25  ;;  %v1321_v25 = vshll.u32 %v2511_v8, 16  ;;  %v1847_v53 = vld [vmem:[%s3473_s1 + $0x468] sm:$0xff] }
  0x91   : > { %2240 = vmatprep.mubr.msk.bf16.mxu0 %vm2522_vm0, %v2521_v3  ;;  %2257 = vmatpush3.bf16.msra.mxu0 %v1267_v49  ;;  %v1845_v49 = vld [vmem:[%s3473_s1 + $0x458] sm:$0xff] }
  0x92   : > { %2113 = vmatpush3.bf16.msra.mxu1 %v651_v50  ;;  %2258 = vmatprep.subr.bf16.mxu0 %v2521_v3  ;;  %v1315_v50 = vor.u32 %v1314_v1, %v1311_v48  ;;  %v1437_v51 = vpack.c.bf16 %v1845_v49, %v1844_v13  ;;  %v1323_v58 = vrot.slane %v1321_v25, 3 }
  0x93   : > { %2114 = vmatprep.subr.bf16.mxu1 %v2521_v3 }
  0x94   : > { %v1316_v41 = vsel %vm1272_vm6, %v1306_v31, %v1315_v50 }
  0x95   : > { %2259 = vmatpush3.bf16.msra.mxu0 %v1268_v57  ;;  %v1320_v57 = vrot.slane %v1318_v52, 2 }
  0x96   : > { %2115 = vmatpush3.bf16.msra.mxu1 %v652_v17  ;;  %2280 = vmatprep.subr.bf16.mxu0 %v2521_v3 }
  0x97   : > { %2097 = vmatmul.mubr.bf16.gmra.mrb[16].mxu1 %v528_v37  ;;  %2316 = vmatprep.subr.bf16.mxu1 %v2521_v3  ;;  %v1324_v17 = vor.u32 %v1323_v58, %v1320_v57  ;;  %v1439_v37 = vpack.c.bf16 %v1849_v63, %v1848_v59 }
  0x98   : > { %2241 = vmatmul.mubr.bf16.gmra.mrb[16].mxu0 %v2934_v28  ;;  %2116 = vmatprep.mubr.msk.bf16.mxu1 %vm2522_vm0, %v2521_v3  ;;  %v1835_v28 = vld [vmem:[%s3473_s1 + $0x408] sm:$0xff] }
  0x99   : > { %2260 = vmatprep.mubr.msk.bf16.mxu0 %vm2522_vm0, %v2521_v3  ;;  %v1432_v11 = vpack.c.bf16 %v1835_v28, %v1834_v23  ;;  %v1325_v9 = vsel %vm1272_vm6, %v1315_v50, %v1324_v17 }
  0x9f   : > { %2117 = vmatmul.mubr.bf16.vlgmr.msra.gmra.mrb[0].mxu1 %v2824_v14  ;;  %v1838_v14 = vld [vmem:[%s3473_s1 + $0x420] sm:$0xff] }
  0xa0   : > { %2261 = vmatmul.mubr.bf16.vlgmr.msra.gmra.mrb[0].mxu0 %v1289_v56  ;;  %2120 = vmatprep.mubr.msk.bf16.mxu1 %vm2522_vm0, %v2521_v3  ;;  %v1434_v24 = vpack.c.bf16 %v1839_v20, %v1838_v14 }
  0xa1   : > { %2281 = vmatpush3.bf16.msra.mxu0 %v1432_v11  ;;  %2264 = vmatprep.mubr.msk.bf16.mxu0 %vm2522_vm0, %v2521_v3 }
  0xa2   : > { %2282 = vmatprep.subr.bf16.mxu0 %v2521_v3  ;;  %2324 = vmatpush3.bf16.msra.mxu1 %v1432_v11 }
  0xa3   : > { %2317 = vmatprep.subr.bf16.mxu1 %v2521_v3 }
  0xa5   : > { %2283 = vmatpush3.bf16.msra.mxu0 %v1433_v18 }
  0xa6   : > { %2284 = vmatprep.subr.bf16.mxu0 %v2521_v3  ;;  %2325 = vmatpush3.bf16.msra.mxu1 %v1433_v18 }
  0xa7   : > { %2121 = vmatmul.mubr.bf16.gmra.mrb[4].mxu1 %v2862_v39  ;;  %2318 = vmatprep.subr.bf16.mxu1 %v2521_v3  ;;  %v1842_v39 = vld [vmem:[%s3473_s1 + $0x440] sm:$0xff] }
  0xa8   : > { %2265 = vmatmul.mubr.bf16.gmra.mrb[4].mxu0 %v1298_v22  ;;  %2124 = vmatprep.mubr.msk.bf16.mxu1 %vm2522_vm0, %v2521_v3  ;;  %v1436_v30 = vpack.c.bf16 %v1843_v43, %v1842_v39  ;;  %v3417_v39 = vld [vmem:[%s3475_s3] ss:$0 sm:$0xff] }
  0xa9   : > { %2285 = vmatpush3.bf16.msra.mxu0 %v1434_v24  ;;  %2268 = vmatprep.mubr.msk.bf16.mxu0 %vm2522_vm0, %v2521_v3 }
  0xaa   : > { %2286 = vmatprep.subr.bf16.mxu0 %v2521_v3  ;;  %2326 = vmatpush3.bf16.msra.mxu1 %v1434_v24 }
  0xab   : > { %2319 = vmatprep.subr.bf16.mxu1 %v2521_v3 }
  0xad   : > { %2287 = vmatpush3.bf16.msra.mxu0 %v1435_v10 }
  0xae   : > { %2288 = vmatprep.subr.bf16.mxu0 %v2521_v3  ;;  %2327 = vmatpush3.bf16.msra.mxu1 %v1435_v10 }
  0xaf   : > { %2125 = vmatmul.mubr.bf16.gmra.mrb[8].mxu1 %v2867_v44  ;;  %2320 = vmatprep.subr.bf16.mxu1 %v2521_v3  ;;  %v1846_v44 = vld [vmem:[%s3473_s1 + $0x460] sm:$0xff] }
  0xb0   : > { %2269 = vmatmul.mubr.bf16.gmra.mrb[8].mxu0 %v1307_v32  ;;  %2128 = vmatprep.mubr.msk.bf16.mxu1 %vm2522_vm0, %v2521_v3  ;;  %v1438_v55 = vpack.c.bf16 %v1847_v53, %v1846_v44 }
  0xb1   : > { %2289 = vmatpush3.bf16.msra.mxu0 %v1436_v30  ;;  %2272 = vmatprep.mubr.msk.bf16.mxu0 %vm2522_vm0, %v2521_v3 }
  0xb2   : > { %2328 = vmatpush3.bf16.msra.mxu1 %v1436_v30  ;;  %2290 = vmatprep.subr.bf16.mxu0 %v2521_v3 }
  0xb3   : > { %2321 = vmatprep.subr.bf16.mxu1 %v2521_v3 }
  0xb5   : > { %2291 = vmatpush3.bf16.msra.mxu0 %v1437_v51 }
  0xb6   : > { %2329 = vmatpush3.bf16.msra.mxu1 %v1437_v51  ;;  %2292 = vmatprep.subr.bf16.mxu0 %v2521_v3 }
  0xb7   : > { %2129 = vmatmul.mubr.bf16.gmra.mrb[12].mxu1 %v2872_v45  ;;  %2322 = vmatprep.subr.bf16.mxu1 %v2521_v3  ;;  %v1453_v45 = vrot.slane %v2511_v8, 3 }
  0xb8   : > { %2273 = vmatmul.mubr.bf16.gmra.mrb[12].mxu0 %v1316_v41  ;;  %2132 = vmatprep.mubr.msk.bf16.mxu1 %vm2522_vm0, %v2521_v3 }
  0xb9   : > { %2276 = vmatprep.mubr.msk.bf16.mxu0 %vm2522_vm0, %v2521_v3  ;;  %2293 = vmatpush3.bf16.msra.mxu0 %v1438_v55 }
  0xba   : > { %2330 = vmatpush3.bf16.msra.mxu1 %v1438_v55  ;;  %2294 = vmatprep.subr.bf16.mxu0 %v2521_v3 }
  0xbb   : > { %2323 = vmatprep.subr.bf16.mxu1 %v2521_v3 }
  0xbd   : > { %2295 = vmatpush3.bf16.msra.mxu0 %v1439_v37 }
  0xbe   : > { %2331 = vmatpush3.bf16.msra.mxu1 %v1439_v37 }
  0xbf   : > { %2133 = vmatmul.mubr.bf16.gmra.mrb[16].mxu1 %v2981_v60  ;;  %v1454_v60 = vsel %vm1443_vm5, %v1451_v36, %v1453_v45 }
  0xc0   : > { %2277 = vmatmul.mubr.bf16.gmra.mrb[16].mxu0 %v1325_v9  ;;  %2308 = vmatprep.mubr.msk.bf16.mxu1 %vm2522_vm0, %v2521_v3 }
  0xc1   : > { %2296 = vmatprep.mubr.msk.bf16.mxu0 %vm2522_vm0, %v2521_v3 }
  0xc7   : > { %2309 = vmatmul.mubr.bf16.vlgmr.msra.gmra.mrb[20].mxu1 %v2958_v47 }
  0xc8   : > { %2297 = vmatmul.mubr.bf16.vlgmr.msra.gmra.mrb[0].mxu0 %v2994_v5  ;;  %2312 = vmatprep.mubr.msk.bf16.mxu1 %vm2522_vm0, %v2521_v3 }
  0xc9   : > { %2300 = vmatprep.mubr.msk.bf16.mxu0 %vm2522_vm0, %v2521_v3 }
  0xcf   : > { %2313 = vmatmul.mubr.bf16.gmra.mrb[24].mxu1 %v1454_v60 }
  0xd0   : > { %2301 = vmatmul.mubr.bf16.gmra.mrb[4].mxu0 %v2984_v62 }
  0xd1   : > { %2304 = vmatprep.mubr.msk.bf16.mxu0 %vm2522_vm0, %v2521_v3 }
  0xd8   : > { %2305 = vmatmul.mubr.bf16.gmra.mrb[8].mxu0 %v3009_v38 }
 0x172   : > { %v731_v47 = vpop.f32.mrb[0].mxu1 }
 0x173   : > { %v2118_v5 = vpop.f32.mrb[1].mxu1 }
 0x174   : > { %v734_v0 = vpop.f32.mrb[2].mxu1 }
 0x175   : > { %v2119_v2 = vpop.f32.mrb[3].mxu1 }
 0x17a   : > { %v3401_v6 = vpop.f32.mrb[4].mxu1 }
 0x17b   : > { %v2122_v34 = vpop.f32.mrb[5].mxu1 }
 0x17c   : > { %v3403_v29 = vpop.f32.mrb[6].mxu1 }
 0x17d   : > { %v2123_v61 = vpop.f32.mrb[7].mxu1 }
 0x182   : > { %v3405_v40 = vpop.f32.mrb[8].mxu1 }
 0x183   : > { %v2126_v36 = vpop.f32.mrb[9].mxu1 }
 0x184   : > { %v3407_v7 = vpop.f32.mrb[10].mxu1 }
 0x185   : > { %v2127_v62 = vpop.f32.mrb[11].mxu1 }
 0x18a   : > { %v755_v23 = vpop.f32.mrb[12].mxu1 }
 0x18b   : > { %v1389_v3 = vpop.f32.mrb[12].mxu0  ;;  %v2130_v28 = vpop.f32.mrb[13].mxu1 }
 0x18c   : > { %v2338_v38 = vadd.f32 %v1389_v3, %v755_v23  ;;  %v2274_v56 = vpop.f32.mrb[13].mxu0  ;;  %v758_v11 = vpop.f32.mrb[14].mxu1 }
 0x18d   : > { %v1392_v12 = vpop.f32.mrb[14].mxu0  ;;  %v2131_v15 = vpop.f32.mrb[15].mxu1 }
 0x18e   : > { %v2340_v16 = vadd.f32 %v1392_v12, %v758_v11  ;;  %v2275_v42 = vpop.f32.mrb[15].mxu0 }
 0x192   : > { %v763_v18 = vpop.f32.mrb[16].mxu1 }
 0x193   : > { %v1397_v19 = vpop.f32.mrb[16].mxu0  ;;  %v2134_v4 = vpop.f32.mrb[17].mxu1 }
 0x194   : > { %v2342_v35 = vadd.f32 %v1397_v19, %v763_v18  ;;  %v2278_v14 = vpop.f32.mrb[17].mxu0  ;;  %v766_v20 = vpop.f32.mrb[18].mxu1 }
 0x195   : > { %v1400_v22 = vpop.f32.mrb[18].mxu0  ;;  %v2135_v24 = vpop.f32.mrb[19].mxu1 }
 0x196   : > { %v2344_v26 = vadd.f32 %v1400_v22, %v766_v20  ;;  %v2279_v27 = vpop.f32.mrb[19].mxu0 }
 0x19a   : > { %v1518_v21 = vpop.f32.mrb[20].mxu1 }
 0x19b   : > { %v1494_v31 = vpop.f32.mrb[0].mxu0  ;;  %v2339_v10 = vadd.f32 %v2338_v38, %v1518_v21  ;;  %v2310_v46 = vpop.f32.mrb[21].mxu1 }
 0x19c   : > { %v2332_v33 = vadd.f32 %v1494_v31, %v731_v47  ;;  %v2298_v43 = vpop.f32.mrb[1].mxu0  ;;  %v1521_v32 = vpop.f32.mrb[22].mxu1 }
 0x19d   : > { %v1556_v30 = vmul.f32 %v2339_v10, %v3412_v54  ;;  %v1497_v48 = vpop.f32.mrb[2].mxu0  ;;  %v2341_v1 = vadd.f32 %v2340_v16, %v1521_v32  ;;  %v2311_v8 = vpop.f32.mrb[23].mxu1 }
 0x19e   : > { %v1550_v13 = vmul.f32 %v2332_v33, %v3412_v54  ;;  %v2333_v49 = vadd.f32 %v1497_v48, %v734_v0  ;;  %v2299_v50 = vpop.f32.mrb[3].mxu0 }
 0x19f   : > { %v1573_v51 = vadd.f32 %v3417_v39, %v1556_v30  ;;  %v1557_v52 = vmul.f32 %v2341_v1, %v3412_v54 }
 0x1a0   : > { %v1567_v25 = vadd.f32 %v3417_v39, %v1550_v13  ;;  %v1551_v44 = vmul.f32 %v2333_v49, %v3412_v54 }
 0x1a1   : > { %v1583_v53 = vmax.f32 %v1573_v51, 0.0  ;;  %v1574_v41 = vadd.f32 %v3417_v39, %v1557_v52 }
 0x1a2   : > { %v1577_v55 = vmax.f32 %v1567_v25, 0.0  ;;  %v1568_v57 = vadd.f32 %v3417_v39, %v1551_v44  ;;  %v1526_v58 = vpop.f32.mrb[24].mxu1 }
 0x1a3   : > { %v1871_v59 = vpack.c.bf16 %v1583_v53, %v1583_v53  ;;  %v1584_v63 = vmax.f32 %v1574_v41, 0.0  ;;  %v1502_v17 = vpop.f32.mrb[4].mxu0  ;;  %v2343_v37 = vadd.f32 %v2342_v35, %v1526_v58  ;;  %v2314_v9 = vpop.f32.mrb[25].mxu1 }
 0x1a4   : > { %v1865_v45 = vpack.c.bf16 %v1577_v55, %v1577_v55  ;;  %v1578_v60 = vmax.f32 %v1568_v57, 0.0  ;;  %v2334_v47 = vadd.f32 %v1502_v17, %v3401_v6  ;;  %v2302_v5 = vpop.f32.mrb[5].mxu0  ;;  %v1529_v0 = vpop.f32.mrb[26].mxu1 }
 0x1a5   : > { %1634 = vst.msk [vmem:[%s3430_s13 + $0x18] sm:$0xf] %vm1627_vm7, %v1871_v59  ;;  %v1872_v2 = vpack.c.bf16 %v1584_v63, %v1584_v63  ;;  %v1558_v34 = vmul.f32 %v2343_v37, %v3412_v54  ;;  %v1505_v61 = vpop.f32.mrb[6].mxu0  ;;  %v2345_v36 = vadd.f32 %v2344_v26, %v1529_v0  ;;  %v2315_v62 = vpop.f32.mrb[27].mxu1 }
 0x1a6   : > { %1628 = vst.msk [vmem:[%s3430_s13] sm:$0xf] %vm1627_vm7, %v1865_v45  ;;  %v1866_v23 = vpack.c.bf16 %v1578_v60, %v1578_v60  ;;  %v1552_v3 = vmul.f32 %v2334_v47, %v3412_v54  ;;  %v2335_v28 = vadd.f32 %v1505_v61, %v3403_v29  ;;  %v2303_v38 = vpop.f32.mrb[7].mxu0 }
 0x1a7   : > { %1635 = vst.msk [vmem:[%s3430_s13 + $0x1c] sm:$0xf] %vm1627_vm7, %v1872_v2  ;;  %v1575_v6 = vadd.f32 %v3417_v39, %v1558_v34  ;;  %v1559_v56 = vmul.f32 %v2345_v36, %v3412_v54 }
 0x1a8   : > { %1629 = vst.msk [vmem:[%s3430_s13 + $0x4] sm:$0xf] %vm1627_vm7, %v1866_v23  ;;  %v1569_v11 = vadd.f32 %v3417_v39, %v1552_v3  ;;  %v1553_v12 = vmul.f32 %v2335_v28, %v3412_v54 }
 0x1a9   : > { %v1585_v15 = vmax.f32 %v1575_v6, 0.0  ;;  %v1576_v16 = vadd.f32 %v3417_v39, %v1559_v56 }
 0x1aa   : > { %v1579_v42 = vmax.f32 %v1569_v11, 0.0  ;;  %v1570_v29 = vadd.f32 %v3417_v39, %v1553_v12 }
 0x1ab   : > { %v1873_v18 = vpack.c.bf16 %v1585_v15, %v1585_v15  ;;  %v1586_v19 = vmax.f32 %v1576_v16, 0.0  ;;  %v1510_v4 = vpop.f32.mrb[8].mxu0 }
 0x1ac   : > { %v1867_v35 = vpack.c.bf16 %v1579_v42, %v1579_v42  ;;  %v1580_v14 = vmax.f32 %v1570_v29, 0.0  ;;  %v2336_v20 = vadd.f32 %v1510_v4, %v3405_v40  ;;  %v2306_v22 = vpop.f32.mrb[9].mxu0 }
 0x1ad   : > { %1636 = vst.msk [vmem:[%s3430_s13 + $0x20] sm:$0xf] %vm1627_vm7, %v1873_v18  ;;  %v1874_v24 = vpack.c.bf16 %v1586_v19, %v1586_v19  ;;  %v1513_v26 = vpop.f32.mrb[10].mxu0 }
 0x1ae   : > { %1630 = vst.msk [vmem:[%s3430_s13 + $0x8] sm:$0xf] %vm1627_vm7, %v1867_v35  ;;  %v1868_v27 = vpack.c.bf16 %v1580_v14, %v1580_v14  ;;  %v1554_v21 = vmul.f32 %v2336_v20, %v3412_v54  ;;  %v2337_v31 = vadd.f32 %v1513_v26, %v3407_v7  ;;  %v2307_v10 = vpop.f32.mrb[11].mxu0 }
 0x1af   : > { %1637 = vst.msk [vmem:[%s3430_s13 + $0x24] sm:$0xf] %vm1627_vm7, %v1874_v24 }
 0x1b0   : > { %1631 = vst.msk [vmem:[%s3430_s13 + $0xc] sm:$0xf] %vm1627_vm7, %v1868_v27  ;;  %v1571_v40 = vadd.f32 %v3417_v39, %v1554_v21  ;;  %v1555_v46 = vmul.f32 %v2337_v31, %v3412_v54 }
 0x1b2   : > { %v1581_v33 = vmax.f32 %v1571_v40, 0.0  ;;  %v1572_v43 = vadd.f32 %v3417_v39, %v1555_v46 }
 0x1b4   : > { %v1869_v32 = vpack.c.bf16 %v1581_v33, %v1581_v33  ;;  %v1582_v30 = vmax.f32 %v1572_v43, 0.0 }
 0x1b6   : > { %1632 = vst.msk [vmem:[%s3430_s13 + $0x10] sm:$0xf] %vm1627_vm7, %v1869_v32  ;;  %v1870_v48 = vpack.c.bf16 %v1582_v30, %v1582_v30 }
 0x1b8   : > { %1633 = vst.msk [vmem:[%s3430_s13 + $0x14] sm:$0xf] %vm1627_vm7, %v1870_v48 }
 0x1b9 PF: > { %s14_s15 = sadd.s32 1, %s2519_s15  }
 0x1ba   : > { %p11_p4 = scmp.ge.s32.totalorder %s14_s15, 4  }
 0x1bc   :  { %13 = sbr.rel (!%p11_p4) target bundleno = 1 (0x1), region = 74 }

// kernel: tg_forward.15
= control target key start
LH: loop header
LB: loop body
LE: loop exit
PB: predicated region body
PF: predicated region fallthrough
CT: control target
= control target key end

     0   :  { %s523_s12 = smov 0   ;;  %s569_s0 = inlined_call_operand.vmem [shape: f32[32,8], index: 0, kind: input, shape index: {}]   ;;  %s570_s1 = inlined_call_operand.vmem [shape: f32[24,96], index: 1, kind: input, shape index: {}]   ;;  %s571_s2 = inlined_call_operand.vmem [shape: f32[2,8,24], index: 2, kind: input, shape index: {}]   ;;  %s572_s3 = inlined_call_operand.vmem [shape: f32[2,32,96], index: 3, kind: output, shape index: {}]  }
   0x1 LB: > { %s432_s13 = sadd.s32 4294967295, %s501_s12   ;;  %p436_p0 = scmp.ge.s32.totalorder %s501_s12, 1  ;;  %s501_s12 = sphi %s523_s12, %s13_s12  }
   0x2   : > { %p136_p1 = scmp.lt.s32.totalorder %s501_s12, 3 }
   0x4   : > { %p137_p2 = pnand %p436_p0, %p136_p1 }
   0x5   : > { %p159_p3 = scmp.lt.s32.totalorder (!%p137_p2), %s432_s13, 1  ;;  %v169_v0 = vld [vmem:[%s569_s0] sm:$0xff] (!%p137_p2)  ;;  %vm173_vm0 = vcmask (!%p137_p2), 64512   ;;  %v272_v2 = vld [vmem:[%s570_s1 + $0x8] sm:$0xff] (!%p137_p2)  ;;  %v171_v6 = vld [vmem:[%s569_s0 + $0x10] sm:$0xff] (!%p137_p2)  ;;  %vm274_vm1 = vcmask (!%p137_p2), 195584  }
   0x6   : > { %140 = sbr.rel (%p137_p2) target bundleno = 451 (0x1c3), region = 32  ;;  %465 = vmatprep.mubr.msk.f32.mxu0 (!%p137_p2), %vm173_vm0, %v169_v0  ;;  %v271_v1 = vld [vmem:[%s570_s1] sm:$0xff] (!%p137_p2)  ;;  %v170_v5 = vld [vmem:[%s569_s0 + $0x8] sm:$0xff] (!%p137_p2)  ;;  %v172_v7 = vld [vmem:[%s569_s0 + $0x18] sm:$0xff] (!%p137_p2)  ;;  %vm372_vm2 = vcmask (!%p137_p2), 785408  }
   0x7   : > { %v483_v3 = vpack.c.bf16 (!%p137_p2), %v272_v2, %v271_v1  ;;  %v273_v8 = vld [vmem:[%s570_s1 + $0x10] sm:$0xff] (!%p137_p2) }
   0x9   : > { %484 = vmatprep.subr.bf16.mxu1 (!%p137_p2), %v483_v3 }
   0xa   : > { %486 = vmatpush3.bf16.msra.mxu1 (!%p137_p2), %v483_v3 }
   0xb   : > { %475 = vmatprep.subr.mxu1 (!%p137_p2), %v273_v8 }
   0xd   : > { %s574_s13 = smov (!%p159_p3, %s432_s13), 1 }
   0xe   : > { %s437_s20 = sshll.u32 %s574_s13, 3  ;;  %476 = vmatpush3.msra.mxu1 %v273_v8  ;;  %s450_s5 = sshll.u32 %s574_s13, 5 }
   0xf   : > { %s162_s23 = scalar_lea.vmem %s571_s2, %s437_s20  ;;  %s167_s8 = scalar_lea.vmem %s572_s3, %s450_s5 }
  0x10   : > { %v168_v4 = vld [vmem:[%s162_s23] sm:$0xff] }
  0x11   : > { %463 = vmatprep.subr.mxu0 %v168_v4 }
  0x12   : > { %464 = vmatpush3.msra.mxu0 %v168_v4 }
  0x13   : > { %466 = vmatmul.mubr.msk.f32.vlgmr.msra.gmra.mrb[0].mxu0 %vm173_vm0, %v170_v5 }
  0x14   : > { %468 = vmatprep.mubr.msk.f32.mxu0 %vm173_vm0, %v171_v6 }
  0x17   : > { %469 = vmatmul.mubr.msk.f32.gmra.mrb[2].mxu0 %vm173_vm0, %v172_v7 }
  0xe6   : > { %v467_v9 = vpop.f32.mrb[0].mxu0 }
  0xe7   : > { %v252_v10 = vpop.f32.mrb[1].mxu0 }
  0xe8   : > { %477 = vmatprep.mubr.msk.f32.mxu1 %vm274_vm1, %v252_v10 }
  0xe9   : > { %478 = vmatmul.mubr.msk.f32.vlgmr.msra.gmra.mrb[0].mxu1 %vm274_vm1, %v467_v9 }
  0xea   : > { %v470_v11 = vpop.f32.mrb[2].mxu0 }
  0xeb   : > { %v262_v12 = vpop.f32.mrb[3].mxu0 }
  0xec   : > { %480 = vmatprep.mubr.msk.f32.mxu1 %vm274_vm1, %v262_v12 }
  0xed   : > { %481 = vmatmul.mubr.msk.f32.gmra.mrb[2].mxu1 %vm274_vm1, %v470_v11 }
 0x1bc   : > { %v479_v13 = vpop.f32.mrb[0].mxu1 }
 0x1bd   : > { %374 = vst.msk [vmem:[%s167_s8 + $0x8] sm:$0xff] %vm372_vm2, %v479_v13  ;;  %v353_v14 = vpop.f32.mrb[1].mxu1 }
 0x1be   : > { %373 = vst.msk [vmem:[%s167_s8] sm:$0xff] %vm372_vm2, %v353_v14 }
 0x1c0   : > { %v482_v15 = vpop.f32.mrb[2].mxu1 }
 0x1c1   : > { %376 = vst.msk [vmem:[%s167_s8 + $0x18] sm:$0xff] %vm372_vm2, %v482_v15  ;;  %v363_v16 = vpop.f32.mrb[3].mxu1 }
 0x1c2   : > { %375 = vst.msk [vmem:[%s167_s8 + $0x10] sm:$0xff] %vm372_vm2, %v363_v16 }
 0x1c3 PF: > { %s13_s12 = sadd.s32 1, %s501_s12  }
 0x1c4   : > { %p10_p4 = scmp.ge.s32.totalorder %s13_s12, 4  }
 0x1c6   :  { %12 = sbr.rel (!%p10_p4) target bundleno = 1 (0x1), region = 62 }

</bundles_post_ra>
